<compile_context>
chip_gen: v6e
topology: v6e:2x2x1
jax: 0.10.0
libtpu: 0.0.40
codegen_flags: <defaults>
</compile_context>

<pallas_src>
import functools

import jax
import jax.numpy as jnp
from jax.experimental import pallas as pl
from jax.experimental.pallas import tpu as pltpu


BATCH_BLOCK = 8   # batch is padded to a multiple of this; fused-fc block height


# ---------------------------------------------------------------------------
# helpers
# ---------------------------------------------------------------------------
def _round_up(x, m):
    return ((x + m - 1) // m) * m


def _choose_tm(m, cap=512):
    """Largest row tile <= cap that divides m (m is always a multiple of 8)."""
    if m <= cap:
        return m
    for t in (cap, 256, 128, 64, 32, 16, 8):
        if m % t == 0:
            return t
    return m


# ---------------------------------------------------------------------------
# Pallas kernel 1: single-shot GEMM + bias + ReLU (conv layers as im2col GEMM)
# ---------------------------------------------------------------------------
def _gemm_bias_relu_kernel(x_ref, w_ref, b_ref, o_ref):
    acc = jnp.dot(x_ref[...], w_ref[...], preferred_element_type=jnp.float32)
    o_ref[...] = jnp.maximum(acc + b_ref[...], 0.0).astype(o_ref.dtype)


def conv_gemm_bias_relu(x, w, b, out_dtype=jnp.bfloat16):
    """(M, K) @ (K, N) + b, ReLU.  Full-K/full-N block, M tiled (parallel)."""
    m, k = x.shape
    n = w.shape[1]
    tm = _choose_tm(m)
    return pl.pallas_call(
        _gemm_bias_relu_kernel,
        grid=(m // tm,),
        in_specs=[
            pl.BlockSpec((tm, k), lambda i: (i, 0)),
            pl.BlockSpec((k, n), lambda i: (0, 0)),
            pl.BlockSpec((1, n), lambda i: (0, 0)),
        ],
        out_specs=pl.BlockSpec((tm, n), lambda i: (i, 0)),
        out_shape=jax.ShapeDtypeStruct((m, n), out_dtype),
        compiler_params=pltpu.CompilerParams(
            dimension_semantics=("parallel",)),
    )(x, w, b)


# ---------------------------------------------------------------------------
# Pallas kernel 2: fused conv3-GEMM + flatten + fc1(+ReLU) + fc2
# ---------------------------------------------------------------------------
def _conv3_fc_kernel(col3_ref, w3_ref, b3_ref, w1_ref, b1_ref, w2_ref, b2_ref,
                     o_ref, *, p2, bblk):
    c3 = w3_ref.shape[1]
    hid = w1_ref.shape[1]

    # conv3 GEMM + bias + ReLU; rows ordered (spatial position, sample).
    y3 = jnp.dot(col3_ref[...], w3_ref[...], preferred_element_type=jnp.float32)
    y3 = jnp.maximum(y3 + b3_ref[...], 0.0)            # (p2*bblk, c3) f32

    # fc1: the torch CHW flatten is folded into a sum of per-position GEMMs;
    # W1 rows are pre-permuted so row (p*c3 + c) matches torch column c*p2 + p.
    # Slices are 8-row / 64-row aligned -> no relayout copies.
    h = jnp.zeros((bblk, hid), jnp.float32)
    for p in range(p2):
        a = y3[p * bblk:(p + 1) * bblk, :].astype(jnp.bfloat16)     # (bblk, c3)
        h = h + jnp.dot(a, w1_ref[p * c3:(p + 1) * c3, :],
                        preferred_element_type=jnp.float32)
    h = jnp.maximum(h + b1_ref[...], 0.0).astype(jnp.bfloat16)      # (bblk, 512)

    # fc2 (no activation)
    out = jnp.dot(h, w2_ref[...], preferred_element_type=jnp.float32)
    o_ref[...] = out + b2_ref[...]


def conv3_fc_fused(col3, w3, b3, w1, b1, w2, b2, *, p2, bblk):
    rows, k3 = col3.shape
    bo = rows // (p2 * bblk)
    c3 = w3.shape[1]
    hid = w1.shape[1]
    out_dim = w2.shape[1]
    return pl.pallas_call(
        functools.partial(_conv3_fc_kernel, p2=p2, bblk=bblk),
        grid=(bo,),
        in_specs=[
            pl.BlockSpec((p2 * bblk, k3), lambda i: (i, 0)),
            pl.BlockSpec((k3, c3), lambda i: (0, 0)),
            pl.BlockSpec((1, c3), lambda i: (0, 0)),
            pl.BlockSpec((p2 * c3, hid), lambda i: (0, 0)),
            pl.BlockSpec((1, hid), lambda i: (0, 0)),
            pl.BlockSpec((hid, out_dim), lambda i: (0, 0)),
            pl.BlockSpec((1, out_dim), lambda i: (0, 0)),
        ],
        out_specs=pl.BlockSpec((bblk, out_dim), lambda i: (i, 0)),
        out_shape=jax.ShapeDtypeStruct((bo * bblk, out_dim), jnp.float32),
        compiler_params=pltpu.CompilerParams(
            dimension_semantics=("parallel",)),
    )(col3, w3, b3, w1, b1, w2, b2)


# ---------------------------------------------------------------------------
# im2col patch extraction (XLA glue, fused under jit)
# ---------------------------------------------------------------------------
def _im2col(x_nhwc, kh, kw, stride, pad):
    # TODO(synk): fuse this patch extraction into the GEMM kernel (in-kernel
    # windows over a VMEM-resident NHWC block) to remove the kh*kw/stride^2
    # HBM read amplification of the materialized col matrix.
    n, h, w, c = x_nhwc.shape
    xp = jnp.pad(x_nhwc, ((0, 0), (pad, pad), (pad, pad), (0, 0)))
    oh = (h + 2 * pad - kh) // stride + 1
    ow = (w + 2 * pad - kw) // stride + 1
    patches = [xp[:, i:i + stride * oh:stride, j:j + stride * ow:stride, :]
               for i in range(kh) for j in range(kw)]
    col = jnp.concatenate(patches, axis=-1)        # features ordered (kh, kw, c)
    return col.reshape(n * oh * ow, kh * kw * c), oh, ow


# ---------------------------------------------------------------------------
# Parameters
# ---------------------------------------------------------------------------
def init_params(key, input_size, input_frames, output_size):
    ks = jax.random.split(key, 10)

    def winit(k, shape, fan_in):
        bound = 1.0 / jnp.sqrt(fan_in)
        return jax.random.uniform(k, shape, jnp.float32, -bound, bound)

    num_fc1 = (input_size // 8) * (input_size // 8) * 64
    return {
        "conv1_w": winit(ks[0], (32, input_frames, 8, 8), input_frames * 64),
        "conv1_b": winit(ks[1], (32,), input_frames * 64),
        "conv2_w": winit(ks[2], (64, 32, 4, 4), 32 * 16),
        "conv2_b": winit(ks[3], (64,), 32 * 16),
        "conv3_w": winit(ks[4], (64, 64, 3, 3), 64 * 9),
        "conv3_b": winit(ks[5], (64,), 64 * 9),
        "fc1_w": winit(ks[6], (512, num_fc1), num_fc1),
        "fc1_b": winit(ks[7], (512,), num_fc1),
        "fc2_w": winit(ks[8], (output_size, 512), 512),
        "fc2_b": winit(ks[9], (output_size,), 512),
    }


def prepare_params(params, input_size):
    """One-time weight re-layout + bf16 cast (zero cost per forward):
    conv weights -> (kh*kw*cin, cout) rows matching the (kh, kw, c) patch
    order; fc weights pre-transposed to (K, N); fc1 rows permuted so row
    p*64+c picks torch column c*P2+p (NHWC flatten == torch CHW flatten);
    biases stored as f32 (1, N)."""
    def conv_mat(w):                       # (O, I, kh, kw) -> rows (kh, kw, I)
        o, i, kh, kw = w.shape
        return jnp.transpose(w, (2, 3, 1, 0)).reshape(kh * kw * i, o)

    def bias(b):
        return b.astype(jnp.float32).reshape(1, -1)

    h3 = input_size // 8
    c3 = params["conv3_w"].shape[0]
    fc1_w = params["fc1_w"].reshape(-1, c3, h3, h3).transpose(0, 2, 3, 1)
    fc1_w = fc1_w.reshape(fc1_w.shape[0], h3 * h3 * c3)   # cols ordered (p, c)

    return {
        "c1_w": conv_mat(params["conv1_w"]).astype(jnp.bfloat16),
        "c1_b": bias(params["conv1_b"]),
        "c2_w": conv_mat(params["conv2_w"]).astype(jnp.bfloat16),
        "c2_b": bias(params["conv2_b"]),
        "c3_w": conv_mat(params["conv3_w"]).astype(jnp.bfloat16),
        "c3_b": bias(params["conv3_b"]),
        "fc1_w": jnp.transpose(fc1_w).astype(jnp.bfloat16),            # (P2*64, 512)
        "fc1_b": bias(params["fc1_b"]),
        "fc2_w": jnp.transpose(params["fc2_w"]).astype(jnp.bfloat16),  # (512, out)
        "fc2_b": bias(params["fc2_b"]),
    }


# ---------------------------------------------------------------------------
# ModelOpenAI forward (jitted): 3 Pallas launches total
# ---------------------------------------------------------------------------
@jax.jit
def model_openai_forward(prepared, x_nchw):
    n = x_nchw.shape[0]
    npad = _round_up(n, BATCH_BLOCK)
    if npad != n:
        x_nchw = jnp.pad(x_nchw, ((0, npad - n), (0, 0), (0, 0), (0, 0)))

    x = jnp.transpose(x_nchw, (0, 2, 3, 1)).astype(jnp.bfloat16)   # NHWC bf16

    # conv1: 8x8 / stride 4 / pad 2
    col1, oh1, ow1 = _im2col(x, 8, 8, 4, 2)
    y1 = conv_gemm_bias_relu(col1, prepared["c1_w"], prepared["c1_b"])
    y1 = y1.reshape(npad, oh1, ow1, -1)

    # conv2: 4x4 / stride 2 / pad 1
    col2, oh2, ow2 = _im2col(y1, 4, 4, 2, 1)
    y2 = conv_gemm_bias_relu(col2, prepared["c2_w"], prepared["c2_b"])
    y2 = y2.reshape(npad, oh2, ow2, -1)

    # conv3 (3x3 / stride 1 / pad 1) + flatten + fc1 + fc2, fused in one kernel
    col3, oh3, ow3 = _im2col(y2, 3, 3, 1, 1)
    p2 = oh3 * ow3
    k3 = col3.shape[1]
    # reorder rows to (batch-block, spatial position, sample) so the fused
    # kernel only needs aligned static slices to perform the flatten.
    col3 = col3.reshape(npad // BATCH_BLOCK, BATCH_BLOCK, p2, k3)
    col3 = jnp.transpose(col3, (0, 2, 1, 3)).reshape(npad * p2, k3)

    out = conv3_fc_fused(col3, prepared["c3_w"], prepared["c3_b"],
                         prepared["fc1_w"], prepared["fc1_b"],
                         prepared["fc2_w"], prepared["fc2_b"],
                         p2=p2, bblk=BATCH_BLOCK)
    return out[:n]


# ---------------------------------------------------------------------------
# Pure-JAX f32 reference (PyTorch semantics) -- validation only
# ---------------------------------------------------------------------------
def reference_forward(params, x):
    def conv(x, w, b, stride, pad):
        y = jax.lax.conv_general_dilated(
            x, w, (stride, stride), [(pad, pad), (pad, pad)],
            dimension_numbers=("NCHW", "OIHW", "NCHW"))
        return jax.nn.relu(y + b[None, :, None, None])

    x = conv(x, params["conv1_w"], params["conv1_b"], 4, 2)
    x = conv(x, params["conv2_w"], params["conv2_b"], 2, 1)
    x = conv(x, params["conv3_w"], params["conv3_b"], 1, 1)
    x = x.reshape(x.shape[0], -1)
    x = jax.nn.relu(x @ params["fc1_w"].T + params["fc1_b"])
    return x @ params["fc2_w"].T + params["fc2_b"]


if __name__ == "__main__":
    input_size, input_frames, output_size, batch = 32, 4, 6, 2

    key = jax.random.PRNGKey(0)
    pkey, xkey = jax.random.split(key)
    params = init_params(pkey, input_size, input_frames, output_size)
    prepared = prepare_params(params, input_size)
    x = jax.random.normal(
        xkey, (batch, input_frames, input_size, input_size), jnp.float32)

    out = model_openai_forward(prepared, x)
    jax.block_until_ready(out)
    assert out.shape == (batch, output_size), out.shape

    # Sanity check vs. f32 reference (bf16 MXU operands => loose tolerance).
    ref = reference_forward(params, x)
    err = float(jnp.max(jnp.abs(out - ref)))
    scale = float(jnp.max(jnp.abs(ref))) + 1e-6
    assert err <= 0.08 * scale + 0.02, ("numerical mismatch", err, scale)

    print("KERNEL_OK")
</pallas_src>

<mosaic_0001>
module attributes {stable_mosaic.version = 11 : i64} {
  func.func @_gemm_bias_relu_kernel(%arg0: i32, %arg1: memref<512x256xbf16, #tpu.memory_space<vmem>>, %arg2: memref<256x32xbf16, #tpu.memory_space<vmem>>, %arg3: memref<1x32xf32, #tpu.memory_space<vmem>>, %arg4: memref<512x32xbf16, #tpu.memory_space<vmem>>) attributes {dimension_semantics = [#tpu.dimension_semantics<parallel>], iteration_bounds = array<i64: 1>, scalar_prefetch = 0 : i64, scratch_operands = 0 : i64, tpu.core_type = #tpu.core_type<tc>, window_params = [{transform_indices = @transform_0, window_bounds = array<i64: 512, 256>}, {pipeline_mode = #tpu.pipeline_mode<synchronous>, transform_indices = @transform_1, window_bounds = array<i64: 256, 32>}, {pipeline_mode = #tpu.pipeline_mode<synchronous>, transform_indices = @transform_2, window_bounds = array<i64: 1, 32>}, {transform_indices = @transform_3, window_bounds = array<i64: 512, 32>}]} {
    %c0 = arith.constant 0 : index
    %c0_0 = arith.constant 0 : index
    %0 = vector.load %arg1[%c0, %c0_0] : memref<512x256xbf16, #tpu.memory_space<vmem>>, vector<512x256xbf16>
    %c0_1 = arith.constant 0 : index
    %c0_2 = arith.constant 0 : index
    %1 = vector.load %arg2[%c0_1, %c0_2] : memref<256x32xbf16, #tpu.memory_space<vmem>>, vector<256x32xbf16>
    %cst = arith.constant dense<0.000000e+00> : vector<512x32xf32>
    %2 = tpu.matmul %0, %1, %cst {dimension_numbers = #tpu.dot_dimension_numbers<[1], [0], [0], [1], [0, 0, 1, 1], [], []>} : vector<512x256xbf16>, vector<256x32xbf16>, vector<512x32xf32> -> vector<512x32xf32>
    %c0_3 = arith.constant 0 : index
    %c0_4 = arith.constant 0 : index
    %3 = vector.load %arg3[%c0_3, %c0_4] : memref<1x32xf32, #tpu.memory_space<vmem>>, vector<1x32xf32>
    %4 = vector.broadcast %3 : vector<1x32xf32> to vector<512x32xf32>
    %5 = arith.addf %2, %4 : vector<512x32xf32>
    %cst_5 = arith.constant 0.000000e+00 : f32
    %6 = vector.broadcast %cst_5 : f32 to vector<512x32xf32>
    %7 = arith.maximumf %5, %6 : vector<512x32xf32>
    %8 = arith.truncf %7 : vector<512x32xf32> to vector<512x32xbf16>
    %c0_6 = arith.constant 0 : index
    %c0_7 = arith.constant 0 : index
    %9 = vector.load %arg4[%c0_6, %c0_7] : memref<512x32xbf16, #tpu.memory_space<vmem>>, vector<512x32xbf16>
    tpu.vector_store %arg4[%c0_6, %c0_7], %8 {strides = array<i32>} : memref<512x32xbf16, #tpu.memory_space<vmem>>, vector<512x32xbf16>,
    return
  }
  func.func @transform_0(%arg0: i32) -> (i32, i32) {
    %c0_i32 = arith.constant 0 : i32
    %c0_i32_0 = arith.constant 0 : i32
    return %arg0, %c0_i32 : i32, i32
  }
  func.func @transform_1(%arg0: i32) -> (i32, i32) {
    %c0_i32 = arith.constant 0 : i32
    %c0_i32_0 = arith.constant 0 : i32
    %c0_i32_1 = arith.constant 0 : i32
    return %c0_i32, %c0_i32_0 : i32, i32
  }
  func.func @transform_2(%arg0: i32) -> (i32, i32) {
    %c0_i32 = arith.constant 0 : i32
    %c0_i32_0 = arith.constant 0 : i32
    %c0_i32_1 = arith.constant 0 : i32
    return %c0_i32, %c0_i32_0 : i32, i32
  }
  func.func @transform_3(%arg0: i32) -> (i32, i32) {
    %c0_i32 = arith.constant 0 : i32
    %c0_i32_0 = arith.constant 0 : i32
    return %arg0, %c0_i32 : i32, i32
  }
}

module attributes {stable_mosaic.version = 11 : i64} {
  func.func @_gemm_bias_relu_kernel(%arg0: i32, %arg1: memref<128x512xbf16, #tpu.memory_space<vmem>>, %arg2: memref<512x64xbf16, #tpu.memory_space<vmem>>, %arg3: memref<1x64xf32, #tpu.memory_space<vmem>>, %arg4: memref<128x64xbf16, #tpu.memory_space<vmem>>) attributes {dimension_semantics = [#tpu.dimension_semantics<parallel>], iteration_bounds = array<i64: 1>, scalar_prefetch = 0 : i64, scratch_operands = 0 : i64, tpu.core_type = #tpu.core_type<tc>, window_params = [{transform_indices = @transform_0, window_bounds = array<i64: 128, 512>}, {pipeline_mode = #tpu.pipeline_mode<synchronous>, transform_indices = @transform_1, window_bounds = array<i64: 512, 64>}, {pipeline_mode = #tpu.pipeline_mode<synchronous>, transform_indices = @transform_2, window_bounds = array<i64: 1, 64>}, {transform_indices = @transform_3, window_bounds = array<i64: 128, 64>}]} {
    %c0 = arith.constant 0 : index
    %c0_0 = arith.constant 0 : index
    %0 = vector.load %arg1[%c0, %c0_0] : memref<128x512xbf16, #tpu.memory_space<vmem>>, vector<128x512xbf16>
    %c0_1 = arith.constant 0 : index
    %c0_2 = arith.constant 0 : index
    %1 = vector.load %arg2[%c0_1, %c0_2] : memref<512x64xbf16, #tpu.memory_space<vmem>>, vector<512x64xbf16>
    %cst = arith.constant dense<0.000000e+00> : vector<128x64xf32>
    %2 = tpu.matmul %0, %1, %cst {dimension_numbers = #tpu.dot_dimension_numbers<[1], [0], [0], [1], [0, 0, 1, 1], [], []>} : vector<128x512xbf16>, vector<512x64xbf16>, vector<128x64xf32> -> vector<128x64xf32>
    %c0_3 = arith.constant 0 : index
    %c0_4 = arith.constant 0 : index
    %3 = vector.load %arg3[%c0_3, %c0_4] : memref<1x64xf32, #tpu.memory_space<vmem>>, vector<1x64xf32>
    %4 = vector.broadcast %3 : vector<1x64xf32> to vector<128x64xf32>
    %5 = arith.addf %2, %4 : vector<128x64xf32>
    %cst_5 = arith.constant 0.000000e+00 : f32
    %6 = vector.broadcast %cst_5 : f32 to vector<128x64xf32>
    %7 = arith.maximumf %5, %6 : vector<128x64xf32>
    %8 = arith.truncf %7 : vector<128x64xf32> to vector<128x64xbf16>
    %c0_6 = arith.constant 0 : index
    %c0_7 = arith.constant 0 : index
    %9 = vector.load %arg4[%c0_6, %c0_7] : memref<128x64xbf16, #tpu.memory_space<vmem>>, vector<128x64xbf16>
    tpu.vector_store %arg4[%c0_6, %c0_7], %8 {strides = array<i32>} : memref<128x64xbf16, #tpu.memory_space<vmem>>, vector<128x64xbf16>,
    return
  }
  func.func @transform_0(%arg0: i32) -> (i32, i32) {
    %c0_i32 = arith.constant 0 : i32
    %c0_i32_0 = arith.constant 0 : i32
    return %arg0, %c0_i32 : i32, i32
  }
  func.func @transform_1(%arg0: i32) -> (i32, i32) {
    %c0_i32 = arith.constant 0 : i32
    %c0_i32_0 = arith.constant 0 : i32
    %c0_i32_1 = arith.constant 0 : i32
    return %c0_i32, %c0_i32_0 : i32, i32
  }
  func.func @transform_2(%arg0: i32) -> (i32, i32) {
    %c0_i32 = arith.constant 0 : i32
    %c0_i32_0 = arith.constant 0 : i32
    %c0_i32_1 = arith.constant 0 : i32
    return %c0_i32, %c0_i32_0 : i32, i32
  }
  func.func @transform_3(%arg0: i32) -> (i32, i32) {
    %c0_i32 = arith.constant 0 : i32
    %c0_i32_0 = arith.constant 0 : i32
    return %arg0, %c0_i32 : i32, i32
  }
}

module attributes {stable_mosaic.version = 11 : i64} {
  func.func @_conv3_fc_kernel(%arg0: i32, %arg1: memref<128x576xbf16, #tpu.memory_space<vmem>>, %arg2: memref<576x64xbf16, #tpu.memory_space<vmem>>, %arg3: memref<1x64xf32, #tpu.memory_space<vmem>>, %arg4: memref<1024x512xbf16, #tpu.memory_space<vmem>>, %arg5: memref<1x512xf32, #tpu.memory_space<vmem>>, %arg6: memref<512x6xbf16, #tpu.memory_space<vmem>>, %arg7: memref<1x6xf32, #tpu.memory_space<vmem>>, %arg8: memref<8x6xf32, #tpu.memory_space<vmem>>) attributes {dimension_semantics = [#tpu.dimension_semantics<parallel>], iteration_bounds = array<i64: 1>, scalar_prefetch = 0 : i64, scratch_operands = 0 : i64, tpu.core_type = #tpu.core_type<tc>, window_params = [{transform_indices = @transform_0, window_bounds = array<i64: 128, 576>}, {pipeline_mode = #tpu.pipeline_mode<synchronous>, transform_indices = @transform_1, window_bounds = array<i64: 576, 64>}, {pipeline_mode = #tpu.pipeline_mode<synchronous>, transform_indices = @transform_2, window_bounds = array<i64: 1, 64>}, {pipeline_mode = #tpu.pipeline_mode<synchronous>, transform_indices = @transform_3, window_bounds = array<i64: 1024, 512>}, {pipeline_mode = #tpu.pipeline_mode<synchronous>, transform_indices = @transform_4, window_bounds = array<i64: 1, 512>}, {pipeline_mode = #tpu.pipeline_mode<synchronous>, transform_indices = @transform_5, window_bounds = array<i64: 512, 6>}, {pipeline_mode = #tpu.pipeline_mode<synchronous>, transform_indices = @transform_6, window_bounds = array<i64: 1, 6>}, {transform_indices = @transform_7, window_bounds = array<i64: 8, 6>}]} {
    %c0 = arith.constant 0 : index
    %c0_0 = arith.constant 0 : index
    %0 = vector.load %arg1[%c0, %c0_0] : memref<128x576xbf16, #tpu.memory_space<vmem>>, vector<128x576xbf16>
    %c0_1 = arith.constant 0 : index
    %c0_2 = arith.constant 0 : index
    %1 = vector.load %arg2[%c0_1, %c0_2] : memref<576x64xbf16, #tpu.memory_space<vmem>>, vector<576x64xbf16>
    %cst = arith.constant dense<0.000000e+00> : vector<128x64xf32>
    %2 = tpu.matmul %0, %1, %cst {dimension_numbers = #tpu.dot_dimension_numbers<[1], [0], [0], [1], [0, 0, 1, 1], [], []>} : vector<128x576xbf16>, vector<576x64xbf16>, vector<128x64xf32> -> vector<128x64xf32>
    %c0_3 = arith.constant 0 : index
    %c0_4 = arith.constant 0 : index
    %3 = vector.load %arg3[%c0_3, %c0_4] : memref<1x64xf32, #tpu.memory_space<vmem>>, vector<1x64xf32>
    %4 = vector.broadcast %3 : vector<1x64xf32> to vector<128x64xf32>
    %5 = arith.addf %2, %4 : vector<128x64xf32>
    %cst_5 = arith.constant 0.000000e+00 : f32
    %6 = vector.broadcast %cst_5 : f32 to vector<128x64xf32>
    %7 = arith.maximumf %5, %6 : vector<128x64xf32>
    %cst_6 = arith.constant 0.000000e+00 : f32
    %8 = vector.broadcast %cst_6 : f32 to vector<8x512xf32>
    %9 = vector.extract_strided_slice %7 {offsets = [0, 0], sizes = [8, 64], strides = [1, 1]} : vector<128x64xf32> to vector<8x64xf32>
    %10 = arith.truncf %9 : vector<8x64xf32> to vector<8x64xbf16>
    %c0_7 = arith.constant 0 : index
    %c0_8 = arith.constant 0 : index
    %11 = vector.load %arg4[%c0_7, %c0_8] : memref<1024x512xbf16, #tpu.memory_space<vmem>>, vector<64x512xbf16>
    %cst_9 = arith.constant dense<0.000000e+00> : vector<8x512xf32>
    %12 = tpu.matmul %10, %11, %cst_9 {dimension_numbers = #tpu.dot_dimension_numbers<[1], [0], [0], [1], [0, 0, 1, 1], [], []>} : vector<8x64xbf16>, vector<64x512xbf16>, vector<8x512xf32> -> vector<8x512xf32>
    %13 = arith.addf %8, %12 : vector<8x512xf32>
    %14 = vector.extract_strided_slice %7 {offsets = [8, 0], sizes = [8, 64], strides = [1, 1]} : vector<128x64xf32> to vector<8x64xf32>
    %15 = arith.truncf %14 : vector<8x64xf32> to vector<8x64xbf16>
    %c64 = arith.constant 64 : index
    %c0_10 = arith.constant 0 : index
    %16 = vector.load %arg4[%c64, %c0_10] : memref<1024x512xbf16, #tpu.memory_space<vmem>>, vector<64x512xbf16>
    %cst_11 = arith.constant dense<0.000000e+00> : vector<8x512xf32>
    %17 = tpu.matmul %15, %16, %cst_11 {dimension_numbers = #tpu.dot_dimension_numbers<[1], [0], [0], [1], [0, 0, 1, 1], [], []>} : vector<8x64xbf16>, vector<64x512xbf16>, vector<8x512xf32> -> vector<8x512xf32>
    %18 = arith.addf %13, %17 : vector<8x512xf32>
    %19 = vector.extract_strided_slice %7 {offsets = [16, 0], sizes = [8, 64], strides = [1, 1]} : vector<128x64xf32> to vector<8x64xf32>
    %20 = arith.truncf %19 : vector<8x64xf32> to vector<8x64xbf16>
    %c128 = arith.constant 128 : index
    %c0_12 = arith.constant 0 : index
    %21 = vector.load %arg4[%c128, %c0_12] : memref<1024x512xbf16, #tpu.memory_space<vmem>>, vector<64x512xbf16>
    %cst_13 = arith.constant dense<0.000000e+00> : vector<8x512xf32>
    %22 = tpu.matmul %20, %21, %cst_13 {dimension_numbers = #tpu.dot_dimension_numbers<[1], [0], [0], [1], [0, 0, 1, 1], [], []>} : vector<8x64xbf16>, vector<64x512xbf16>, vector<8x512xf32> -> vector<8x512xf32>
    %23 = arith.addf %18, %22 : vector<8x512xf32>
    %24 = vector.extract_strided_slice %7 {offsets = [24, 0], sizes = [8, 64], strides = [1, 1]} : vector<128x64xf32> to vector<8x64xf32>
    %25 = arith.truncf %24 : vector<8x64xf32> to vector<8x64xbf16>
    %c192 = arith.constant 192 : index
    %c0_14 = arith.constant 0 : index
    %26 = vector.load %arg4[%c192, %c0_14] : memref<1024x512xbf16, #tpu.memory_space<vmem>>, vector<64x512xbf16>
    %cst_15 = arith.constant dense<0.000000e+00> : vector<8x512xf32>
    %27 = tpu.matmul %25, %26, %cst_15 {dimension_numbers = #tpu.dot_dimension_numbers<[1], [0], [0], [1], [0, 0, 1, 1], [], []>} : vector<8x64xbf16>, vector<64x512xbf16>, vector<8x512xf32> -> vector<8x512xf32>
    %28 = arith.addf %23, %27 : vector<8x512xf32>
    %29 = vector.extract_strided_slice %7 {offsets = [32, 0], sizes = [8, 64], strides = [1, 1]} : vector<128x64xf32> to vector<8x64xf32>
    %30 = arith.truncf %29 : vector<8x64xf32> to vector<8x64xbf16>
    %c256 = arith.constant 256 : index
    %c0_16 = arith.constant 0 : index
    %31 = vector.load %arg4[%c256, %c0_16] : memref<1024x512xbf16, #tpu.memory_space<vmem>>, vector<64x512xbf16>
    %cst_17 = arith.constant dense<0.000000e+00> : vector<8x512xf32>
    %32 = tpu.matmul %30, %31, %cst_17 {dimension_numbers = #tpu.dot_dimension_numbers<[1], [0], [0], [1], [0, 0, 1, 1], [], []>} : vector<8x64xbf16>, vector<64x512xbf16>, vector<8x512xf32> -> vector<8x512xf32>
    %33 = arith.addf %28, %32 : vector<8x512xf32>
    %34 = vector.extract_strided_slice %7 {offsets = [40, 0], sizes = [8, 64], strides = [1, 1]} : vector<128x64xf32> to vector<8x64xf32>
    %35 = arith.truncf %34 : vector<8x64xf32> to vector<8x64xbf16>
    %c320 = arith.constant 320 : index
    %c0_18 = arith.constant 0 : index
    %36 = vector.load %arg4[%c320, %c0_18] : memref<1024x512xbf16, #tpu.memory_space<vmem>>, vector<64x512xbf16>
    %cst_19 = arith.constant dense<0.000000e+00> : vector<8x512xf32>
    %37 = tpu.matmul %35, %36, %cst_19 {dimension_numbers = #tpu.dot_dimension_numbers<[1], [0], [0], [1], [0, 0, 1, 1], [], []>} : vector<8x64xbf16>, vector<64x512xbf16>, vector<8x512xf32> -> vector<8x512xf32>
    %38 = arith.addf %33, %37 : vector<8x512xf32>
    %39 = vector.extract_strided_slice %7 {offsets = [48, 0], sizes = [8, 64], strides = [1, 1]} : vector<128x64xf32> to vector<8x64xf32>
    %40 = arith.truncf %39 : vector<8x64xf32> to vector<8x64xbf16>
    %c384 = arith.constant 384 : index
    %c0_20 = arith.constant 0 : index
    %41 = vector.load %arg4[%c384, %c0_20] : memref<1024x512xbf16, #tpu.memory_space<vmem>>, vector<64x512xbf16>
    %cst_21 = arith.constant dense<0.000000e+00> : vector<8x512xf32>
    %42 = tpu.matmul %40, %41, %cst_21 {dimension_numbers = #tpu.dot_dimension_numbers<[1], [0], [0], [1], [0, 0, 1, 1], [], []>} : vector<8x64xbf16>, vector<64x512xbf16>, vector<8x512xf32> -> vector<8x512xf32>
    %43 = arith.addf %38, %42 : vector<8x512xf32>
    %44 = vector.extract_strided_slice %7 {offsets = [56, 0], sizes = [8, 64], strides = [1, 1]} : vector<128x64xf32> to vector<8x64xf32>
    %45 = arith.truncf %44 : vector<8x64xf32> to vector<8x64xbf16>
    %c448 = arith.constant 448 : index
    %c0_22 = arith.constant 0 : index
    %46 = vector.load %arg4[%c448, %c0_22] : memref<1024x512xbf16, #tpu.memory_space<vmem>>, vector<64x512xbf16>
    %cst_23 = arith.constant dense<0.000000e+00> : vector<8x512xf32>
    %47 = tpu.matmul %45, %46, %cst_23 {dimension_numbers = #tpu.dot_dimension_numbers<[1], [0], [0], [1], [0, 0, 1, 1], [], []>} : vector<8x64xbf16>, vector<64x512xbf16>, vector<8x512xf32> -> vector<8x512xf32>
    %48 = arith.addf %43, %47 : vector<8x512xf32>
    %49 = vector.extract_strided_slice %7 {offsets = [64, 0], sizes = [8, 64], strides = [1, 1]} : vector<128x64xf32> to vector<8x64xf32>
    %50 = arith.truncf %49 : vector<8x64xf32> to vector<8x64xbf16>
    %c512 = arith.constant 512 : index
    %c0_24 = arith.constant 0 : index
    %51 = vector.load %arg4[%c512, %c0_24] : memref<1024x512xbf16, #tpu.memory_space<vmem>>, vector<64x512xbf16>
    %cst_25 = arith.constant dense<0.000000e+00> : vector<8x512xf32>
    %52 = tpu.matmul %50, %51, %cst_25 {dimension_numbers = #tpu.dot_dimension_numbers<[1], [0], [0], [1], [0, 0, 1, 1], [], []>} : vector<8x64xbf16>, vector<64x512xbf16>, vector<8x512xf32> -> vector<8x512xf32>
    %53 = arith.addf %48, %52 : vector<8x512xf32>
    %54 = vector.extract_strided_slice %7 {offsets = [72, 0], sizes = [8, 64], strides = [1, 1]} : vector<128x64xf32> to vector<8x64xf32>
    %55 = arith.truncf %54 : vector<8x64xf32> to vector<8x64xbf16>
    %c576 = arith.constant 576 : index
    %c0_26 = arith.constant 0 : index
    %56 = vector.load %arg4[%c576, %c0_26] : memref<1024x512xbf16, #tpu.memory_space<vmem>>, vector<64x512xbf16>
    %cst_27 = arith.constant dense<0.000000e+00> : vector<8x512xf32>
    %57 = tpu.matmul %55, %56, %cst_27 {dimension_numbers = #tpu.dot_dimension_numbers<[1], [0], [0], [1], [0, 0, 1, 1], [], []>} : vector<8x64xbf16>, vector<64x512xbf16>, vector<8x512xf32> -> vector<8x512xf32>
    %58 = arith.addf %53, %57 : vector<8x512xf32>
    %59 = vector.extract_strided_slice %7 {offsets = [80, 0], sizes = [8, 64], strides = [1, 1]} : vector<128x64xf32> to vector<8x64xf32>
    %60 = arith.truncf %59 : vector<8x64xf32> to vector<8x64xbf16>
    %c640 = arith.constant 640 : index
    %c0_28 = arith.constant 0 : index
    %61 = vector.load %arg4[%c640, %c0_28] : memref<1024x512xbf16, #tpu.memory_space<vmem>>, vector<64x512xbf16>
    %cst_29 = arith.constant dense<0.000000e+00> : vector<8x512xf32>
    %62 = tpu.matmul %60, %61, %cst_29 {dimension_numbers = #tpu.dot_dimension_numbers<[1], [0], [0], [1], [0, 0, 1, 1], [], []>} : vector<8x64xbf16>, vector<64x512xbf16>, vector<8x512xf32> -> vector<8x512xf32>
    %63 = arith.addf %58, %62 : vector<8x512xf32>
    %64 = vector.extract_strided_slice %7 {offsets = [88, 0], sizes = [8, 64], strides = [1, 1]} : vector<128x64xf32> to vector<8x64xf32>
    %65 = arith.truncf %64 : vector<8x64xf32> to vector<8x64xbf16>
    %c704 = arith.constant 704 : index
    %c0_30 = arith.constant 0 : index
    %66 = vector.load %arg4[%c704, %c0_30] : memref<1024x512xbf16, #tpu.memory_space<vmem>>, vector<64x512xbf16>
    %cst_31 = arith.constant dense<0.000000e+00> : vector<8x512xf32>
    %67 = tpu.matmul %65, %66, %cst_31 {dimension_numbers = #tpu.dot_dimension_numbers<[1], [0], [0], [1], [0, 0, 1, 1], [], []>} : vector<8x64xbf16>, vector<64x512xbf16>, vector<8x512xf32> -> vector<8x512xf32>
    %68 = arith.addf %63, %67 : vector<8x512xf32>
    %69 = vector.extract_strided_slice %7 {offsets = [96, 0], sizes = [8, 64], strides = [1, 1]} : vector<128x64xf32> to vector<8x64xf32>
    %70 = arith.truncf %69 : vector<8x64xf32> to vector<8x64xbf16>
    %c768 = arith.constant 768 : index
    %c0_32 = arith.constant 0 : index
    %71 = vector.load %arg4[%c768, %c0_32] : memref<1024x512xbf16, #tpu.memory_space<vmem>>, vector<64x512xbf16>
    %cst_33 = arith.constant dense<0.000000e+00> : vector<8x512xf32>
    %72 = tpu.matmul %70, %71, %cst_33 {dimension_numbers = #tpu.dot_dimension_numbers<[1], [0], [0], [1], [0, 0, 1, 1], [], []>} : vector<8x64xbf16>, vector<64x512xbf16>, vector<8x512xf32> -> vector<8x512xf32>
    %73 = arith.addf %68, %72 : vector<8x512xf32>
    %74 = vector.extract_strided_slice %7 {offsets = [104, 0], sizes = [8, 64], strides = [1, 1]} : vector<128x64xf32> to vector<8x64xf32>
    %75 = arith.truncf %74 : vector<8x64xf32> to vector<8x64xbf16>
    %c832 = arith.constant 832 : index
    %c0_34 = arith.constant 0 : index
    %76 = vector.load %arg4[%c832, %c0_34] : memref<1024x512xbf16, #tpu.memory_space<vmem>>, vector<64x512xbf16>
    %cst_35 = arith.constant dense<0.000000e+00> : vector<8x512xf32>
    %77 = tpu.matmul %75, %76, %cst_35 {dimension_numbers = #tpu.dot_dimension_numbers<[1], [0], [0], [1], [0, 0, 1, 1], [], []>} : vector<8x64xbf16>, vector<64x512xbf16>, vector<8x512xf32> -> vector<8x512xf32>
    %78 = arith.addf %73, %77 : vector<8x512xf32>
    %79 = vector.extract_strided_slice %7 {offsets = [112, 0], sizes = [8, 64], strides = [1, 1]} : vector<128x64xf32> to vector<8x64xf32>
    %80 = arith.truncf %79 : vector<8x64xf32> to vector<8x64xbf16>
    %c896 = arith.constant 896 : index
    %c0_36 = arith.constant 0 : index
    %81 = vector.load %arg4[%c896, %c0_36] : memref<1024x512xbf16, #tpu.memory_space<vmem>>, vector<64x512xbf16>
    %cst_37 = arith.constant dense<0.000000e+00> : vector<8x512xf32>
    %82 = tpu.matmul %80, %81, %cst_37 {dimension_numbers = #tpu.dot_dimension_numbers<[1], [0], [0], [1], [0, 0, 1, 1], [], []>} : vector<8x64xbf16>, vector<64x512xbf16>, vector<8x512xf32> -> vector<8x512xf32>
    %83 = arith.addf %78, %82 : vector<8x512xf32>
    %84 = vector.extract_strided_slice %7 {offsets = [120, 0], sizes = [8, 64], strides = [1, 1]} : vector<128x64xf32> to vector<8x64xf32>
    %85 = arith.truncf %84 : vector<8x64xf32> to vector<8x64xbf16>
    %c960 = arith.constant 960 : index
    %c0_38 = arith.constant 0 : index
    %86 = vector.load %arg4[%c960, %c0_38] : memref<1024x512xbf16, #tpu.memory_space<vmem>>, vector<64x512xbf16>
    %cst_39 = arith.constant dense<0.000000e+00> : vector<8x512xf32>
    %87 = tpu.matmul %85, %86, %cst_39 {dimension_numbers = #tpu.dot_dimension_numbers<[1], [0], [0], [1], [0, 0, 1, 1], [], []>} : vector<8x64xbf16>, vector<64x512xbf16>, vector<8x512xf32> -> vector<8x512xf32>
    %88 = arith.addf %83, %87 : vector<8x512xf32>
    %c0_40 = arith.constant 0 : index
    %c0_41 = arith.constant 0 : index
    %89 = vector.load %arg5[%c0_40, %c0_41] : memref<1x512xf32, #tpu.memory_space<vmem>>, vector<1x512xf32>
    %90 = vector.broadcast %89 : vector<1x512xf32> to vector<8x512xf32>
    %91 = arith.addf %88, %90 : vector<8x512xf32>
    %cst_42 = arith.constant 0.000000e+00 : f32
    %92 = vector.broadcast %cst_42 : f32 to vector<8x512xf32>
    %93 = arith.maximumf %91, %92 : vector<8x512xf32>
    %94 = arith.truncf %93 : vector<8x512xf32> to vector<8x512xbf16>
    %c0_43 = arith.constant 0 : index
    %c0_44 = arith.constant 0 : index
    %95 = vector.load %arg6[%c0_43, %c0_44] : memref<512x6xbf16, #tpu.memory_space<vmem>>, vector<512x6xbf16>
    %cst_45 = arith.constant dense<0.000000e+00> : vector<8x6xf32>
    %96 = tpu.matmul %94, %95, %cst_45 {dimension_numbers = #tpu.dot_dimension_numbers<[1], [0], [0], [1], [0, 0, 1, 1], [], []>} : vector<8x512xbf16>, vector<512x6xbf16>, vector<8x6xf32> -> vector<8x6xf32>
    %c0_46 = arith.constant 0 : index
    %c0_47 = arith.constant 0 : index
    %97 = vector.load %arg7[%c0_46, %c0_47] : memref<1x6xf32, #tpu.memory_space<vmem>>, vector<1x6xf32>
    %98 = vector.broadcast %97 : vector<1x6xf32> to vector<8x6xf32>
    %99 = arith.addf %96, %98 : vector<8x6xf32>
    %c0_48 = arith.constant 0 : index
    %c0_49 = arith.constant 0 : index
    %100 = vector.load %arg8[%c0_48, %c0_49] : memref<8x6xf32, #tpu.memory_space<vmem>>, vector<8x6xf32>
    tpu.vector_store %arg8[%c0_48, %c0_49], %99 {strides = array<i32>} : memref<8x6xf32, #tpu.memory_space<vmem>>, vector<8x6xf32>,
    return
  }
  func.func @transform_0(%arg0: i32) -> (i32, i32) {
    %c0_i32 = arith.constant 0 : i32
    %c0_i32_0 = arith.constant 0 : i32
    return %arg0, %c0_i32 : i32, i32
  }
  func.func @transform_1(%arg0: i32) -> (i32, i32) {
    %c0_i32 = arith.constant 0 : i32
    %c0_i32_0 = arith.constant 0 : i32
    %c0_i32_1 = arith.constant 0 : i32
    return %c0_i32, %c0_i32_0 : i32, i32
  }
  func.func @transform_2(%arg0: i32) -> (i32, i32) {
    %c0_i32 = arith.constant 0 : i32
    %c0_i32_0 = arith.constant 0 : i32
    %c0_i32_1 = arith.constant 0 : i32
    return %c0_i32, %c0_i32_0 : i32, i32
  }
  func.func @transform_3(%arg0: i32) -> (i32, i32) {
    %c0_i32 = arith.constant 0 : i32
    %c0_i32_0 = arith.constant 0 : i32
    %c0_i32_1 = arith.constant 0 : i32
    return %c0_i32, %c0_i32_0 : i32, i32
  }
  func.func @transform_4(%arg0: i32) -> (i32, i32) {
    %c0_i32 = arith.constant 0 : i32
    %c0_i32_0 = arith.constant 0 : i32
    %c0_i32_1 = arith.constant 0 : i32
    return %c0_i32, %c0_i32_0 : i32, i32
  }
  func.func @transform_5(%arg0: i32) -> (i32, i32) {
    %c0_i32 = arith.constant 0 : i32
    %c0_i32_0 = arith.constant 0 : i32
    %c0_i32_1 = arith.constant 0 : i32
    return %c0_i32, %c0_i32_0 : i32, i32
  }
  func.func @transform_6(%arg0: i32) -> (i32, i32) {
    %c0_i32 = arith.constant 0 : i32
    %c0_i32_0 = arith.constant 0 : i32
    %c0_i32_1 = arith.constant 0 : i32
    return %c0_i32, %c0_i32_0 : i32, i32
  }
  func.func @transform_7(%arg0: i32) -> (i32, i32) {
    %c0_i32 = arith.constant 0 : i32
    %c0_i32_0 = arith.constant 0 : i32
    return %arg0, %c0_i32 : i32, i32
  }
}

</mosaic_0001>

<bundles_post_ra>
// kernel: model_openai_forward.3
= control target key start
LH: loop header
LB: loop body
LE: loop exit
PB: predicated region body
PF: predicated region fallthrough
CT: control target
= control target key end

     0   :  { %v1566_v0 = vmov 0   ;;  %vm1143_vm0 = vcmask 257024   ;;  %s2184_s1 = inlined_call_operand.vmem [shape: bf16[256,32], index: 1, kind: input, shape index: {}]   ;;  %s2185_s0 = inlined_call_operand.vmem [shape: bf16[512,256], index: 0, kind: input, shape index: {}]   ;;  %s2186_s2 = inlined_call_operand.vmem [shape: f32[1,32], index: 2, kind: input, shape index: {}]   ;;  %s2187_s3 = inlined_call_operand.vmem [shape: bf16[512,32], index: 3, kind: output, shape index: {}]  }
   0x1   :  { %534 = vmatprep.subr.bf16.mxu0 %v1566_v0  ;;  %1421 = vmatprep.subr.bf16.mxu1 %v1566_v0  ;;  %v1454_v1 = vld [vmem:[%s2184_s1 + $0x38] sm:$0xff]   ;;  %v1455_v2 = vld [vmem:[%s2184_s1 + $0x30] sm:$0xff]   ;;  %v1456_v3 = vld [vmem:[%s2184_s1 + $0x28] sm:$0xff]  }
   0x2   :  { %535 = vmatpush1.bf16.msra.mxu0 %v1454_v1  ;;  %1437 = vmatpush1.bf16.msra.mxu1 %v1454_v1  ;;  %v1457_v4 = vld [vmem:[%s2184_s1 + $0x20] sm:$0xff]   ;;  %v1458_v5 = vld [vmem:[%s2184_s1 + $0x18] sm:$0xff]   ;;  %v1459_v7 = vld [vmem:[%s2184_s1 + $0x10] sm:$0xff]  }
   0x3   :  { %536 = vmatprep.subr.bf16.mxu0 %v1566_v0  ;;  %1422 = vmatprep.subr.bf16.mxu1 %v1566_v0  ;;  %v1472_v6 = vld [vmem:[%s2185_s0 + $0x4] ss:$8 sps:$4 sm:$0xff]   ;;  %v1462_v11 = vld [vmem:[%s2184_s1 + $0x78] sm:$0xff]   ;;  %v1463_v12 = vld [vmem:[%s2184_s1 + $0x70] sm:$0xff]  }
   0x4   :  { %v1475_v8 = vld [vmem:[%s2185_s0 + $0x104] ss:$8 sps:$4 sm:$0xff]   ;;  %566 = vmatprep.mubr.bf16.mxu0 %v1472_v6  ;;  %v1466_v15 = vld [vmem:[%s2184_s1 + $0x58] sm:$0xff]   ;;  %v1467_v16 = vld [vmem:[%s2184_s1 + $0x50] sm:$0xff]  }
   0x5   :  { %694 = vmatprep.mubr.bf16.mxu1 %v1475_v8  ;;  %v1460_v9 = vld [vmem:[%s2184_s1 + $0x8] sm:$0xff]   ;;  %v1461_v10 = vld [vmem:[%s2184_s1] sm:$0xff]   ;;  %v1476_v21 = vld [vmem:[%s2185_s0 + $0x14] ss:$8 sps:$4 sm:$0xff]  }
   0x6   :  { %537 = vmatpush1.bf16.msra.mxu0 %v1455_v2  ;;  %1438 = vmatpush1.bf16.msra.mxu1 %v1455_v2  ;;  %v1464_v13 = vld [vmem:[%s2184_s1 + $0x68] sm:$0xff]   ;;  %v1465_v14 = vld [vmem:[%s2184_s1 + $0x60] sm:$0xff]   ;;  %v1478_v22 = vld [vmem:[%s2185_s0 + $0x114] ss:$8 sps:$4 sm:$0xff]  }
   0x7   :  { %538 = vmatprep.subr.bf16.mxu0 %v1566_v0  ;;  %1423 = vmatprep.subr.bf16.mxu1 %v1566_v0  ;;  %v1468_v17 = vld [vmem:[%s2184_s1 + $0x48] sm:$0xff]   ;;  %v1469_v18 = vld [vmem:[%s2184_s1 + $0x40] sm:$0xff]   ;;  %v1480_v23 = vld [vmem:[%s2185_s0 + $0x10] ss:$8 sps:$4 sm:$0xff]  }
   0x8   :  { %v1470_v19 = vld [vmem:[%s2185_s0] ss:$8 sps:$4 sm:$0xff]   ;;  %v1481_v24 = vld [vmem:[%s2185_s0 + $0x110] ss:$8 sps:$4 sm:$0xff]   ;;  %v1482_v25 = vld [vmem:[%s2185_s0 + $0x24] ss:$8 sps:$4 sm:$0xff]  }
   0x9   :  { %v1473_v20 = vld [vmem:[%s2185_s0 + $0x100] ss:$8 sps:$4 sm:$0xff]   ;;  %v1484_v26 = vld [vmem:[%s2185_s0 + $0x124] ss:$8 sps:$4 sm:$0xff]   ;;  %v1488_v29 = vld [vmem:[%s2185_s0 + $0x34] ss:$8 sps:$4 sm:$0xff]  }
   0xa   :  { %539 = vmatpush1.bf16.msra.mxu0 %v1456_v3  ;;  %1439 = vmatpush1.bf16.msra.mxu1 %v1456_v3  ;;  %v1486_v27 = vld [vmem:[%s2185_s0 + $0x20] ss:$8 sps:$4 sm:$0xff]   ;;  %v1490_v30 = vld [vmem:[%s2185_s0 + $0x134] ss:$8 sps:$4 sm:$0xff]   ;;  %v1492_v31 = vld [vmem:[%s2185_s0 + $0x30] ss:$8 sps:$4 sm:$0xff]  }
   0xb   :  { %540 = vmatprep.subr.bf16.mxu0 %v1566_v0  ;;  %1424 = vmatprep.subr.bf16.mxu1 %v1566_v0  ;;  %v1487_v28 = vld [vmem:[%s2185_s0 + $0x120] ss:$8 sps:$4 sm:$0xff]   ;;  %v1493_v32 = vld [vmem:[%s2185_s0 + $0x130] ss:$8 sps:$4 sm:$0xff]   ;;  %v1494_v33 = vld [vmem:[%s2185_s0 + $0x44] ss:$8 sps:$4 sm:$0xff]  }
   0xc   :  { %v1496_v34 = vld [vmem:[%s2185_s0 + $0x144] ss:$8 sps:$4 sm:$0xff]   ;;  %v1498_v35 = vld [vmem:[%s2185_s0 + $0x40] ss:$8 sps:$4 sm:$0xff]   ;;  %v1500_v37 = vld [vmem:[%s2185_s0 + $0x54] ss:$8 sps:$4 sm:$0xff]  }
   0xd   :  { %v1499_v36 = vld [vmem:[%s2185_s0 + $0x140] ss:$8 sps:$4 sm:$0xff]   ;;  %v1502_v38 = vld [vmem:[%s2185_s0 + $0x154] ss:$8 sps:$4 sm:$0xff]   ;;  %v1504_v39 = vld [vmem:[%s2185_s0 + $0x50] ss:$8 sps:$4 sm:$0xff]  }
   0xe   :  { %541 = vmatpush1.bf16.msra.mxu0 %v1457_v4  ;;  %1440 = vmatpush1.bf16.msra.mxu1 %v1457_v4  ;;  %v1505_v40 = vld [vmem:[%s2185_s0 + $0x150] ss:$8 sps:$4 sm:$0xff]   ;;  %v1506_v41 = vld [vmem:[%s2185_s0 + $0x64] ss:$8 sps:$4 sm:$0xff]   ;;  %v1510_v43 = vld [vmem:[%s2185_s0 + $0x60] ss:$8 sps:$4 sm:$0xff]  }
   0xf   :  { %542 = vmatprep.subr.bf16.mxu0 %v1566_v0  ;;  %1425 = vmatprep.subr.bf16.mxu1 %v1566_v0  ;;  %v1508_v42 = vld [vmem:[%s2185_s0 + $0x164] ss:$8 sps:$4 sm:$0xff]   ;;  %v1511_v44 = vld [vmem:[%s2185_s0 + $0x160] ss:$8 sps:$4 sm:$0xff]   ;;  %v1512_v45 = vld [vmem:[%s2185_s0 + $0x74] ss:$8 sps:$4 sm:$0xff]  }
  0x10   :  { %v1514_v46 = vld [vmem:[%s2185_s0 + $0x174] ss:$8 sps:$4 sm:$0xff]   ;;  %v1516_v47 = vld [vmem:[%s2185_s0 + $0x70] ss:$8 sps:$4 sm:$0xff]   ;;  %v1518_v49 = vld [vmem:[%s2185_s0 + $0x84] ss:$8 sps:$4 sm:$0xff]  }
  0x11   :  { %v1517_v48 = vld [vmem:[%s2185_s0 + $0x170] ss:$8 sps:$4 sm:$0xff]   ;;  %v1520_v50 = vld [vmem:[%s2185_s0 + $0x184] ss:$8 sps:$4 sm:$0xff]   ;;  %v1522_v51 = vld [vmem:[%s2185_s0 + $0x80] ss:$8 sps:$4 sm:$0xff]  }
  0x12   :  { %543 = vmatpush1.bf16.msra.mxu0 %v1458_v5  ;;  %1441 = vmatpush1.bf16.msra.mxu1 %v1458_v5  ;;  %v1523_v52 = vld [vmem:[%s2185_s0 + $0x180] ss:$8 sps:$4 sm:$0xff]   ;;  %v1524_v53 = vld [vmem:[%s2185_s0 + $0x94] ss:$8 sps:$4 sm:$0xff]   ;;  %v1528_v55 = vld [vmem:[%s2185_s0 + $0x90] ss:$8 sps:$4 sm:$0xff]  }
  0x13   :  { %544 = vmatprep.subr.bf16.mxu0 %v1566_v0  ;;  %1426 = vmatprep.subr.bf16.mxu1 %v1566_v0  ;;  %v1526_v54 = vld [vmem:[%s2185_s0 + $0x194] ss:$8 sps:$4 sm:$0xff]   ;;  %v1529_v56 = vld [vmem:[%s2185_s0 + $0x190] ss:$8 sps:$4 sm:$0xff]   ;;  %v1530_v57 = vld [vmem:[%s2185_s0 + $0xa4] ss:$8 sps:$4 sm:$0xff]  }
  0x14   :  { %v1532_v58 = vld [vmem:[%s2185_s0 + $0x1a4] ss:$8 sps:$4 sm:$0xff]   ;;  %v1534_v59 = vld [vmem:[%s2185_s0 + $0xa0] ss:$8 sps:$4 sm:$0xff]   ;;  %v1536_v61 = vld [vmem:[%s2185_s0 + $0xb4] ss:$8 sps:$4 sm:$0xff]  }
  0x15   :  { %v1535_v60 = vld [vmem:[%s2185_s0 + $0x1a0] ss:$8 sps:$4 sm:$0xff]   ;;  %v1538_v62 = vld [vmem:[%s2185_s0 + $0x1b4] ss:$8 sps:$4 sm:$0xff]   ;;  %v1540_v63 = vld [vmem:[%s2185_s0 + $0xb0] ss:$8 sps:$4 sm:$0xff]  }
  0x16   :  { %545 = vmatpush1.bf16.msra.mxu0 %v1459_v7  ;;  %1442 = vmatpush1.bf16.msra.mxu1 %v1459_v7  ;;  %v1542_v1 = vld [vmem:[%s2185_s0 + $0xc4] ss:$8 sps:$4 sm:$0xff]   ;;  %v1546_v3 = vld [vmem:[%s2185_s0 + $0xc0] ss:$8 sps:$4 sm:$0xff]   ;;  %v1548_v5 = vld [vmem:[%s2185_s0 + $0xd4] ss:$8 sps:$4 sm:$0xff]  }
  0x17   :  { %546 = vmatprep.subr.bf16.mxu0 %v1566_v0  ;;  %1427 = vmatprep.subr.bf16.mxu1 %v1566_v0  ;;  %v1544_v2 = vld [vmem:[%s2185_s0 + $0x1c4] ss:$8 sps:$4 sm:$0xff]   ;;  %v1547_v4 = vld [vmem:[%s2185_s0 + $0x1c0] ss:$8 sps:$4 sm:$0xff]   ;;  %v1550_v6 = vld [vmem:[%s2185_s0 + $0x1d4] ss:$8 sps:$4 sm:$0xff]  }
  0x18   :  { %v1552_v7 = vld [vmem:[%s2185_s0 + $0xd0] ss:$8 sps:$4 sm:$0xff]  }
  0x19   :  { %v1553_v8 = vld [vmem:[%s2185_s0 + $0x1d0] ss:$8 sps:$4 sm:$0xff]  }
  0x1a   :  { %547 = vmatpush1.bf16.msra.mxu0 %v1460_v9  ;;  %1443 = vmatpush1.bf16.msra.mxu1 %v1460_v9  ;;  %v1554_v9 = vld [vmem:[%s2185_s0 + $0xe4] ss:$8 sps:$4 sm:$0xff]  }
  0x1b   :  { %548 = vmatprep.subr.bf16.mxu0 %v1566_v0  ;;  %1428 = vmatprep.subr.bf16.mxu1 %v1566_v0 }
  0x1e   :  { %549 = vmatpush1.bf16.msra.mxu0 %v1461_v10  ;;  %1444 = vmatpush1.bf16.msra.mxu1 %v1461_v10  ;;  %v1556_v10 = vld [vmem:[%s2185_s0 + $0x1e4] ss:$8 sps:$4 sm:$0xff]  }
  0x1f   :  { %550 = vmatprep.subr.bf16.mxu0 %v1566_v0  ;;  %1429 = vmatprep.subr.bf16.mxu1 %v1566_v0 }
  0x22   :  { %551 = vmatpush2.bf16.msra.mxu0 %v1462_v11  ;;  %1445 = vmatpush2.bf16.msra.mxu1 %v1462_v11  ;;  %v1558_v11 = vld [vmem:[%s2185_s0 + $0xe0] ss:$8 sps:$4 sm:$0xff]  }
  0x23   :  { %552 = vmatprep.subr.bf16.mxu0 %v1566_v0  ;;  %1430 = vmatprep.subr.bf16.mxu1 %v1566_v0 }
  0x26   :  { %553 = vmatpush2.bf16.msra.mxu0 %v1463_v12  ;;  %1446 = vmatpush2.bf16.msra.mxu1 %v1463_v12  ;;  %v1559_v12 = vld [vmem:[%s2185_s0 + $0x1e0] ss:$8 sps:$4 sm:$0xff]  }
  0x27   :  { %554 = vmatprep.subr.bf16.mxu0 %v1566_v0  ;;  %1431 = vmatprep.subr.bf16.mxu1 %v1566_v0 }
  0x2a   :  { %555 = vmatpush2.bf16.msra.mxu0 %v1464_v13  ;;  %1447 = vmatpush2.bf16.msra.mxu1 %v1464_v13  ;;  %v1560_v13 = vld [vmem:[%s2185_s0 + $0xf4] ss:$8 sps:$4 sm:$0xff]  }
  0x2b   :  { %556 = vmatprep.subr.bf16.mxu0 %v1566_v0  ;;  %1432 = vmatprep.subr.bf16.mxu1 %v1566_v0 }
  0x2e   :  { %557 = vmatpush2.bf16.msra.mxu0 %v1465_v14  ;;  %1448 = vmatpush2.bf16.msra.mxu1 %v1465_v14  ;;  %v1562_v14 = vld [vmem:[%s2185_s0 + $0x1f4] ss:$8 sps:$4 sm:$0xff]  }
  0x2f   :  { %558 = vmatprep.subr.bf16.mxu0 %v1566_v0  ;;  %1433 = vmatprep.subr.bf16.mxu1 %v1566_v0 }
  0x32   :  { %559 = vmatpush2.bf16.msra.mxu0 %v1466_v15  ;;  %1449 = vmatpush2.bf16.msra.mxu1 %v1466_v15  ;;  %v1564_v15 = vld [vmem:[%s2185_s0 + $0xf0] ss:$8 sps:$4 sm:$0xff]  }
  0x33   :  { %560 = vmatprep.subr.bf16.mxu0 %v1566_v0  ;;  %1434 = vmatprep.subr.bf16.mxu1 %v1566_v0 }
  0x36   :  { %561 = vmatpush2.bf16.msra.mxu0 %v1467_v16  ;;  %1450 = vmatpush2.bf16.msra.mxu1 %v1467_v16  ;;  %v1565_v16 = vld [vmem:[%s2185_s0 + $0x1f0] ss:$8 sps:$4 sm:$0xff]  }
  0x37   :  { %562 = vmatprep.subr.bf16.mxu0 %v1566_v0  ;;  %1435 = vmatprep.subr.bf16.mxu1 %v1566_v0 }
  0x3a   :  { %563 = vmatpush2.bf16.msra.mxu0 %v1468_v17  ;;  %1451 = vmatpush2.bf16.msra.mxu1 %v1468_v17  ;;  %v1862_v17 = vld [vmem:[%s2186_s2] ss:$0 sm:$0xff] }
  0x3b   :  { %564 = vmatprep.subr.bf16.mxu0 %v1566_v0  ;;  %1436 = vmatprep.subr.bf16.mxu1 %v1566_v0  ;;  %v1541_v0 = vld [vmem:[%s2185_s0 + $0x1b0] ss:$8 sps:$4 sm:$0xff]  }
  0x3e   :  { %565 = vmatpush2.bf16.msra.mxu0 %v1469_v18  ;;  %1452 = vmatpush2.bf16.msra.mxu1 %v1469_v18 }
  0x41   :  { %567 = vmatmul.mubr.bf16.vlgmr.msra.gmra.mxu0 %v1470_v19  ;;  %695 = vmatmul.mubr.bf16.vlgmr.msra.gmra.mxu1 %v1473_v20 }
  0x42   :  { %574 = vmatprep.mubr.bf16.mxu0 %v1476_v21  ;;  %702 = vmatprep.mubr.bf16.mxu1 %v1478_v22 }
  0x49   :  { %575 = vmatmul.mubr.bf16.gmra.mxu0 %v1480_v23  ;;  %703 = vmatmul.mubr.bf16.gmra.mxu1 %v1481_v24 }
  0x4a   :  { %582 = vmatprep.mubr.bf16.mxu0 %v1482_v25  ;;  %710 = vmatprep.mubr.bf16.mxu1 %v1484_v26 }
  0x51   :  { %583 = vmatmul.mubr.bf16.gmra.mxu0 %v1486_v27  ;;  %711 = vmatmul.mubr.bf16.gmra.mxu1 %v1487_v28 }
  0x52   :  { %590 = vmatprep.mubr.bf16.mxu0 %v1488_v29  ;;  %718 = vmatprep.mubr.bf16.mxu1 %v1490_v30 }
  0x59   :  { %591 = vmatmul.mubr.bf16.gmra.mxu0 %v1492_v31  ;;  %719 = vmatmul.mubr.bf16.gmra.mxu1 %v1493_v32 }
  0x5a   :  { %598 = vmatprep.mubr.bf16.mxu0 %v1494_v33  ;;  %726 = vmatprep.mubr.bf16.mxu1 %v1496_v34 }
  0x61   :  { %599 = vmatmul.mubr.bf16.gmra.mxu0 %v1498_v35  ;;  %727 = vmatmul.mubr.bf16.gmra.mxu1 %v1499_v36 }
  0x62   :  { %606 = vmatprep.mubr.bf16.mxu0 %v1500_v37  ;;  %734 = vmatprep.mubr.bf16.mxu1 %v1502_v38 }
  0x69   :  { %607 = vmatmul.mubr.bf16.gmra.mxu0 %v1504_v39  ;;  %735 = vmatmul.mubr.bf16.gmra.mxu1 %v1505_v40 }
  0x6a   :  { %614 = vmatprep.mubr.bf16.mxu0 %v1506_v41  ;;  %742 = vmatprep.mubr.bf16.mxu1 %v1508_v42 }
  0x71   :  { %615 = vmatmul.mubr.bf16.gmra.mxu0 %v1510_v43  ;;  %743 = vmatmul.mubr.bf16.gmra.mxu1 %v1511_v44 }
  0x72   :  { %622 = vmatprep.mubr.bf16.mxu0 %v1512_v45  ;;  %750 = vmatprep.mubr.bf16.mxu1 %v1514_v46 }
  0x79   :  { %623 = vmatmul.mubr.bf16.gmra.mxu0 %v1516_v47  ;;  %751 = vmatmul.mubr.bf16.gmra.mxu1 %v1517_v48 }
  0x7a   :  { %630 = vmatprep.mubr.bf16.mxu0 %v1518_v49  ;;  %758 = vmatprep.mubr.bf16.mxu1 %v1520_v50 }
  0x81   :  { %631 = vmatmul.mubr.bf16.gmra.mxu0 %v1522_v51  ;;  %759 = vmatmul.mubr.bf16.gmra.mxu1 %v1523_v52 }
  0x82   :  { %638 = vmatprep.mubr.bf16.mxu0 %v1524_v53  ;;  %766 = vmatprep.mubr.bf16.mxu1 %v1526_v54 }
  0x89   :  { %639 = vmatmul.mubr.bf16.gmra.mxu0 %v1528_v55  ;;  %767 = vmatmul.mubr.bf16.gmra.mxu1 %v1529_v56 }
  0x8a   :  { %646 = vmatprep.mubr.bf16.mxu0 %v1530_v57  ;;  %774 = vmatprep.mubr.bf16.mxu1 %v1532_v58 }
  0x91   :  { %647 = vmatmul.mubr.bf16.gmra.mxu0 %v1534_v59  ;;  %775 = vmatmul.mubr.bf16.gmra.mxu1 %v1535_v60 }
  0x92   :  { %654 = vmatprep.mubr.bf16.mxu0 %v1536_v61  ;;  %782 = vmatprep.mubr.bf16.mxu1 %v1538_v62 }
  0x99   :  { %655 = vmatmul.mubr.bf16.gmra.mxu0 %v1540_v63  ;;  %783 = vmatmul.mubr.bf16.gmra.mxu1 %v1541_v0 }
  0x9a   :  { %662 = vmatprep.mubr.bf16.mxu0 %v1542_v1  ;;  %790 = vmatprep.mubr.bf16.mxu1 %v1544_v2 }
  0xa1   :  { %663 = vmatmul.mubr.bf16.gmra.mxu0 %v1546_v3  ;;  %791 = vmatmul.mubr.bf16.gmra.mxu1 %v1547_v4 }
  0xa2   :  { %670 = vmatprep.mubr.bf16.mxu0 %v1548_v5  ;;  %798 = vmatprep.mubr.bf16.mxu1 %v1550_v6 }
  0xa9   :  { %671 = vmatmul.mubr.bf16.gmra.mxu0 %v1552_v7  ;;  %799 = vmatmul.mubr.bf16.gmra.mxu1 %v1553_v8 }
  0xaa   :  { %678 = vmatprep.mubr.bf16.mxu0 %v1554_v9  ;;  %806 = vmatprep.mubr.bf16.mxu1 %v1556_v10 }
  0xb1   :  { %679 = vmatmul.mubr.bf16.gmra.mxu0 %v1558_v11  ;;  %807 = vmatmul.mubr.bf16.gmra.mxu1 %v1559_v12 }
  0xb2   :  { %686 = vmatprep.mubr.bf16.mxu0 %v1560_v13  ;;  %814 = vmatprep.mubr.bf16.mxu1 %v1562_v14 }
  0xb9   :  { %687 = vmatmul.mubr.bf16.gmra.mxu0 %v1564_v15  ;;  %815 = vmatmul.mubr.bf16.gmra.mxu1 %v1565_v16 }
 0x101   :  { %v568_v18 = vpop.f32.mrf.mxu0  ;;  %v696_v19 = vpop.f32.mrf.mxu1 }
 0x102   :  { %v569_v20 = vadd.f32 %v1862_v17, %v568_v18  ;;  %v697_v21 = vadd.f32 %v1862_v17, %v696_v19 }
 0x103   :  { %v570_v22 = vpop.f32.mrf.mxu0  ;;  %v698_v23 = vpop.f32.mrf.mxu1 }
 0x104   :  { %v823_v24 = vmax.f32 %v569_v20, 0.0  ;;  %v855_v25 = vmax.f32 %v697_v21, 0.0 }
 0x105   :  { %v571_v26 = vpop.f32.mrf.mxu0  ;;  %v699_v27 = vpop.f32.mrf.mxu1 }
 0x106   :  { %v1357_v28 = vpack.c.bf16 %v823_v24, %v823_v24  ;;  %v1389_v29 = vpack.c.bf16 %v855_v25, %v855_v25  ;;  %v572_v30 = vadd.f32 %v1862_v17, %v571_v26  ;;  %v700_v31 = vadd.f32 %v1862_v17, %v699_v27 }
 0x107   :  { %v573_v32 = vpop.f32.mrf.mxu0  ;;  %v701_v33 = vpop.f32.mrf.mxu1 }
 0x108   :  { %1144 = vst.msk [vmem:[%s2187_s3] sm:$0xf] %vm1143_vm0, %v1357_v28  ;;  %1176 = vst.msk [vmem:[%s2187_s3 + $0x80] sm:$0xf] %vm1143_vm0, %v1389_v29  ;;  %v824_v34 = vmax.f32 %v572_v30, 0.0  ;;  %v856_v35 = vmax.f32 %v700_v31, 0.0 }
 0x109   :  { %v576_v36 = vpop.f32.mrf.mxu0  ;;  %v704_v37 = vpop.f32.mrf.mxu1 }
 0x10a   :  { %v1358_v38 = vpack.c.bf16 %v824_v34, %v824_v34  ;;  %v1390_v39 = vpack.c.bf16 %v856_v35, %v856_v35  ;;  %v577_v40 = vadd.f32 %v1862_v17, %v576_v36  ;;  %v705_v41 = vadd.f32 %v1862_v17, %v704_v37 }
 0x10b   :  { %v578_v42 = vpop.f32.mrf.mxu0  ;;  %v706_v43 = vpop.f32.mrf.mxu1 }
 0x10c   :  { %1145 = vst.msk [vmem:[%s2187_s3 + $0x4] sm:$0xf] %vm1143_vm0, %v1358_v38  ;;  %1177 = vst.msk [vmem:[%s2187_s3 + $0x84] sm:$0xf] %vm1143_vm0, %v1390_v39  ;;  %v825_v44 = vmax.f32 %v577_v40, 0.0  ;;  %v857_v45 = vmax.f32 %v705_v41, 0.0 }
 0x10d   :  { %v579_v46 = vpop.f32.mrf.mxu0  ;;  %v707_v47 = vpop.f32.mrf.mxu1 }
 0x10e   :  { %v1359_v48 = vpack.c.bf16 %v825_v44, %v825_v44  ;;  %v1391_v49 = vpack.c.bf16 %v857_v45, %v857_v45  ;;  %v580_v50 = vadd.f32 %v1862_v17, %v579_v46  ;;  %v708_v51 = vadd.f32 %v1862_v17, %v707_v47 }
 0x10f   :  { %v581_v52 = vpop.f32.mrf.mxu0  ;;  %v709_v53 = vpop.f32.mrf.mxu1 }
 0x110   :  { %1146 = vst.msk [vmem:[%s2187_s3 + $0x8] sm:$0xf] %vm1143_vm0, %v1359_v48  ;;  %1178 = vst.msk [vmem:[%s2187_s3 + $0x88] sm:$0xf] %vm1143_vm0, %v1391_v49  ;;  %v826_v54 = vmax.f32 %v580_v50, 0.0  ;;  %v858_v55 = vmax.f32 %v708_v51, 0.0 }
 0x111   :  { %v584_v56 = vpop.f32.mrf.mxu0  ;;  %v712_v57 = vpop.f32.mrf.mxu1 }
 0x112   :  { %v1360_v58 = vpack.c.bf16 %v826_v54, %v826_v54  ;;  %v1392_v59 = vpack.c.bf16 %v858_v55, %v858_v55  ;;  %v585_v60 = vadd.f32 %v1862_v17, %v584_v56  ;;  %v713_v61 = vadd.f32 %v1862_v17, %v712_v57 }
 0x113   :  { %v586_v62 = vpop.f32.mrf.mxu0  ;;  %v714_v63 = vpop.f32.mrf.mxu1 }
 0x114   :  { %1147 = vst.msk [vmem:[%s2187_s3 + $0xc] sm:$0xf] %vm1143_vm0, %v1360_v58  ;;  %1179 = vst.msk [vmem:[%s2187_s3 + $0x8c] sm:$0xf] %vm1143_vm0, %v1392_v59  ;;  %v827_v0 = vmax.f32 %v585_v60, 0.0  ;;  %v859_v1 = vmax.f32 %v713_v61, 0.0 }
 0x115   :  { %v587_v2 = vpop.f32.mrf.mxu0  ;;  %v715_v3 = vpop.f32.mrf.mxu1 }
 0x116   :  { %v1361_v4 = vpack.c.bf16 %v827_v0, %v827_v0  ;;  %v1393_v5 = vpack.c.bf16 %v859_v1, %v859_v1  ;;  %v588_v6 = vadd.f32 %v1862_v17, %v587_v2  ;;  %v716_v7 = vadd.f32 %v1862_v17, %v715_v3 }
 0x117   :  { %v589_v8 = vpop.f32.mrf.mxu0  ;;  %v717_v9 = vpop.f32.mrf.mxu1 }
 0x118   :  { %1148 = vst.msk [vmem:[%s2187_s3 + $0x10] sm:$0xf] %vm1143_vm0, %v1361_v4  ;;  %1180 = vst.msk [vmem:[%s2187_s3 + $0x90] sm:$0xf] %vm1143_vm0, %v1393_v5  ;;  %v828_v10 = vmax.f32 %v588_v6, 0.0  ;;  %v860_v11 = vmax.f32 %v716_v7, 0.0 }
 0x119   :  { %v592_v12 = vpop.f32.mrf.mxu0  ;;  %v720_v13 = vpop.f32.mrf.mxu1 }
 0x11a   :  { %v1362_v14 = vpack.c.bf16 %v828_v10, %v828_v10  ;;  %v1394_v15 = vpack.c.bf16 %v860_v11, %v860_v11  ;;  %v593_v16 = vadd.f32 %v1862_v17, %v592_v12  ;;  %v721_v18 = vadd.f32 %v1862_v17, %v720_v13 }
 0x11b   :  { %v594_v19 = vpop.f32.mrf.mxu0  ;;  %v722_v20 = vpop.f32.mrf.mxu1 }
 0x11c   :  { %1149 = vst.msk [vmem:[%s2187_s3 + $0x14] sm:$0xf] %vm1143_vm0, %v1362_v14  ;;  %1181 = vst.msk [vmem:[%s2187_s3 + $0x94] sm:$0xf] %vm1143_vm0, %v1394_v15  ;;  %v829_v21 = vmax.f32 %v593_v16, 0.0  ;;  %v861_v22 = vmax.f32 %v721_v18, 0.0 }
 0x11d   :  { %v595_v23 = vpop.f32.mrf.mxu0  ;;  %v723_v24 = vpop.f32.mrf.mxu1 }
 0x11e   :  { %v1363_v25 = vpack.c.bf16 %v829_v21, %v829_v21  ;;  %v1395_v26 = vpack.c.bf16 %v861_v22, %v861_v22  ;;  %v596_v27 = vadd.f32 %v1862_v17, %v595_v23  ;;  %v724_v28 = vadd.f32 %v1862_v17, %v723_v24 }
 0x11f   :  { %v597_v29 = vpop.f32.mrf.mxu0  ;;  %v725_v30 = vpop.f32.mrf.mxu1 }
 0x120   :  { %1150 = vst.msk [vmem:[%s2187_s3 + $0x18] sm:$0xf] %vm1143_vm0, %v1363_v25  ;;  %1182 = vst.msk [vmem:[%s2187_s3 + $0x98] sm:$0xf] %vm1143_vm0, %v1395_v26  ;;  %v830_v31 = vmax.f32 %v596_v27, 0.0  ;;  %v862_v32 = vmax.f32 %v724_v28, 0.0 }
 0x121   :  { %v600_v33 = vpop.f32.mrf.mxu0  ;;  %v728_v34 = vpop.f32.mrf.mxu1 }
 0x122   :  { %v1364_v35 = vpack.c.bf16 %v830_v31, %v830_v31  ;;  %v1396_v36 = vpack.c.bf16 %v862_v32, %v862_v32  ;;  %v601_v37 = vadd.f32 %v1862_v17, %v600_v33  ;;  %v729_v38 = vadd.f32 %v1862_v17, %v728_v34 }
 0x123   :  { %v602_v39 = vpop.f32.mrf.mxu0  ;;  %v730_v40 = vpop.f32.mrf.mxu1 }
 0x124   :  { %1151 = vst.msk [vmem:[%s2187_s3 + $0x1c] sm:$0xf] %vm1143_vm0, %v1364_v35  ;;  %1183 = vst.msk [vmem:[%s2187_s3 + $0x9c] sm:$0xf] %vm1143_vm0, %v1396_v36  ;;  %v831_v41 = vmax.f32 %v601_v37, 0.0  ;;  %v863_v42 = vmax.f32 %v729_v38, 0.0 }
 0x125   :  { %v603_v43 = vpop.f32.mrf.mxu0  ;;  %v731_v44 = vpop.f32.mrf.mxu1 }
 0x126   :  { %v1365_v45 = vpack.c.bf16 %v831_v41, %v831_v41  ;;  %v1397_v46 = vpack.c.bf16 %v863_v42, %v863_v42  ;;  %v604_v47 = vadd.f32 %v1862_v17, %v603_v43  ;;  %v732_v48 = vadd.f32 %v1862_v17, %v731_v44 }
 0x127   :  { %v605_v49 = vpop.f32.mrf.mxu0  ;;  %v733_v50 = vpop.f32.mrf.mxu1 }
 0x128   :  { %1152 = vst.msk [vmem:[%s2187_s3 + $0x20] sm:$0xf] %vm1143_vm0, %v1365_v45  ;;  %1184 = vst.msk [vmem:[%s2187_s3 + $0xa0] sm:$0xf] %vm1143_vm0, %v1397_v46  ;;  %v832_v51 = vmax.f32 %v604_v47, 0.0  ;;  %v864_v52 = vmax.f32 %v732_v48, 0.0 }
 0x129   :  { %v608_v53 = vpop.f32.mrf.mxu0  ;;  %v736_v54 = vpop.f32.mrf.mxu1 }
 0x12a   :  { %v1366_v55 = vpack.c.bf16 %v832_v51, %v832_v51  ;;  %v1398_v56 = vpack.c.bf16 %v864_v52, %v864_v52  ;;  %v609_v57 = vadd.f32 %v1862_v17, %v608_v53  ;;  %v737_v58 = vadd.f32 %v1862_v17, %v736_v54 }
 0x12b   :  { %v610_v59 = vpop.f32.mrf.mxu0  ;;  %v738_v60 = vpop.f32.mrf.mxu1 }
 0x12c   :  { %1153 = vst.msk [vmem:[%s2187_s3 + $0x24] sm:$0xf] %vm1143_vm0, %v1366_v55  ;;  %1185 = vst.msk [vmem:[%s2187_s3 + $0xa4] sm:$0xf] %vm1143_vm0, %v1398_v56  ;;  %v833_v61 = vmax.f32 %v609_v57, 0.0  ;;  %v865_v62 = vmax.f32 %v737_v58, 0.0 }
 0x12d   :  { %v611_v63 = vpop.f32.mrf.mxu0  ;;  %v739_v0 = vpop.f32.mrf.mxu1 }
 0x12e   :  { %v1367_v1 = vpack.c.bf16 %v833_v61, %v833_v61  ;;  %v1399_v2 = vpack.c.bf16 %v865_v62, %v865_v62  ;;  %v612_v3 = vadd.f32 %v1862_v17, %v611_v63  ;;  %v740_v4 = vadd.f32 %v1862_v17, %v739_v0 }
 0x12f   :  { %v613_v5 = vpop.f32.mrf.mxu0  ;;  %v741_v6 = vpop.f32.mrf.mxu1 }
 0x130   :  { %1154 = vst.msk [vmem:[%s2187_s3 + $0x28] sm:$0xf] %vm1143_vm0, %v1367_v1  ;;  %1186 = vst.msk [vmem:[%s2187_s3 + $0xa8] sm:$0xf] %vm1143_vm0, %v1399_v2  ;;  %v834_v7 = vmax.f32 %v612_v3, 0.0  ;;  %v866_v8 = vmax.f32 %v740_v4, 0.0 }
 0x131   :  { %v616_v9 = vpop.f32.mrf.mxu0  ;;  %v744_v10 = vpop.f32.mrf.mxu1 }
 0x132   :  { %v1368_v11 = vpack.c.bf16 %v834_v7, %v834_v7  ;;  %v1400_v12 = vpack.c.bf16 %v866_v8, %v866_v8  ;;  %v617_v13 = vadd.f32 %v1862_v17, %v616_v9  ;;  %v745_v14 = vadd.f32 %v1862_v17, %v744_v10 }
 0x133   :  { %v618_v15 = vpop.f32.mrf.mxu0  ;;  %v746_v16 = vpop.f32.mrf.mxu1 }
 0x134   :  { %1155 = vst.msk [vmem:[%s2187_s3 + $0x2c] sm:$0xf] %vm1143_vm0, %v1368_v11  ;;  %1187 = vst.msk [vmem:[%s2187_s3 + $0xac] sm:$0xf] %vm1143_vm0, %v1400_v12  ;;  %v835_v18 = vmax.f32 %v617_v13, 0.0  ;;  %v867_v19 = vmax.f32 %v745_v14, 0.0 }
 0x135   :  { %v619_v20 = vpop.f32.mrf.mxu0  ;;  %v747_v21 = vpop.f32.mrf.mxu1 }
 0x136   :  { %v1369_v22 = vpack.c.bf16 %v835_v18, %v835_v18  ;;  %v1401_v23 = vpack.c.bf16 %v867_v19, %v867_v19  ;;  %v620_v24 = vadd.f32 %v1862_v17, %v619_v20  ;;  %v748_v25 = vadd.f32 %v1862_v17, %v747_v21 }
 0x137   :  { %v621_v26 = vpop.f32.mrf.mxu0  ;;  %v749_v27 = vpop.f32.mrf.mxu1 }
 0x138   :  { %1156 = vst.msk [vmem:[%s2187_s3 + $0x30] sm:$0xf] %vm1143_vm0, %v1369_v22  ;;  %1188 = vst.msk [vmem:[%s2187_s3 + $0xb0] sm:$0xf] %vm1143_vm0, %v1401_v23  ;;  %v836_v28 = vmax.f32 %v620_v24, 0.0  ;;  %v868_v29 = vmax.f32 %v748_v25, 0.0 }
 0x139   :  { %v624_v30 = vpop.f32.mrf.mxu0  ;;  %v752_v31 = vpop.f32.mrf.mxu1 }
 0x13a   :  { %v1370_v32 = vpack.c.bf16 %v836_v28, %v836_v28  ;;  %v1402_v33 = vpack.c.bf16 %v868_v29, %v868_v29  ;;  %v625_v34 = vadd.f32 %v1862_v17, %v624_v30  ;;  %v753_v35 = vadd.f32 %v1862_v17, %v752_v31 }
 0x13b   :  { %v626_v36 = vpop.f32.mrf.mxu0  ;;  %v754_v37 = vpop.f32.mrf.mxu1 }
 0x13c   :  { %1157 = vst.msk [vmem:[%s2187_s3 + $0x34] sm:$0xf] %vm1143_vm0, %v1370_v32  ;;  %1189 = vst.msk [vmem:[%s2187_s3 + $0xb4] sm:$0xf] %vm1143_vm0, %v1402_v33  ;;  %v837_v38 = vmax.f32 %v625_v34, 0.0  ;;  %v869_v39 = vmax.f32 %v753_v35, 0.0 }
 0x13d   :  { %v627_v40 = vpop.f32.mrf.mxu0  ;;  %v755_v41 = vpop.f32.mrf.mxu1 }
 0x13e   :  { %v1371_v42 = vpack.c.bf16 %v837_v38, %v837_v38  ;;  %v1403_v43 = vpack.c.bf16 %v869_v39, %v869_v39  ;;  %v628_v44 = vadd.f32 %v1862_v17, %v627_v40  ;;  %v756_v45 = vadd.f32 %v1862_v17, %v755_v41 }
 0x13f   :  { %v629_v46 = vpop.f32.mrf.mxu0  ;;  %v757_v47 = vpop.f32.mrf.mxu1 }
 0x140   :  { %1158 = vst.msk [vmem:[%s2187_s3 + $0x38] sm:$0xf] %vm1143_vm0, %v1371_v42  ;;  %1190 = vst.msk [vmem:[%s2187_s3 + $0xb8] sm:$0xf] %vm1143_vm0, %v1403_v43  ;;  %v838_v48 = vmax.f32 %v628_v44, 0.0  ;;  %v870_v49 = vmax.f32 %v756_v45, 0.0 }
 0x141   :  { %v632_v50 = vpop.f32.mrf.mxu0  ;;  %v760_v51 = vpop.f32.mrf.mxu1 }
 0x142   :  { %v1372_v52 = vpack.c.bf16 %v838_v48, %v838_v48  ;;  %v1404_v53 = vpack.c.bf16 %v870_v49, %v870_v49  ;;  %v633_v54 = vadd.f32 %v1862_v17, %v632_v50  ;;  %v761_v55 = vadd.f32 %v1862_v17, %v760_v51 }
 0x143   :  { %v634_v56 = vpop.f32.mrf.mxu0  ;;  %v762_v57 = vpop.f32.mrf.mxu1 }
 0x144   :  { %1159 = vst.msk [vmem:[%s2187_s3 + $0x3c] sm:$0xf] %vm1143_vm0, %v1372_v52  ;;  %1191 = vst.msk [vmem:[%s2187_s3 + $0xbc] sm:$0xf] %vm1143_vm0, %v1404_v53  ;;  %v839_v58 = vmax.f32 %v633_v54, 0.0  ;;  %v871_v59 = vmax.f32 %v761_v55, 0.0 }
 0x145   :  { %v635_v60 = vpop.f32.mrf.mxu0  ;;  %v763_v61 = vpop.f32.mrf.mxu1 }
 0x146   :  { %v1373_v62 = vpack.c.bf16 %v839_v58, %v839_v58  ;;  %v1405_v63 = vpack.c.bf16 %v871_v59, %v871_v59  ;;  %v636_v0 = vadd.f32 %v1862_v17, %v635_v60  ;;  %v764_v1 = vadd.f32 %v1862_v17, %v763_v61 }
 0x147   :  { %v637_v2 = vpop.f32.mrf.mxu0  ;;  %v765_v3 = vpop.f32.mrf.mxu1 }
 0x148   :  { %1160 = vst.msk [vmem:[%s2187_s3 + $0x40] sm:$0xf] %vm1143_vm0, %v1373_v62  ;;  %1192 = vst.msk [vmem:[%s2187_s3 + $0xc0] sm:$0xf] %vm1143_vm0, %v1405_v63  ;;  %v840_v4 = vmax.f32 %v636_v0, 0.0  ;;  %v872_v5 = vmax.f32 %v764_v1, 0.0 }
 0x149   :  { %v640_v6 = vpop.f32.mrf.mxu0  ;;  %v768_v7 = vpop.f32.mrf.mxu1 }
 0x14a   :  { %v1374_v8 = vpack.c.bf16 %v840_v4, %v840_v4  ;;  %v1406_v9 = vpack.c.bf16 %v872_v5, %v872_v5  ;;  %v641_v10 = vadd.f32 %v1862_v17, %v640_v6  ;;  %v769_v11 = vadd.f32 %v1862_v17, %v768_v7 }
 0x14b   :  { %v642_v12 = vpop.f32.mrf.mxu0  ;;  %v770_v13 = vpop.f32.mrf.mxu1 }
 0x14c   :  { %1161 = vst.msk [vmem:[%s2187_s3 + $0x44] sm:$0xf] %vm1143_vm0, %v1374_v8  ;;  %1193 = vst.msk [vmem:[%s2187_s3 + $0xc4] sm:$0xf] %vm1143_vm0, %v1406_v9  ;;  %v841_v14 = vmax.f32 %v641_v10, 0.0  ;;  %v873_v15 = vmax.f32 %v769_v11, 0.0 }
 0x14d   :  { %v643_v16 = vpop.f32.mrf.mxu0  ;;  %v771_v18 = vpop.f32.mrf.mxu1 }
 0x14e   :  { %v1375_v19 = vpack.c.bf16 %v841_v14, %v841_v14  ;;  %v1407_v20 = vpack.c.bf16 %v873_v15, %v873_v15  ;;  %v644_v21 = vadd.f32 %v1862_v17, %v643_v16  ;;  %v772_v22 = vadd.f32 %v1862_v17, %v771_v18 }
 0x14f   :  { %v645_v23 = vpop.f32.mrf.mxu0  ;;  %v773_v24 = vpop.f32.mrf.mxu1 }
 0x150   :  { %1162 = vst.msk [vmem:[%s2187_s3 + $0x48] sm:$0xf] %vm1143_vm0, %v1375_v19  ;;  %1194 = vst.msk [vmem:[%s2187_s3 + $0xc8] sm:$0xf] %vm1143_vm0, %v1407_v20  ;;  %v842_v25 = vmax.f32 %v644_v21, 0.0  ;;  %v874_v26 = vmax.f32 %v772_v22, 0.0 }
 0x151   :  { %v648_v27 = vpop.f32.mrf.mxu0  ;;  %v776_v28 = vpop.f32.mrf.mxu1 }
 0x152   :  { %v1376_v29 = vpack.c.bf16 %v842_v25, %v842_v25  ;;  %v1408_v30 = vpack.c.bf16 %v874_v26, %v874_v26  ;;  %v649_v31 = vadd.f32 %v1862_v17, %v648_v27  ;;  %v777_v32 = vadd.f32 %v1862_v17, %v776_v28 }
 0x153   :  { %v650_v33 = vpop.f32.mrf.mxu0  ;;  %v778_v34 = vpop.f32.mrf.mxu1 }
 0x154   :  { %1163 = vst.msk [vmem:[%s2187_s3 + $0x4c] sm:$0xf] %vm1143_vm0, %v1376_v29  ;;  %1195 = vst.msk [vmem:[%s2187_s3 + $0xcc] sm:$0xf] %vm1143_vm0, %v1408_v30  ;;  %v843_v35 = vmax.f32 %v649_v31, 0.0  ;;  %v875_v36 = vmax.f32 %v777_v32, 0.0 }
 0x155   :  { %v651_v37 = vpop.f32.mrf.mxu0  ;;  %v779_v38 = vpop.f32.mrf.mxu1 }
 0x156   :  { %v1377_v39 = vpack.c.bf16 %v843_v35, %v843_v35  ;;  %v1409_v40 = vpack.c.bf16 %v875_v36, %v875_v36  ;;  %v652_v41 = vadd.f32 %v1862_v17, %v651_v37  ;;  %v780_v42 = vadd.f32 %v1862_v17, %v779_v38 }
 0x157   :  { %v653_v43 = vpop.f32.mrf.mxu0  ;;  %v781_v44 = vpop.f32.mrf.mxu1 }
 0x158   :  { %1164 = vst.msk [vmem:[%s2187_s3 + $0x50] sm:$0xf] %vm1143_vm0, %v1377_v39  ;;  %1196 = vst.msk [vmem:[%s2187_s3 + $0xd0] sm:$0xf] %vm1143_vm0, %v1409_v40  ;;  %v844_v45 = vmax.f32 %v652_v41, 0.0  ;;  %v876_v46 = vmax.f32 %v780_v42, 0.0 }
 0x159   :  { %v656_v47 = vpop.f32.mrf.mxu0  ;;  %v784_v48 = vpop.f32.mrf.mxu1 }
 0x15a   :  { %v1378_v49 = vpack.c.bf16 %v844_v45, %v844_v45  ;;  %v1410_v50 = vpack.c.bf16 %v876_v46, %v876_v46  ;;  %v657_v51 = vadd.f32 %v1862_v17, %v656_v47  ;;  %v785_v52 = vadd.f32 %v1862_v17, %v784_v48 }
 0x15b   :  { %v658_v53 = vpop.f32.mrf.mxu0  ;;  %v786_v54 = vpop.f32.mrf.mxu1 }
 0x15c   :  { %1165 = vst.msk [vmem:[%s2187_s3 + $0x54] sm:$0xf] %vm1143_vm0, %v1378_v49  ;;  %1197 = vst.msk [vmem:[%s2187_s3 + $0xd4] sm:$0xf] %vm1143_vm0, %v1410_v50  ;;  %v845_v55 = vmax.f32 %v657_v51, 0.0  ;;  %v877_v56 = vmax.f32 %v785_v52, 0.0 }
 0x15d   :  { %v659_v57 = vpop.f32.mrf.mxu0  ;;  %v787_v58 = vpop.f32.mrf.mxu1 }
 0x15e   :  { %v1379_v59 = vpack.c.bf16 %v845_v55, %v845_v55  ;;  %v1411_v60 = vpack.c.bf16 %v877_v56, %v877_v56  ;;  %v660_v61 = vadd.f32 %v1862_v17, %v659_v57  ;;  %v788_v62 = vadd.f32 %v1862_v17, %v787_v58 }
 0x15f   :  { %v661_v63 = vpop.f32.mrf.mxu0  ;;  %v789_v0 = vpop.f32.mrf.mxu1 }
 0x160   :  { %1166 = vst.msk [vmem:[%s2187_s3 + $0x58] sm:$0xf] %vm1143_vm0, %v1379_v59  ;;  %1198 = vst.msk [vmem:[%s2187_s3 + $0xd8] sm:$0xf] %vm1143_vm0, %v1411_v60  ;;  %v846_v1 = vmax.f32 %v660_v61, 0.0  ;;  %v878_v2 = vmax.f32 %v788_v62, 0.0 }
 0x161   :  { %v664_v3 = vpop.f32.mrf.mxu0  ;;  %v792_v4 = vpop.f32.mrf.mxu1 }
 0x162   :  { %v1380_v5 = vpack.c.bf16 %v846_v1, %v846_v1  ;;  %v1412_v6 = vpack.c.bf16 %v878_v2, %v878_v2  ;;  %v665_v7 = vadd.f32 %v1862_v17, %v664_v3  ;;  %v793_v8 = vadd.f32 %v1862_v17, %v792_v4 }
 0x163   :  { %v666_v9 = vpop.f32.mrf.mxu0  ;;  %v794_v10 = vpop.f32.mrf.mxu1 }
 0x164   :  { %1167 = vst.msk [vmem:[%s2187_s3 + $0x5c] sm:$0xf] %vm1143_vm0, %v1380_v5  ;;  %1199 = vst.msk [vmem:[%s2187_s3 + $0xdc] sm:$0xf] %vm1143_vm0, %v1412_v6  ;;  %v847_v11 = vmax.f32 %v665_v7, 0.0  ;;  %v879_v12 = vmax.f32 %v793_v8, 0.0 }
 0x165   :  { %v667_v13 = vpop.f32.mrf.mxu0  ;;  %v795_v14 = vpop.f32.mrf.mxu1 }
 0x166   :  { %v1381_v15 = vpack.c.bf16 %v847_v11, %v847_v11  ;;  %v1413_v16 = vpack.c.bf16 %v879_v12, %v879_v12  ;;  %v668_v18 = vadd.f32 %v1862_v17, %v667_v13  ;;  %v796_v19 = vadd.f32 %v1862_v17, %v795_v14 }
 0x167   :  { %v669_v20 = vpop.f32.mrf.mxu0  ;;  %v797_v21 = vpop.f32.mrf.mxu1 }
 0x168   :  { %1168 = vst.msk [vmem:[%s2187_s3 + $0x60] sm:$0xf] %vm1143_vm0, %v1381_v15  ;;  %1200 = vst.msk [vmem:[%s2187_s3 + $0xe0] sm:$0xf] %vm1143_vm0, %v1413_v16  ;;  %v848_v22 = vmax.f32 %v668_v18, 0.0  ;;  %v880_v23 = vmax.f32 %v796_v19, 0.0 }
 0x169   :  { %v672_v24 = vpop.f32.mrf.mxu0  ;;  %v800_v25 = vpop.f32.mrf.mxu1 }
 0x16a   :  { %v1382_v26 = vpack.c.bf16 %v848_v22, %v848_v22  ;;  %v1414_v27 = vpack.c.bf16 %v880_v23, %v880_v23  ;;  %v673_v28 = vadd.f32 %v1862_v17, %v672_v24  ;;  %v801_v29 = vadd.f32 %v1862_v17, %v800_v25 }
 0x16b   :  { %v674_v30 = vpop.f32.mrf.mxu0  ;;  %v802_v31 = vpop.f32.mrf.mxu1 }
 0x16c   :  { %1169 = vst.msk [vmem:[%s2187_s3 + $0x64] sm:$0xf] %vm1143_vm0, %v1382_v26  ;;  %1201 = vst.msk [vmem:[%s2187_s3 + $0xe4] sm:$0xf] %vm1143_vm0, %v1414_v27  ;;  %v849_v32 = vmax.f32 %v673_v28, 0.0  ;;  %v881_v33 = vmax.f32 %v801_v29, 0.0 }
 0x16d   :  { %v675_v34 = vpop.f32.mrf.mxu0  ;;  %v803_v35 = vpop.f32.mrf.mxu1 }
 0x16e   :  { %v1383_v36 = vpack.c.bf16 %v849_v32, %v849_v32  ;;  %v1415_v37 = vpack.c.bf16 %v881_v33, %v881_v33  ;;  %v676_v38 = vadd.f32 %v1862_v17, %v675_v34  ;;  %v804_v39 = vadd.f32 %v1862_v17, %v803_v35 }
 0x16f   :  { %v677_v40 = vpop.f32.mrf.mxu0  ;;  %v805_v41 = vpop.f32.mrf.mxu1 }
 0x170   :  { %1170 = vst.msk [vmem:[%s2187_s3 + $0x68] sm:$0xf] %vm1143_vm0, %v1383_v36  ;;  %1202 = vst.msk [vmem:[%s2187_s3 + $0xe8] sm:$0xf] %vm1143_vm0, %v1415_v37  ;;  %v850_v42 = vmax.f32 %v676_v38, 0.0  ;;  %v882_v43 = vmax.f32 %v804_v39, 0.0 }
 0x171   :  { %v680_v44 = vpop.f32.mrf.mxu0  ;;  %v808_v45 = vpop.f32.mrf.mxu1 }
 0x172   :  { %v1384_v46 = vpack.c.bf16 %v850_v42, %v850_v42  ;;  %v1416_v47 = vpack.c.bf16 %v882_v43, %v882_v43  ;;  %v681_v48 = vadd.f32 %v1862_v17, %v680_v44  ;;  %v809_v49 = vadd.f32 %v1862_v17, %v808_v45 }
 0x173   :  { %v682_v50 = vpop.f32.mrf.mxu0  ;;  %v810_v51 = vpop.f32.mrf.mxu1 }
 0x174   :  { %1171 = vst.msk [vmem:[%s2187_s3 + $0x6c] sm:$0xf] %vm1143_vm0, %v1384_v46  ;;  %1203 = vst.msk [vmem:[%s2187_s3 + $0xec] sm:$0xf] %vm1143_vm0, %v1416_v47  ;;  %v851_v52 = vmax.f32 %v681_v48, 0.0  ;;  %v883_v53 = vmax.f32 %v809_v49, 0.0 }
 0x175   :  { %v683_v54 = vpop.f32.mrf.mxu0  ;;  %v811_v55 = vpop.f32.mrf.mxu1 }
 0x176   :  { %v1385_v56 = vpack.c.bf16 %v851_v52, %v851_v52  ;;  %v1417_v57 = vpack.c.bf16 %v883_v53, %v883_v53  ;;  %v684_v58 = vadd.f32 %v1862_v17, %v683_v54  ;;  %v812_v59 = vadd.f32 %v1862_v17, %v811_v55 }
 0x177   :  { %v685_v60 = vpop.f32.mrf.mxu0  ;;  %v813_v61 = vpop.f32.mrf.mxu1 }
 0x178   :  { %1172 = vst.msk [vmem:[%s2187_s3 + $0x70] sm:$0xf] %vm1143_vm0, %v1385_v56  ;;  %1204 = vst.msk [vmem:[%s2187_s3 + $0xf0] sm:$0xf] %vm1143_vm0, %v1417_v57  ;;  %v852_v62 = vmax.f32 %v684_v58, 0.0  ;;  %v884_v63 = vmax.f32 %v812_v59, 0.0 }
 0x179   :  { %v688_v0 = vpop.f32.mrf.mxu0  ;;  %v816_v1 = vpop.f32.mrf.mxu1 }
 0x17a   :  { %v1386_v2 = vpack.c.bf16 %v852_v62, %v852_v62  ;;  %v1418_v3 = vpack.c.bf16 %v884_v63, %v884_v63  ;;  %v689_v4 = vadd.f32 %v1862_v17, %v688_v0  ;;  %v817_v5 = vadd.f32 %v1862_v17, %v816_v1 }
 0x17b   :  { %v690_v6 = vpop.f32.mrf.mxu0  ;;  %v818_v7 = vpop.f32.mrf.mxu1 }
 0x17c   :  { %1173 = vst.msk [vmem:[%s2187_s3 + $0x74] sm:$0xf] %vm1143_vm0, %v1386_v2  ;;  %1205 = vst.msk [vmem:[%s2187_s3 + $0xf4] sm:$0xf] %vm1143_vm0, %v1418_v3  ;;  %v853_v8 = vmax.f32 %v689_v4, 0.0  ;;  %v885_v9 = vmax.f32 %v817_v5, 0.0 }
 0x17d   :  { %v691_v10 = vpop.f32.mrf.mxu0  ;;  %v819_v11 = vpop.f32.mrf.mxu1 }
 0x17e   :  { %v1387_v12 = vpack.c.bf16 %v853_v8, %v853_v8  ;;  %v1419_v13 = vpack.c.bf16 %v885_v9, %v885_v9  ;;  %v692_v14 = vadd.f32 %v1862_v17, %v691_v10  ;;  %v820_v15 = vadd.f32 %v1862_v17, %v819_v11 }
 0x17f   :  { %v693_v16 = vpop.f32.mrf.mxu0  ;;  %v821_v18 = vpop.f32.mrf.mxu1 }
 0x180   :  { %1174 = vst.msk [vmem:[%s2187_s3 + $0x78] sm:$0xf] %vm1143_vm0, %v1387_v12  ;;  %1206 = vst.msk [vmem:[%s2187_s3 + $0xf8] sm:$0xf] %vm1143_vm0, %v1419_v13  ;;  %v854_v19 = vmax.f32 %v692_v14, 0.0  ;;  %v886_v20 = vmax.f32 %v820_v15, 0.0 }
 0x182   :  { %v1388_v21 = vpack.c.bf16 %v854_v19, %v854_v19  ;;  %v1420_v22 = vpack.c.bf16 %v886_v20, %v886_v20 }
 0x184   :  { %1175 = vst.msk [vmem:[%s2187_s3 + $0x7c] sm:$0xf] %vm1143_vm0, %v1388_v21  ;;  %1207 = vst.msk [vmem:[%s2187_s3 + $0xfc] sm:$0xf] %vm1143_vm0, %v1420_v22 }

// kernel: model_openai_forward.4
= control target key start
LH: loop header
LB: loop body
LE: loop exit
PB: predicated region body
PF: predicated region fallthrough
CT: control target
= control target key end

     0   :  { %vm744_vm0 = vcmask 519168   ;;  %s1367_s1 = inlined_call_operand.vmem [shape: bf16[512,64], index: 1, kind: input, shape index: {}]   ;;  %s1368_s0 = inlined_call_operand.vmem [shape: bf16[128,512], index: 0, kind: input, shape index: {}]   ;;  %s1369_s2 = inlined_call_operand.vmem [shape: f32[1,64], index: 2, kind: input, shape index: {}]   ;;  %s1370_s3 = inlined_call_operand.vmem [shape: bf16[128,64], index: 3, kind: output, shape index: {}]  }
   0x1   :  { %v990_v0 = vld [vmem:[%s1367_s1 + $0x78] sm:$0xff]   ;;  %v994_v4 = vld [vmem:[%s1367_s1 + $0x70] sm:$0xff]   ;;  %v998_v8 = vld [vmem:[%s1367_s1 + $0x68] sm:$0xff]  }
   0x2   :  { %v991_v1 = vld [vmem:[%s1367_s1 + $0xf8] sm:$0xff]   ;;  %862 = vmatprep.subr.bf16.mxu0 %v990_v0  ;;  %v995_v5 = vld [vmem:[%s1367_s1 + $0xf0] sm:$0xff]   ;;  %v999_v9 = vld [vmem:[%s1367_s1 + $0xe8] sm:$0xff]  }
   0x3   :  { %v992_v2 = vld [vmem:[%s1367_s1 + $0x38] sm:$0xff]   ;;  %926 = vmatprep.subr.bf16.mxu1 %v991_v1  ;;  %v996_v6 = vld [vmem:[%s1367_s1 + $0x30] sm:$0xff]   ;;  %v1000_v10 = vld [vmem:[%s1367_s1 + $0x28] sm:$0xff]  }
   0x4   :  { %v993_v3 = vld [vmem:[%s1367_s1 + $0xb8] sm:$0xff]   ;;  %863 = vmatpush3.bf16.msra.mxu0 %v992_v2  ;;  %v997_v7 = vld [vmem:[%s1367_s1 + $0xb0] sm:$0xff]   ;;  %v1001_v11 = vld [vmem:[%s1367_s1 + $0xa8] sm:$0xff]  }
   0x5   :  { %927 = vmatpush3.bf16.msra.mxu1 %v993_v3  ;;  %864 = vmatprep.subr.bf16.mxu0 %v994_v4  ;;  %v1002_v12 = vld [vmem:[%s1367_s1 + $0x60] sm:$0xff]   ;;  %v1006_v16 = vld [vmem:[%s1367_s1 + $0x58] sm:$0xff]   ;;  %v1010_v20 = vld [vmem:[%s1367_s1 + $0x50] sm:$0xff]  }
   0x6   :  { %928 = vmatprep.subr.bf16.mxu1 %v995_v5  ;;  %v1003_v13 = vld [vmem:[%s1367_s1 + $0xe0] sm:$0xff]   ;;  %v1007_v17 = vld [vmem:[%s1367_s1 + $0xd8] sm:$0xff]   ;;  %v1011_v21 = vld [vmem:[%s1367_s1 + $0xd0] sm:$0xff]  }
   0x7   :  { %v1004_v14 = vld [vmem:[%s1367_s1 + $0x20] sm:$0xff]   ;;  %v1008_v18 = vld [vmem:[%s1367_s1 + $0x18] sm:$0xff]   ;;  %v1012_v22 = vld [vmem:[%s1367_s1 + $0x10] sm:$0xff]  }
   0x8   :  { %865 = vmatpush3.bf16.msra.mxu0 %v996_v6  ;;  %v1005_v15 = vld [vmem:[%s1367_s1 + $0xa0] sm:$0xff]   ;;  %v1009_v19 = vld [vmem:[%s1367_s1 + $0x98] sm:$0xff]   ;;  %v1013_v23 = vld [vmem:[%s1367_s1 + $0x90] sm:$0xff]  }
   0x9   :  { %929 = vmatpush3.bf16.msra.mxu1 %v997_v7  ;;  %866 = vmatprep.subr.bf16.mxu0 %v998_v8  ;;  %v1014_v24 = vld [vmem:[%s1367_s1 + $0x48] sm:$0xff]   ;;  %v1018_v28 = vld [vmem:[%s1367_s1 + $0x40] sm:$0xff]  }
   0xa   :  { %930 = vmatprep.subr.bf16.mxu1 %v999_v9  ;;  %v1015_v25 = vld [vmem:[%s1367_s1 + $0xc8] sm:$0xff]   ;;  %v1019_v29 = vld [vmem:[%s1367_s1 + $0xc0] sm:$0xff]  }
   0xb   :  { %v1016_v26 = vld [vmem:[%s1367_s1 + $0x8] sm:$0xff]   ;;  %v1020_v30 = vld [vmem:[%s1367_s1] sm:$0xff]  }
   0xc   :  { %867 = vmatpush3.bf16.msra.mxu0 %v1000_v10  ;;  %v1017_v27 = vld [vmem:[%s1367_s1 + $0x88] sm:$0xff]   ;;  %v1021_v31 = vld [vmem:[%s1367_s1 + $0x80] sm:$0xff]  }
   0xd   :  { %931 = vmatpush3.bf16.msra.mxu1 %v1001_v11  ;;  %868 = vmatprep.subr.bf16.mxu0 %v1002_v12  ;;  %v1022_v32 = vld [vmem:[%s1368_s0] ss:$16 sps:$4 sm:$0xff]   ;;  %v1024_v33 = vld [vmem:[%s1368_s0 + $0x4] ss:$16 sps:$4 sm:$0xff]   ;;  %v1025_v34 = vld [vmem:[%s1368_s0 + $0x8] ss:$16 sps:$4 sm:$0xff]  }
   0xe   :  { %932 = vmatprep.subr.bf16.mxu1 %v1003_v13  ;;  %v1027_v35 = vld [vmem:[%s1368_s0 + $0xc] ss:$16 sps:$4 sm:$0xff]   ;;  %502 = vmatprep.mubr.bf16.mxu0 %v1024_v33  ;;  %v1028_v36 = vld [vmem:[%s1368_s0 + $0x24] ss:$16 sps:$4 sm:$0xff]   ;;  %v1032_v38 = vld [vmem:[%s1368_s0 + $0x20] ss:$16 sps:$4 sm:$0xff]  }
   0xf   :  { %599 = vmatprep.mubr.bf16.mxu1 %v1027_v35  ;;  %v1030_v37 = vld [vmem:[%s1368_s0 + $0x2c] ss:$16 sps:$4 sm:$0xff]   ;;  %v1033_v39 = vld [vmem:[%s1368_s0 + $0x28] ss:$16 sps:$4 sm:$0xff]   ;;  %v1034_v40 = vld [vmem:[%s1368_s0 + $0x44] ss:$16 sps:$4 sm:$0xff]  }
  0x10   :  { %869 = vmatpush3.bf16.msra.mxu0 %v1004_v14  ;;  %v1036_v41 = vld [vmem:[%s1368_s0 + $0x4c] ss:$16 sps:$4 sm:$0xff]   ;;  %v1038_v42 = vld [vmem:[%s1368_s0 + $0x40] ss:$16 sps:$4 sm:$0xff]   ;;  %v1039_v43 = vld [vmem:[%s1368_s0 + $0x48] ss:$16 sps:$4 sm:$0xff]  }
  0x11   :  { %933 = vmatpush3.bf16.msra.mxu1 %v1005_v15  ;;  %870 = vmatprep.subr.bf16.mxu0 %v1006_v16  ;;  %v1040_v44 = vld [vmem:[%s1368_s0 + $0x64] ss:$16 sps:$4 sm:$0xff]   ;;  %v1042_v45 = vld [vmem:[%s1368_s0 + $0x6c] ss:$16 sps:$4 sm:$0xff]   ;;  %v1044_v46 = vld [vmem:[%s1368_s0 + $0x60] ss:$16 sps:$4 sm:$0xff]  }
  0x12   :  { %934 = vmatprep.subr.bf16.mxu1 %v1007_v17  ;;  %v1045_v47 = vld [vmem:[%s1368_s0 + $0x68] ss:$16 sps:$4 sm:$0xff]   ;;  %v1046_v48 = vld [vmem:[%s1368_s0 + $0x84] ss:$16 sps:$4 sm:$0xff]   ;;  %v1048_v49 = vld [vmem:[%s1368_s0 + $0x8c] ss:$16 sps:$4 sm:$0xff]  }
  0x13   :  { %v1050_v50 = vld [vmem:[%s1368_s0 + $0x80] ss:$16 sps:$4 sm:$0xff]   ;;  %v1051_v51 = vld [vmem:[%s1368_s0 + $0x88] ss:$16 sps:$4 sm:$0xff]   ;;  %v1052_v52 = vld [vmem:[%s1368_s0 + $0xa4] ss:$16 sps:$4 sm:$0xff]  }
  0x14   :  { %871 = vmatpush3.bf16.msra.mxu0 %v1008_v18  ;;  %v1054_v53 = vld [vmem:[%s1368_s0 + $0xac] ss:$16 sps:$4 sm:$0xff]   ;;  %v1056_v54 = vld [vmem:[%s1368_s0 + $0xa0] ss:$16 sps:$4 sm:$0xff]   ;;  %v1057_v55 = vld [vmem:[%s1368_s0 + $0xa8] ss:$16 sps:$4 sm:$0xff]  }
  0x15   :  { %935 = vmatpush3.bf16.msra.mxu1 %v1009_v19  ;;  %872 = vmatprep.subr.bf16.mxu0 %v1010_v20  ;;  %v1058_v56 = vld [vmem:[%s1368_s0 + $0xc4] ss:$16 sps:$4 sm:$0xff]   ;;  %v1060_v57 = vld [vmem:[%s1368_s0 + $0xcc] ss:$16 sps:$4 sm:$0xff]   ;;  %v1062_v58 = vld [vmem:[%s1368_s0 + $0xc0] ss:$16 sps:$4 sm:$0xff]  }
  0x16   :  { %936 = vmatprep.subr.bf16.mxu1 %v1011_v21  ;;  %v1063_v59 = vld [vmem:[%s1368_s0 + $0xc8] ss:$16 sps:$4 sm:$0xff]   ;;  %v1064_v60 = vld [vmem:[%s1368_s0 + $0xe4] ss:$16 sps:$4 sm:$0xff]   ;;  %v1066_v61 = vld [vmem:[%s1368_s0 + $0xec] ss:$16 sps:$4 sm:$0xff]  }
  0x17   :  { %v1068_v62 = vld [vmem:[%s1368_s0 + $0xe0] ss:$16 sps:$4 sm:$0xff]   ;;  %v1069_v63 = vld [vmem:[%s1368_s0 + $0xe8] ss:$16 sps:$4 sm:$0xff]  }
  0x18   :  { %873 = vmatpush3.bf16.msra.mxu0 %v1012_v22  ;;  %v1285_v2 = vld [vmem:[%s1369_s2] ss:$0 sm:$0xff] }
  0x19   :  { %937 = vmatpush3.bf16.msra.mxu1 %v1013_v23  ;;  %874 = vmatprep.subr.bf16.mxu0 %v1014_v24 }
  0x1a   :  { %938 = vmatprep.subr.bf16.mxu1 %v1015_v25 }
  0x1c   :  { %875 = vmatpush3.bf16.msra.mxu0 %v1016_v26 }
  0x1d   :  { %939 = vmatpush3.bf16.msra.mxu1 %v1017_v27  ;;  %876 = vmatprep.subr.bf16.mxu0 %v1018_v28 }
  0x1e   :  { %940 = vmatprep.subr.bf16.mxu1 %v1019_v29 }
  0x20   :  { %877 = vmatpush3.bf16.msra.mxu0 %v1020_v30 }
  0x21   :  { %941 = vmatpush3.bf16.msra.mxu1 %v1021_v31 }
  0x23   :  { %503 = vmatmul.mubr.bf16.vlgmr.msra.gmra.mxu0 %v1022_v32 }
  0x24   :  { %600 = vmatmul.mubr.bf16.vlgmr.msra.gmra.mxu1 %v1025_v34  ;;  %510 = vmatprep.mubr.bf16.mxu0 %v1028_v36 }
  0x25   :  { %607 = vmatprep.mubr.bf16.mxu1 %v1030_v37 }
  0x2b   :  { %511 = vmatmul.mubr.bf16.gmra.mxu0 %v1032_v38 }
  0x2c   :  { %608 = vmatmul.mubr.bf16.gmra.mxu1 %v1033_v39  ;;  %518 = vmatprep.mubr.bf16.mxu0 %v1034_v40 }
  0x2d   :  { %615 = vmatprep.mubr.bf16.mxu1 %v1036_v41 }
  0x33   :  { %519 = vmatmul.mubr.bf16.gmra.mxu0 %v1038_v42 }
  0x34   :  { %616 = vmatmul.mubr.bf16.gmra.mxu1 %v1039_v43  ;;  %526 = vmatprep.mubr.bf16.mxu0 %v1040_v44 }
  0x35   :  { %623 = vmatprep.mubr.bf16.mxu1 %v1042_v45 }
  0x3b   :  { %527 = vmatmul.mubr.bf16.gmra.mxu0 %v1044_v46 }
  0x3c   :  { %624 = vmatmul.mubr.bf16.gmra.mxu1 %v1045_v47  ;;  %534 = vmatprep.mubr.bf16.mxu0 %v1046_v48 }
  0x3d   :  { %631 = vmatprep.mubr.bf16.mxu1 %v1048_v49 }
  0x43   :  { %535 = vmatmul.mubr.bf16.gmra.mxu0 %v1050_v50 }
  0x44   :  { %632 = vmatmul.mubr.bf16.gmra.mxu1 %v1051_v51  ;;  %542 = vmatprep.mubr.bf16.mxu0 %v1052_v52 }
  0x45   :  { %639 = vmatprep.mubr.bf16.mxu1 %v1054_v53 }
  0x4b   :  { %543 = vmatmul.mubr.bf16.gmra.mxu0 %v1056_v54 }
  0x4c   :  { %640 = vmatmul.mubr.bf16.gmra.mxu1 %v1057_v55  ;;  %550 = vmatprep.mubr.bf16.mxu0 %v1058_v56 }
  0x4d   :  { %647 = vmatprep.mubr.bf16.mxu1 %v1060_v57 }
  0x53   :  { %551 = vmatmul.mubr.bf16.gmra.mxu0 %v1062_v58 }
  0x54   :  { %648 = vmatmul.mubr.bf16.gmra.mxu1 %v1063_v59  ;;  %558 = vmatprep.mubr.bf16.mxu0 %v1064_v60 }
  0x55   :  { %655 = vmatprep.mubr.bf16.mxu1 %v1066_v61 }
  0x5b   :  { %559 = vmatmul.mubr.bf16.gmra.mxu0 %v1068_v62 }
  0x5c   :  { %656 = vmatmul.mubr.bf16.gmra.mxu1 %v1069_v63 }
  0xe3   :  { %v878_v0 = vpop.f32.mrf.mxu0 }
  0xe4   :  { %v942_v1 = vpop.f32.mrf.mxu1 }
  0xe5   :  { %v879_v3 = vpop.f32.mrf.mxu0 }
  0xe6   :  { %v880_v4 = vadd.f32 %v879_v3, %v878_v0  ;;  %v943_v5 = vpop.f32.mrf.mxu1 }
  0xe7   :  { %v881_v6 = vpop.f32.mrf.mxu0  ;;  %v944_v8 = vadd.f32 %v943_v5, %v942_v1 }
  0xe8   :  { %v505_v7 = vadd.f32 %v880_v4, %v1285_v2  ;;  %v945_v9 = vpop.f32.mrf.mxu1 }
  0xe9   :  { %v882_v10 = vpop.f32.mrf.mxu0 }
  0xea   :  { %v602_v11 = vadd.f32 %v944_v8, %v505_v7  ;;  %v883_v12 = vadd.f32 %v882_v10, %v881_v6  ;;  %v946_v13 = vpop.f32.mrf.mxu1 }
  0xeb   :  { %v884_v14 = vpop.f32.mrf.mxu0  ;;  %v947_v17 = vadd.f32 %v946_v13, %v945_v9 }
  0xec   :  { %v664_v15 = vmax.f32 %v602_v11, 0.0  ;;  %v508_v16 = vadd.f32 %v883_v12, %v1285_v2  ;;  %v948_v18 = vpop.f32.mrf.mxu1 }
  0xed   :  { %v885_v19 = vpop.f32.mrf.mxu0 }
  0xee   :  { %v846_v20 = vpack.c.bf16 %v664_v15, %v664_v15  ;;  %v605_v21 = vadd.f32 %v947_v17, %v508_v16  ;;  %v886_v22 = vadd.f32 %v885_v19, %v884_v14  ;;  %v949_v23 = vpop.f32.mrf.mxu1 }
  0xef   :  { %v887_v24 = vpop.f32.mrf.mxu0  ;;  %v950_v27 = vadd.f32 %v949_v23, %v948_v18 }
  0xf0   :  { %745 = vst.msk [vmem:[%s1370_s3] sm:$0xf] %vm744_vm0, %v846_v20  ;;  %v665_v25 = vmax.f32 %v605_v21, 0.0  ;;  %v513_v26 = vadd.f32 %v886_v22, %v1285_v2  ;;  %v951_v28 = vpop.f32.mrf.mxu1 }
  0xf1   :  { %v888_v29 = vpop.f32.mrf.mxu0 }
  0xf2   :  { %v847_v30 = vpack.c.bf16 %v665_v25, %v665_v25  ;;  %v610_v31 = vadd.f32 %v950_v27, %v513_v26  ;;  %v889_v32 = vadd.f32 %v888_v29, %v887_v24  ;;  %v952_v33 = vpop.f32.mrf.mxu1 }
  0xf3   :  { %v890_v34 = vpop.f32.mrf.mxu0  ;;  %v953_v37 = vadd.f32 %v952_v33, %v951_v28 }
  0xf4   :  { %746 = vst.msk [vmem:[%s1370_s3 + $0x4] sm:$0xf] %vm744_vm0, %v847_v30  ;;  %v666_v35 = vmax.f32 %v610_v31, 0.0  ;;  %v516_v36 = vadd.f32 %v889_v32, %v1285_v2  ;;  %v954_v38 = vpop.f32.mrf.mxu1 }
  0xf5   :  { %v891_v39 = vpop.f32.mrf.mxu0 }
  0xf6   :  { %v848_v40 = vpack.c.bf16 %v666_v35, %v666_v35  ;;  %v613_v41 = vadd.f32 %v953_v37, %v516_v36  ;;  %v892_v42 = vadd.f32 %v891_v39, %v890_v34  ;;  %v955_v43 = vpop.f32.mrf.mxu1 }
  0xf7   :  { %v893_v44 = vpop.f32.mrf.mxu0  ;;  %v956_v47 = vadd.f32 %v955_v43, %v954_v38 }
  0xf8   :  { %747 = vst.msk [vmem:[%s1370_s3 + $0x8] sm:$0xf] %vm744_vm0, %v848_v40  ;;  %v667_v45 = vmax.f32 %v613_v41, 0.0  ;;  %v521_v46 = vadd.f32 %v892_v42, %v1285_v2  ;;  %v957_v48 = vpop.f32.mrf.mxu1 }
  0xf9   :  { %v894_v49 = vpop.f32.mrf.mxu0 }
  0xfa   :  { %v849_v50 = vpack.c.bf16 %v667_v45, %v667_v45  ;;  %v618_v51 = vadd.f32 %v956_v47, %v521_v46  ;;  %v895_v52 = vadd.f32 %v894_v49, %v893_v44  ;;  %v958_v53 = vpop.f32.mrf.mxu1 }
  0xfb   :  { %v896_v54 = vpop.f32.mrf.mxu0  ;;  %v959_v57 = vadd.f32 %v958_v53, %v957_v48 }
  0xfc   :  { %748 = vst.msk [vmem:[%s1370_s3 + $0xc] sm:$0xf] %vm744_vm0, %v849_v50  ;;  %v668_v55 = vmax.f32 %v618_v51, 0.0  ;;  %v524_v56 = vadd.f32 %v895_v52, %v1285_v2  ;;  %v960_v58 = vpop.f32.mrf.mxu1 }
  0xfd   :  { %v897_v59 = vpop.f32.mrf.mxu0 }
  0xfe   :  { %v850_v60 = vpack.c.bf16 %v668_v55, %v668_v55  ;;  %v621_v61 = vadd.f32 %v959_v57, %v524_v56  ;;  %v898_v62 = vadd.f32 %v897_v59, %v896_v54  ;;  %v961_v63 = vpop.f32.mrf.mxu1 }
  0xff   :  { %v899_v0 = vpop.f32.mrf.mxu0  ;;  %v962_v4 = vadd.f32 %v961_v63, %v960_v58 }
 0x100   :  { %749 = vst.msk [vmem:[%s1370_s3 + $0x10] sm:$0xf] %vm744_vm0, %v850_v60  ;;  %v669_v1 = vmax.f32 %v621_v61, 0.0  ;;  %v529_v3 = vadd.f32 %v898_v62, %v1285_v2  ;;  %v963_v5 = vpop.f32.mrf.mxu1 }
 0x101   :  { %v900_v6 = vpop.f32.mrf.mxu0 }
 0x102   :  { %v851_v7 = vpack.c.bf16 %v669_v1, %v669_v1  ;;  %v626_v8 = vadd.f32 %v962_v4, %v529_v3  ;;  %v901_v9 = vadd.f32 %v900_v6, %v899_v0  ;;  %v964_v10 = vpop.f32.mrf.mxu1 }
 0x103   :  { %v902_v11 = vpop.f32.mrf.mxu0  ;;  %v965_v14 = vadd.f32 %v964_v10, %v963_v5 }
 0x104   :  { %750 = vst.msk [vmem:[%s1370_s3 + $0x14] sm:$0xf] %vm744_vm0, %v851_v7  ;;  %v670_v12 = vmax.f32 %v626_v8, 0.0  ;;  %v532_v13 = vadd.f32 %v901_v9, %v1285_v2  ;;  %v966_v15 = vpop.f32.mrf.mxu1 }
 0x105   :  { %v903_v16 = vpop.f32.mrf.mxu0 }
 0x106   :  { %v852_v17 = vpack.c.bf16 %v670_v12, %v670_v12  ;;  %v629_v18 = vadd.f32 %v965_v14, %v532_v13  ;;  %v904_v19 = vadd.f32 %v903_v16, %v902_v11  ;;  %v967_v20 = vpop.f32.mrf.mxu1 }
 0x107   :  { %v905_v21 = vpop.f32.mrf.mxu0  ;;  %v968_v24 = vadd.f32 %v967_v20, %v966_v15 }
 0x108   :  { %751 = vst.msk [vmem:[%s1370_s3 + $0x18] sm:$0xf] %vm744_vm0, %v852_v17  ;;  %v671_v22 = vmax.f32 %v629_v18, 0.0  ;;  %v537_v23 = vadd.f32 %v904_v19, %v1285_v2  ;;  %v969_v25 = vpop.f32.mrf.mxu1 }
 0x109   :  { %v906_v26 = vpop.f32.mrf.mxu0 }
 0x10a   :  { %v853_v27 = vpack.c.bf16 %v671_v22, %v671_v22  ;;  %v634_v28 = vadd.f32 %v968_v24, %v537_v23  ;;  %v907_v29 = vadd.f32 %v906_v26, %v905_v21  ;;  %v970_v30 = vpop.f32.mrf.mxu1 }
 0x10b   :  { %v908_v31 = vpop.f32.mrf.mxu0  ;;  %v971_v34 = vadd.f32 %v970_v30, %v969_v25 }
 0x10c   :  { %752 = vst.msk [vmem:[%s1370_s3 + $0x1c] sm:$0xf] %vm744_vm0, %v853_v27  ;;  %v672_v32 = vmax.f32 %v634_v28, 0.0  ;;  %v540_v33 = vadd.f32 %v907_v29, %v1285_v2  ;;  %v972_v35 = vpop.f32.mrf.mxu1 }
 0x10d   :  { %v909_v36 = vpop.f32.mrf.mxu0 }
 0x10e   :  { %v854_v37 = vpack.c.bf16 %v672_v32, %v672_v32  ;;  %v637_v38 = vadd.f32 %v971_v34, %v540_v33  ;;  %v910_v39 = vadd.f32 %v909_v36, %v908_v31  ;;  %v973_v40 = vpop.f32.mrf.mxu1 }
 0x10f   :  { %v911_v41 = vpop.f32.mrf.mxu0  ;;  %v974_v44 = vadd.f32 %v973_v40, %v972_v35 }
 0x110   :  { %753 = vst.msk [vmem:[%s1370_s3 + $0x20] sm:$0xf] %vm744_vm0, %v854_v37  ;;  %v673_v42 = vmax.f32 %v637_v38, 0.0  ;;  %v545_v43 = vadd.f32 %v910_v39, %v1285_v2  ;;  %v975_v45 = vpop.f32.mrf.mxu1 }
 0x111   :  { %v912_v46 = vpop.f32.mrf.mxu0 }
 0x112   :  { %v855_v47 = vpack.c.bf16 %v673_v42, %v673_v42  ;;  %v642_v48 = vadd.f32 %v974_v44, %v545_v43  ;;  %v913_v49 = vadd.f32 %v912_v46, %v911_v41  ;;  %v976_v50 = vpop.f32.mrf.mxu1 }
 0x113   :  { %v914_v51 = vpop.f32.mrf.mxu0  ;;  %v977_v54 = vadd.f32 %v976_v50, %v975_v45 }
 0x114   :  { %754 = vst.msk [vmem:[%s1370_s3 + $0x24] sm:$0xf] %vm744_vm0, %v855_v47  ;;  %v674_v52 = vmax.f32 %v642_v48, 0.0  ;;  %v548_v53 = vadd.f32 %v913_v49, %v1285_v2  ;;  %v978_v55 = vpop.f32.mrf.mxu1 }
 0x115   :  { %v915_v56 = vpop.f32.mrf.mxu0 }
 0x116   :  { %v856_v57 = vpack.c.bf16 %v674_v52, %v674_v52  ;;  %v645_v58 = vadd.f32 %v977_v54, %v548_v53  ;;  %v916_v59 = vadd.f32 %v915_v56, %v914_v51  ;;  %v979_v60 = vpop.f32.mrf.mxu1 }
 0x117   :  { %v917_v61 = vpop.f32.mrf.mxu0  ;;  %v980_v0 = vadd.f32 %v979_v60, %v978_v55 }
 0x118   :  { %755 = vst.msk [vmem:[%s1370_s3 + $0x28] sm:$0xf] %vm744_vm0, %v856_v57  ;;  %v675_v62 = vmax.f32 %v645_v58, 0.0  ;;  %v553_v63 = vadd.f32 %v916_v59, %v1285_v2  ;;  %v981_v1 = vpop.f32.mrf.mxu1 }
 0x119   :  { %v918_v3 = vpop.f32.mrf.mxu0 }
 0x11a   :  { %v857_v4 = vpack.c.bf16 %v675_v62, %v675_v62  ;;  %v650_v5 = vadd.f32 %v980_v0, %v553_v63  ;;  %v919_v6 = vadd.f32 %v918_v3, %v917_v61  ;;  %v982_v7 = vpop.f32.mrf.mxu1 }
 0x11b   :  { %v920_v8 = vpop.f32.mrf.mxu0  ;;  %v983_v11 = vadd.f32 %v982_v7, %v981_v1 }
 0x11c   :  { %756 = vst.msk [vmem:[%s1370_s3 + $0x2c] sm:$0xf] %vm744_vm0, %v857_v4  ;;  %v676_v9 = vmax.f32 %v650_v5, 0.0  ;;  %v556_v10 = vadd.f32 %v919_v6, %v1285_v2  ;;  %v984_v12 = vpop.f32.mrf.mxu1 }
 0x11d   :  { %v921_v13 = vpop.f32.mrf.mxu0 }
 0x11e   :  { %v858_v14 = vpack.c.bf16 %v676_v9, %v676_v9  ;;  %v653_v15 = vadd.f32 %v983_v11, %v556_v10  ;;  %v922_v16 = vadd.f32 %v921_v13, %v920_v8  ;;  %v985_v17 = vpop.f32.mrf.mxu1 }
 0x11f   :  { %v923_v18 = vpop.f32.mrf.mxu0  ;;  %v986_v21 = vadd.f32 %v985_v17, %v984_v12 }
 0x120   :  { %757 = vst.msk [vmem:[%s1370_s3 + $0x30] sm:$0xf] %vm744_vm0, %v858_v14  ;;  %v677_v19 = vmax.f32 %v653_v15, 0.0  ;;  %v561_v20 = vadd.f32 %v922_v16, %v1285_v2  ;;  %v987_v22 = vpop.f32.mrf.mxu1 }
 0x121   :  { %v924_v23 = vpop.f32.mrf.mxu0 }
 0x122   :  { %v859_v24 = vpack.c.bf16 %v677_v19, %v677_v19  ;;  %v658_v25 = vadd.f32 %v986_v21, %v561_v20  ;;  %v925_v26 = vadd.f32 %v924_v23, %v923_v18  ;;  %v988_v27 = vpop.f32.mrf.mxu1 }
 0x123   :  { %v989_v30 = vadd.f32 %v988_v27, %v987_v22 }
 0x124   :  { %758 = vst.msk [vmem:[%s1370_s3 + $0x34] sm:$0xf] %vm744_vm0, %v859_v24  ;;  %v678_v28 = vmax.f32 %v658_v25, 0.0  ;;  %v564_v29 = vadd.f32 %v925_v26, %v1285_v2 }
 0x126   :  { %v860_v31 = vpack.c.bf16 %v678_v28, %v678_v28  ;;  %v661_v32 = vadd.f32 %v989_v30, %v564_v29 }
 0x128   :  { %759 = vst.msk [vmem:[%s1370_s3 + $0x38] sm:$0xf] %vm744_vm0, %v860_v31  ;;  %v679_v33 = vmax.f32 %v661_v32, 0.0 }
 0x12a   :  { %v861_v34 = vpack.c.bf16 %v679_v33, %v679_v33 }
 0x12c   :  { %760 = vst.msk [vmem:[%s1370_s3 + $0x3c] sm:$0xf] %vm744_vm0, %v861_v34 }

// kernel: model_openai_forward.5
= control target key start
LH: loop header
LB: loop body
LE: loop exit
PB: predicated region body
PF: predicated region fallthrough
CT: control target
= control target key end

     0   :  { %vm570_vm0 = vcmask 523264   ;;  %vm4247_vm1 = vcmask 48128   ;;  %s6734_s1 = inlined_call_operand.vmem [shape: bf16[576,64], index: 1, kind: input, shape index: {}]   ;;  %s6735_s0 = inlined_call_operand.vmem [shape: bf16[128,576], index: 0, kind: input, shape index: {}]   ;;  %s6736_s3 = inlined_call_operand.vmem [shape: bf16[1024,512], index: 3, kind: input, shape index: {}]   ;;  %s6737_s2 = inlined_call_operand.vmem [shape: f32[1,64], index: 2, kind: input, shape index: {}]   ;;  %s6738_s5 = inlined_call_operand.vmem [shape: bf16[512,6], index: 5, kind: input, shape index: {}]   ;;  %s6739_s4 = inlined_call_operand.vmem [shape: f32[1,512], index: 4, kind: input, shape index: {}]   ;;  %s6740_s6 = inlined_call_operand.vmem [shape: f32[1,6], index: 6, kind: input, shape index: {}]   ;;  %s6741_s7 = inlined_call_operand.vmem [shape: f32[8,6], index: 7, kind: output, shape index: {}]  }
   0x1   :  { %v4868_v0 = vld [vmem:[%s6734_s1 + $0x78] sm:$0xff]   ;;  %v4872_v4 = vld [vmem:[%s6734_s1 + $0x70] sm:$0xff]   ;;  %v4876_v8 = vld [vmem:[%s6734_s1 + $0x68] sm:$0xff]  }
   0x2   :  { %v4869_v1 = vld [vmem:[%s6734_s1 + $0x38] sm:$0xff]   ;;  %4659 = vmatprep.subr.bf16.mxu0 %v4868_v0  ;;  %v4873_v5 = vld [vmem:[%s6734_s1 + $0x30] sm:$0xff]   ;;  %v4877_v9 = vld [vmem:[%s6734_s1 + $0x28] sm:$0xff]  }
   0x3   :  { %v4870_v2 = vld [vmem:[%s6734_s1 + $0xf8] sm:$0xff]   ;;  %4660 = vmatpush3.bf16.msra.mxu0 %v4869_v1  ;;  %v4874_v6 = vld [vmem:[%s6734_s1 + $0xf0] sm:$0xff]   ;;  %v4878_v10 = vld [vmem:[%s6734_s1 + $0xe8] sm:$0xff]  }
   0x4   :  { %v4871_v3 = vld [vmem:[%s6734_s1 + $0xb8] sm:$0xff]   ;;  %4723 = vmatprep.subr.bf16.mxu1 %v4870_v2  ;;  %4661 = vmatprep.subr.bf16.mxu0 %v4872_v4  ;;  %v4875_v7 = vld [vmem:[%s6734_s1 + $0xb0] sm:$0xff]   ;;  %v4879_v11 = vld [vmem:[%s6734_s1 + $0xa8] sm:$0xff]  }
   0x5   :  { %4724 = vmatpush3.bf16.msra.mxu1 %v4871_v3  ;;  %v4880_v12 = vld [vmem:[%s6734_s1 + $0x60] sm:$0xff]   ;;  %v4884_v16 = vld [vmem:[%s6734_s1 + $0x58] sm:$0xff]   ;;  %v4888_v20 = vld [vmem:[%s6734_s1 + $0x50] sm:$0xff]  }
   0x6   :  { %4725 = vmatprep.subr.bf16.mxu1 %v4874_v6  ;;  %v4881_v13 = vld [vmem:[%s6734_s1 + $0x20] sm:$0xff]   ;;  %v4885_v17 = vld [vmem:[%s6734_s1 + $0x18] sm:$0xff]   ;;  %v4889_v21 = vld [vmem:[%s6734_s1 + $0x10] sm:$0xff]  }
   0x7   :  { %4662 = vmatpush3.bf16.msra.mxu0 %v4873_v5  ;;  %v4882_v14 = vld [vmem:[%s6734_s1 + $0xe0] sm:$0xff]   ;;  %v4886_v18 = vld [vmem:[%s6734_s1 + $0xd8] sm:$0xff]   ;;  %v4890_v22 = vld [vmem:[%s6734_s1 + $0xd0] sm:$0xff]  }
   0x8   :  { %4663 = vmatprep.subr.bf16.mxu0 %v4876_v8  ;;  %v4883_v15 = vld [vmem:[%s6734_s1 + $0xa0] sm:$0xff]   ;;  %v4887_v19 = vld [vmem:[%s6734_s1 + $0x98] sm:$0xff]   ;;  %v4891_v23 = vld [vmem:[%s6734_s1 + $0x90] sm:$0xff]  }
   0x9   :  { %4726 = vmatpush3.bf16.msra.mxu1 %v4875_v7  ;;  %v4892_v24 = vld [vmem:[%s6734_s1 + $0x48] sm:$0xff]   ;;  %v4896_v28 = vld [vmem:[%s6734_s1 + $0x40] sm:$0xff]   ;;  %v4903_v34 = vld [vmem:[%s6734_s1 + $0x118] sm:$0xff]  }
   0xa   :  { %4727 = vmatprep.subr.bf16.mxu1 %v4878_v10  ;;  %v4893_v25 = vld [vmem:[%s6734_s1 + $0x8] sm:$0xff]   ;;  %v4897_v29 = vld [vmem:[%s6734_s1] sm:$0xff]   ;;  %v4916_v41 = vld [vmem:[%s6734_s1 + $0x110] sm:$0xff]  }
   0xb   :  { %4664 = vmatpush3.bf16.msra.mxu0 %v4877_v9  ;;  %v4894_v26 = vld [vmem:[%s6734_s1 + $0xc8] sm:$0xff]   ;;  %v4898_v30 = vld [vmem:[%s6734_s1 + $0xc0] sm:$0xff]   ;;  %v4917_v43 = vld [vmem:[%s6735_s0 + $0x5c] ss:$20 sps:$4 sm:$0xff]  }
   0xc   :  { %4665 = vmatprep.subr.bf16.mxu0 %v4880_v12  ;;  %v4895_v27 = vld [vmem:[%s6734_s1 + $0x88] sm:$0xff]   ;;  %v4899_v31 = vld [vmem:[%s6735_s0] ss:$20 sps:$4 sm:$0xff]   ;;  %v4901_v32 = vld [vmem:[%s6735_s0 + $0x4] ss:$20 sps:$4 sm:$0xff]  }
   0xd   :  { %4728 = vmatpush3.bf16.msra.mxu1 %v4879_v11  ;;  %v4902_v33 = vld [vmem:[%s6734_s1 + $0x80] sm:$0xff]   ;;  %627 = vmatprep.mubr.bf16.mxu0 %v4901_v32  ;;  %v4904_v35 = vld [vmem:[%s6735_s0 + $0x8] ss:$20 sps:$4 sm:$0xff]   ;;  %v4919_v47 = vld [vmem:[%s6735_s0 + $0x58] ss:$20 sps:$4 sm:$0xff]  }
   0xe   :  { %4729 = vmatprep.subr.bf16.mxu1 %v4882_v14  ;;  %v4906_v36 = vld [vmem:[%s6735_s0 + $0xc] ss:$20 sps:$4 sm:$0xff]   ;;  %v4910_v38 = vld [vmem:[%s6735_s0 + $0x34] ss:$20 sps:$4 sm:$0xff]   ;;  %v4912_v42 = vld [vmem:[%s6735_s0 + $0x30] ss:$20 sps:$4 sm:$0xff]  }
   0xf   :  { %4666 = vmatpush3.bf16.msra.mxu0 %v4881_v13  ;;  %v4907_v37 = vld [vmem:[%s6735_s0 + $0x2c] ss:$20 sps:$4 sm:$0xff]   ;;  %724 = vmatprep.mubr.bf16.mxu1 %v4906_v36  ;;  %v4909_v39 = vld [vmem:[%s6735_s0 + $0x28] ss:$20 sps:$4 sm:$0xff]   ;;  %v4915_v45 = vld [vmem:[%s6735_s0 + $0x50] ss:$20 sps:$4 sm:$0xff]  }
  0x10   :  { %4667 = vmatprep.subr.bf16.mxu0 %v4884_v16  ;;  %v4913_v40 = vld [vmem:[%s6735_s0 + $0x54] ss:$20 sps:$4 sm:$0xff]   ;;  %v4920_v46 = vld [vmem:[%s6735_s0 + $0x7c] ss:$20 sps:$4 sm:$0xff]   ;;  %v4923_v48 = vld [vmem:[%s6735_s0 + $0x84] ss:$20 sps:$4 sm:$0xff]  }
  0x11   :  { %4730 = vmatpush3.bf16.msra.mxu1 %v4883_v15  ;;  %v4929_v44 = vld [vmem:[%s6734_s1 + $0x108] sm:$0xff]   ;;  %v4942_v49 = vld [vmem:[%s6734_s1 + $0x100] sm:$0xff]   ;;  %v4943_v61 = vld [vmem:[%s6735_s0 + $0xfc] ss:$20 sps:$4 sm:$0xff]  }
  0x12   :  { %4731 = vmatprep.subr.bf16.mxu1 %v4886_v18  ;;  %v4922_v50 = vld [vmem:[%s6735_s0 + $0x78] ss:$20 sps:$4 sm:$0xff]   ;;  %v4925_v52 = vld [vmem:[%s6735_s0 + $0x80] ss:$20 sps:$4 sm:$0xff]   ;;  %v4932_v56 = vld [vmem:[%s6735_s0 + $0xa8] ss:$20 sps:$4 sm:$0xff]  }
  0x13   :  { %4668 = vmatpush3.bf16.msra.mxu0 %v4885_v17  ;;  %v4926_v51 = vld [vmem:[%s6735_s0 + $0xa4] ss:$20 sps:$4 sm:$0xff]   ;;  %v4930_v53 = vld [vmem:[%s6735_s0 + $0xac] ss:$20 sps:$4 sm:$0xff]   ;;  %v4936_v57 = vld [vmem:[%s6735_s0 + $0xd4] ss:$20 sps:$4 sm:$0xff]  }
  0x14   :  { %4669 = vmatprep.subr.bf16.mxu0 %v4888_v20  ;;  %v4928_v54 = vld [vmem:[%s6735_s0 + $0xa0] ss:$20 sps:$4 sm:$0xff]   ;;  %v4935_v58 = vld [vmem:[%s6735_s0 + $0xc8] ss:$20 sps:$4 sm:$0xff]   ;;  %v4938_v60 = vld [vmem:[%s6735_s0 + $0xd0] ss:$20 sps:$4 sm:$0xff]  }
  0x15   :  { %4732 = vmatpush3.bf16.msra.mxu1 %v4887_v19  ;;  %v4933_v55 = vld [vmem:[%s6735_s0 + $0xcc] ss:$20 sps:$4 sm:$0xff]   ;;  %v4939_v59 = vld [vmem:[%s6735_s0 + $0xf4] ss:$20 sps:$4 sm:$0xff]   ;;  %v4941_v62 = vld [vmem:[%s6735_s0 + $0xf0] ss:$20 sps:$4 sm:$0xff]  }
  0x16   :  { %4733 = vmatprep.subr.bf16.mxu1 %v4890_v22  ;;  %v4946_v63 = vld [vmem:[%s6735_s0 + $0x11c] ss:$20 sps:$4 sm:$0xff]   ;;  %v4945_v0 = vld [vmem:[%s6735_s0 + $0xf8] ss:$20 sps:$4 sm:$0xff]   ;;  %v4951_v4 = vld [vmem:[%s6735_s0 + $0x120] ss:$20 sps:$4 sm:$0xff]  }
  0x17   :  { %4670 = vmatpush3.bf16.msra.mxu0 %v4889_v21  ;;  %v4949_v1 = vld [vmem:[%s6735_s0 + $0x124] ss:$20 sps:$4 sm:$0xff]   ;;  %v4954_v6 = vld [vmem:[%s6735_s0 + $0x60] ss:$20 sps:$4 sm:$0xff]   ;;  %v4955_v7 = vld [vmem:[%s6735_s0 + $0x88] ss:$20 sps:$4 sm:$0xff]  }
  0x18   :  { %4671 = vmatprep.subr.bf16.mxu0 %v4892_v24  ;;  %v4948_v2 = vld [vmem:[%s6735_s0 + $0x118] ss:$20 sps:$4 sm:$0xff]   ;;  %v4952_v3 = vld [vmem:[%s6735_s0 + $0x10] ss:$20 sps:$4 sm:$0xff]   ;;  %v4958_v10 = vld [vmem:[%s6735_s0 + $0x100] ss:$20 sps:$4 sm:$0xff]  }
  0x19   :  { %4734 = vmatpush3.bf16.msra.mxu1 %v4891_v23  ;;  %v4953_v5 = vld [vmem:[%s6735_s0 + $0x38] ss:$20 sps:$4 sm:$0xff]   ;;  %v4956_v8 = vld [vmem:[%s6735_s0 + $0xb0] ss:$20 sps:$4 sm:$0xff]   ;;  %v4959_v13 = vld [vmem:[%s6735_s0 + $0x128] ss:$20 sps:$4 sm:$0xff]  }
  0x1a   :  { %4735 = vmatprep.subr.bf16.mxu1 %v4894_v26  ;;  %v4957_v9 = vld [vmem:[%s6735_s0 + $0xd8] ss:$20 sps:$4 sm:$0xff]   ;;  %v4960_v11 = vld [vmem:[%s6736_s3 + $0xe0] ss:$16 sps:$4 sm:$0xff]   ;;  %v4962_v12 = vld [vmem:[%s6736_s3 + $0xe4] ss:$16 sps:$4 sm:$0xff]  }
  0x1b   :  { %4672 = vmatpush3.bf16.msra.mxu0 %v4893_v25  ;;  %v4963_v14 = vld [vmem:[%s6736_s3 + $0xc0] ss:$16 sps:$4 sm:$0xff]   ;;  %v4965_v15 = vld [vmem:[%s6736_s3 + $0xc4] ss:$16 sps:$4 sm:$0xff]  }
  0x1c   :  { %4673 = vmatprep.subr.bf16.mxu0 %v4896_v28  ;;  %v4966_v16 = vld [vmem:[%s6736_s3 + $0xa0] ss:$16 sps:$4 sm:$0xff]   ;;  %v4968_v17 = vld [vmem:[%s6736_s3 + $0xa4] ss:$16 sps:$4 sm:$0xff]  }
  0x1d   :  { %4736 = vmatpush3.bf16.msra.mxu1 %v4895_v27  ;;  %v4971_v18 = vld [vmem:[%s6736_s3 + $0x64] ss:$16 sps:$4 sm:$0xff]   ;;  %v4969_v19 = vld [vmem:[%s6736_s3 + $0x60] ss:$16 sps:$4 sm:$0xff]  }
  0x1e   :  { %4737 = vmatprep.subr.bf16.mxu1 %v4898_v30  ;;  %v4974_v20 = vld [vmem:[%s6736_s3 + $0x44] ss:$16 sps:$4 sm:$0xff]   ;;  %v4972_v21 = vld [vmem:[%s6736_s3 + $0x40] ss:$16 sps:$4 sm:$0xff]   ;;  %v4989_v30 = vld [vmem:[%s6736_s3 + $0xec] ss:$16 sps:$4 sm:$0xff]  }
  0x1f   :  { %4674 = vmatpush3.bf16.msra.mxu0 %v4897_v29  ;;  %v4975_v22 = vld [vmem:[%s6736_s3 + $0x80] ss:$16 sps:$4 sm:$0xff]   ;;  %v4977_v23 = vld [vmem:[%s6736_s3 + $0x84] ss:$16 sps:$4 sm:$0xff]   ;;  %v5376_v29 = vmov 0  }
  0x20   :  { %4843 = vmatprep.subr.bf16.mxu0 %v4903_v34  ;;  %v4980_v24 = vld [vmem:[%s6736_s3 + $0x24] ss:$16 sps:$4 sm:$0xff]   ;;  %v4978_v25 = vld [vmem:[%s6736_s3 + $0x20] ss:$16 sps:$4 sm:$0xff]  }
  0x21   :  { %4738 = vmatpush3.bf16.msra.mxu1 %v4902_v33  ;;  %v4983_v26 = vld [vmem:[%s6736_s3 + $0x4] ss:$16 sps:$4 sm:$0xff]   ;;  %v4981_v27 = vld [vmem:[%s6736_s3] ss:$16 sps:$4 sm:$0xff]  }
  0x22   :  { %628 = vmatmul.mubr.bf16.vlgmr.msra.gmra.mxu0 %v4899_v31  ;;  %1027 = vmatprep.subr.bf16.mxu1 %v4962_v12  ;;  %v4986_v28 = vld [vmem:[%s6736_s3 + $0x164] ss:$16 sps:$4 sm:$0xff]  }
  0x23   :  { %4844 = vmatpush3.bf16.msra.mxu0 %v4903_v34  ;;  %635 = vmatprep.mubr.bf16.mxu0 %v4907_v37 }
  0x24   :  { %725 = vmatmul.mubr.bf16.vlgmr.msra.gmra.mxu1 %v4904_v35  ;;  %4845 = vmatprep.subr.bf16.mxu0 %v4916_v41 }
  0x25   :  { %732 = vmatprep.mubr.bf16.mxu1 %v4910_v38  ;;  %1028 = vmatpush1.bf16.msra.mxu1 %v4960_v11 }
  0x26   :  { %1029 = vmatprep.subr.bf16.mxu1 %v4965_v15 }
  0x27   :  { %4846 = vmatpush3.bf16.msra.mxu0 %v4916_v41 }
  0x28   :  { %4847 = vmatprep.subr.bf16.mxu0 %v4929_v44 }
  0x29   :  { %1030 = vmatpush1.bf16.msra.mxu1 %v4963_v14 }
  0x2a   :  { %636 = vmatmul.mubr.bf16.gmra.mxu0 %v4909_v39  ;;  %1031 = vmatprep.subr.bf16.mxu1 %v4968_v17 }
  0x2b   :  { %643 = vmatprep.mubr.bf16.mxu0 %v4913_v40  ;;  %4848 = vmatpush3.bf16.msra.mxu0 %v4929_v44 }
  0x2c   :  { %733 = vmatmul.mubr.bf16.gmra.mxu1 %v4912_v42  ;;  %4849 = vmatprep.subr.bf16.mxu0 %v4942_v49 }
  0x2d   :  { %740 = vmatprep.mubr.bf16.mxu1 %v4917_v43  ;;  %1032 = vmatpush1.bf16.msra.mxu1 %v4966_v16 }
  0x2e   :  { %1033 = vmatprep.subr.bf16.mxu1 %v4977_v23 }
  0x2f   :  { %4850 = vmatpush3.bf16.msra.mxu0 %v4942_v49 }
  0x30   :  { %1192 = vmatprep.subr.bf16.mxu0 %v4971_v18 }
  0x31   :  { %1034 = vmatpush1.bf16.msra.mxu1 %v4975_v22 }
  0x32   :  { %644 = vmatmul.mubr.bf16.gmra.mxu0 %v4915_v45  ;;  %1068 = vmatprep.subr.bf16.mxu1 %v4989_v30 }
  0x33   :  { %651 = vmatprep.mubr.bf16.mxu0 %v4920_v46 }
  0x34   :  { %741 = vmatmul.mubr.bf16.gmra.mxu1 %v4919_v47  ;;  %v5718_v47 = vld [vmem:[%s6737_s2] ss:$0 sm:$0xff] }
  0x35   :  { %748 = vmatprep.mubr.bf16.mxu1 %v4923_v48 }
  0x3a   :  { %652 = vmatmul.mubr.bf16.gmra.mxu0 %v4922_v50 }
  0x3b   :  { %659 = vmatprep.mubr.bf16.mxu0 %v4926_v51 }
  0x3c   :  { %749 = vmatmul.mubr.bf16.gmra.mxu1 %v4925_v52 }
  0x3d   :  { %756 = vmatprep.mubr.bf16.mxu1 %v4930_v53 }
  0x42   :  { %660 = vmatmul.mubr.bf16.gmra.mxu0 %v4928_v54 }
  0x43   :  { %667 = vmatprep.mubr.bf16.mxu0 %v4933_v55 }
  0x44   :  { %757 = vmatmul.mubr.bf16.gmra.mxu1 %v4932_v56 }
  0x45   :  { %764 = vmatprep.mubr.bf16.mxu1 %v4936_v57 }
  0x4a   :  { %668 = vmatmul.mubr.bf16.gmra.mxu0 %v4935_v58 }
  0x4b   :  { %675 = vmatprep.mubr.bf16.mxu0 %v4939_v59 }
  0x4c   :  { %765 = vmatmul.mubr.bf16.gmra.mxu1 %v4938_v60 }
  0x4d   :  { %772 = vmatprep.mubr.bf16.mxu1 %v4943_v61 }
  0x52   :  { %676 = vmatmul.mubr.bf16.gmra.mxu0 %v4941_v62 }
  0x53   :  { %683 = vmatprep.mubr.bf16.mxu0 %v4946_v63 }
  0x54   :  { %773 = vmatmul.mubr.bf16.gmra.mxu1 %v4945_v0 }
  0x55   :  { %780 = vmatprep.mubr.bf16.mxu1 %v4949_v1 }
  0x5a   :  { %684 = vmatmul.mubr.bf16.gmra.mxu0 %v4948_v2 }
  0x5b   :  { %4851 = vmatprep.mubr.msk.bf16.mxu0 %vm570_vm0, %v4952_v3 }
  0x5c   :  { %781 = vmatmul.mubr.bf16.gmra.mxu1 %v4951_v4 }
  0x5d   :  { %1051 = vmatprep.mubr.bf16.mxu1 %v5376_v29 }
  0x62   :  { %4852 = vmatmul.mubr.msk.bf16.vlgmr.msra.gmra.mxu0 %vm570_vm0, %v4953_v5 }
  0x63   :  { %4855 = vmatprep.mubr.msk.bf16.mxu0 %vm570_vm0, %v4954_v6  ;;  %1193 = vmatpush1.bf16.msra.mxu0 %v4969_v19 }
  0x64   :  { %1194 = vmatprep.subr.bf16.mxu0 %v4974_v20 }
  0x67   :  { %1195 = vmatpush1.bf16.msra.mxu0 %v4972_v21 }
  0x68   :  { %1196 = vmatprep.subr.bf16.mxu0 %v4980_v24 }
  0x6a   :  { %4856 = vmatmul.mubr.msk.bf16.gmra.mxu0 %vm570_vm0, %v4955_v7 }
  0x6b   :  { %4859 = vmatprep.mubr.msk.bf16.mxu0 %vm570_vm0, %v4956_v8  ;;  %1197 = vmatpush1.bf16.msra.mxu0 %v4978_v25 }
  0x6c   :  { %1198 = vmatprep.subr.bf16.mxu0 %v4983_v26 }
  0x6f   :  { %1199 = vmatpush1.bf16.msra.mxu0 %v4981_v27 }
  0x70   :  { %1374 = vmatprep.subr.bf16.mxu0 %v4986_v28 }
  0x72   :  { %4860 = vmatmul.mubr.msk.bf16.gmra.mxu0 %vm570_vm0, %v4957_v9 }
  0x73   :  { %4863 = vmatprep.mubr.msk.bf16.mxu0 %vm570_vm0, %v4958_v10 }
  0x7a   :  { %4864 = vmatmul.mubr.msk.bf16.gmra.mxu0 %vm570_vm0, %v4959_v13 }
  0x7b   :  { %1216 = vmatprep.mubr.bf16.mxu0 %v5376_v29 }
  0xe2   :  { %v4675_v31 = vpop.f32.mrf.mxu0 }
  0xe4   :  { %v4676_v32 = vpop.f32.mrf.mxu0  ;;  %v4739_v10 = vpop.f32.mrf.mxu1 }
  0xe5   :  { %v4677_v19 = vadd.f32 %v4676_v32, %v4675_v31 }
  0xe6   :  { %v4678_v33 = vpop.f32.mrf.mxu0  ;;  %v4740_v15 = vpop.f32.mrf.mxu1 }
  0xe7   :  { %v630_v25 = vadd.f32 %v4677_v19, %v5718_v47  ;;  %v4741_v26 = vadd.f32 %v4740_v15, %v4739_v10  ;;  %v5007_v15 = vld [vmem:[%s6736_s3 + $0x8c] ss:$16 sps:$4 sm:$0xff]   ;;  %v5008_v19 = vld [vmem:[%s6736_s3 + $0x1e0] ss:$16 sps:$4 sm:$0xff]  }
  0xe8   :  { %v4679_v34 = vpop.f32.mrf.mxu0  ;;  %v4742_v21 = vpop.f32.mrf.mxu1 }
  0xe9   :  { %v4680_v27 = vadd.f32 %v4679_v34, %v4678_v33 }
  0xea   :  { %v4681_v35 = vpop.f32.mrf.mxu0  ;;  %v4743_v30 = vpop.f32.mrf.mxu1 }
  0xeb   :  { %v633_v31 = vadd.f32 %v4680_v27, %v5718_v47  ;;  %v4744_v32 = vadd.f32 %v4743_v30, %v4742_v21  ;;  %v5014_v27 = vld [vmem:[%s6736_s3 + $0x1c0] ss:$16 sps:$4 sm:$0xff]   ;;  %v5022_v30 = vld [vmem:[%s6736_s3 + $0x1a4] ss:$16 sps:$4 sm:$0xff]  }
  0xec   :  { %v4682_v36 = vpop.f32.mrf.mxu0 }
  0xed   :  { %v5709_v37 = vadd.f32 %v4682_v36, %v4681_v35  ;;  %v730_v34 = vadd.f32 %v4744_v32, %v633_v31  ;;  %v5025_v32 = vld [vmem:[%s6736_s3 + $0x2c] ss:$16 sps:$4 sm:$0xff]  }
  0xee   :  { %v4684_v38 = vpop.f32.mrf.mxu0 }
  0xf0   :  { %v4685_v39 = vpop.f32.mrf.mxu0 }
  0xf1   :  { %v5711_v40 = vadd.f32 %v4685_v39, %v4684_v38 }
  0xf2   :  { %v4687_v41 = vpop.f32.mrf.mxu0 }
  0xf4   :  { %v4688_v42 = vpop.f32.mrf.mxu0 }
  0xf5   :  { %v5713_v43 = vadd.f32 %v4688_v42, %v4687_v41  ;;  %v727_v41 = vadd.f32 %v4741_v26, %v630_v25  ;;  %v4745_v42 = vpop.f32.mrf.mxu1  ;;  %v5011_v26 = vld [vmem:[%s6736_s3 + $0x68] ss:$16 sps:$4 sm:$0xff]  }
  0xf6   :  { %v4690_v44 = vpop.f32.mrf.mxu0 }
  0xf8   :  { %v4691_v45 = vpop.f32.mrf.mxu0 }
  0xf9   :  { %v4692_v46 = vadd.f32 %v4691_v45, %v4690_v44 }
  0xfa   :  { %v4693_v48 = vpop.f32.mrf.mxu0 }
  0xfb   :  { %v5721_v49 = vadd.f32 %v4692_v46, %v5718_v47 }
  0xfc   :  { %v4694_v50 = vpop.f32.mrf.mxu0 }
  0xfd   :  { %v4695_v51 = vadd.f32 %v4694_v50, %v4693_v48  ;;  %v4746_v48 = vpop.f32.mrf.mxu1 }
  0xfe   :  { %v4696_v52 = vpop.f32.mrf.mxu0 }
  0xff   :  { %v5724_v53 = vadd.f32 %v4695_v51, %v5718_v47  ;;  %v4984_v51 = vld [vmem:[%s6736_s3 + $0x160] ss:$16 sps:$4 sm:$0xff]   ;;  %v4748_v10 = vpop.f32.mrf.mxu1 }
 0x100   :  { %v4697_v54 = vpop.f32.mrf.mxu0 }
 0x101   :  { %v4698_v55 = vadd.f32 %v4697_v54, %v4696_v52 }
 0x102   :  { %v4699_v56 = vpop.f32.mrf.mxu0 }
 0x103   :  { %v5727_v57 = vadd.f32 %v4698_v55, %v5718_v47  ;;  %v4992_v55 = vld [vmem:[%s6736_s3 + $0x144] ss:$16 sps:$4 sm:$0xff]  }
 0x104   :  { %v4700_v58 = vpop.f32.mrf.mxu0 }
 0x105   :  { %v4701_v59 = vadd.f32 %v4700_v58, %v4699_v56  ;;  %v638_v56 = vadd.f32 %v5709_v37, %v5718_v47  ;;  %v4747_v58 = vadd.f32 %v4746_v48, %v4745_v42  ;;  %v4995_v37 = vld [vmem:[%s6736_s3 + $0xcc] ss:$16 sps:$4 sm:$0xff]  }
 0x106   :  { %v4702_v60 = vpop.f32.mrf.mxu0 }
 0x107   :  { %v5730_v61 = vadd.f32 %v4701_v59, %v5718_v47 }
 0x108   :  { %v4703_v62 = vpop.f32.mrf.mxu0 }
 0x109   :  { %v4704_v63 = vadd.f32 %v4703_v62, %v4702_v60  ;;  %v4987_v60 = vld [vmem:[%s6736_s3 + $0xe8] ss:$16 sps:$4 sm:$0xff]   ;;  %v4990_v62 = vld [vmem:[%s6736_s3 + $0x140] ss:$16 sps:$4 sm:$0xff]  }
 0x10a   :  { %v4705_v0 = vpop.f32.mrf.mxu0 }
 0x10b   :  { %v5733_v1 = vadd.f32 %v4704_v63, %v5718_v47 }
 0x10c   :  { %v4706_v2 = vpop.f32.mrf.mxu0 }
 0x10d   :  { %v4707_v3 = vadd.f32 %v4706_v2, %v4705_v0  ;;  %v4998_v0 = vld [vmem:[%s6736_s3 + $0x124] ss:$16 sps:$4 sm:$0xff]   ;;  %v735_v2 = vadd.f32 %v4747_v58, %v638_v56 }
 0x10e   :  { %v4708_v4 = vpop.f32.mrf.mxu0  ;;  %v5040_v56 = vld [vmem:[%s6736_s3 + $0x244] ss:$16 sps:$4 sm:$0xff]  }
 0x10f   :  { %v5736_v5 = vadd.f32 %v4707_v3, %v5718_v47  ;;  %v4993_v3 = vld [vmem:[%s6736_s3 + $0xc8] ss:$16 sps:$4 sm:$0xff]  }
 0x110   :  { %v4709_v6 = vpop.f32.mrf.mxu0 }
 0x111   :  { %v4710_v7 = vadd.f32 %v4709_v6, %v4708_v4  ;;  %v4996_v4 = vld [vmem:[%s6736_s3 + $0x120] ss:$16 sps:$4 sm:$0xff]  }
 0x112   :  { %v4711_v8 = vpop.f32.mrf.mxu0 }
 0x113   :  { %v5739_v9 = vadd.f32 %v4710_v7, %v5718_v47  ;;  %v5001_v7 = vld [vmem:[%s6736_s3 + $0xac] ss:$16 sps:$4 sm:$0xff]  }
 0x114   :  { %v4712_v11 = vpop.f32.mrf.mxu0 }
 0x115   :  { %v4713_v12 = vadd.f32 %v4712_v11, %v4711_v8  ;;  %v5004_v8 = vld [vmem:[%s6736_s3 + $0x104] ss:$16 sps:$4 sm:$0xff]   ;;  %v4999_v11 = vld [vmem:[%s6736_s3 + $0xa8] ss:$16 sps:$4 sm:$0xff]  }
 0x116   :  { %v4714_v13 = vpop.f32.mrf.mxu0 }
 0x117   :  { %v5742_v14 = vadd.f32 %v4713_v12, %v5718_v47  ;;  %v5002_v12 = vld [vmem:[%s6736_s3 + $0x100] ss:$16 sps:$4 sm:$0xff]  }
 0x118   :  { %v4715_v16 = vpop.f32.mrf.mxu0 }
 0x119   :  { %v4716_v17 = vadd.f32 %v4715_v16, %v4714_v13  ;;  %v5010_v16 = vld [vmem:[%s6736_s3 + $0x1e4] ss:$16 sps:$4 sm:$0xff]  }
 0x11a   :  { %v4717_v18 = vpop.f32.mrf.mxu0 }
 0x11b   :  { %v5745_v20 = vadd.f32 %v4716_v17, %v5718_v47  ;;  %v4749_v17 = vpop.f32.mrf.mxu1 }
 0x11c   :  { %v4718_v22 = vpop.f32.mrf.mxu0  ;;  %v4750_v25 = vadd.f32 %v4749_v17, %v4748_v10  ;;  %v5050_v10 = vld [vmem:[%s6736_s3 + $0x200] ss:$16 sps:$4 sm:$0xff]  }
 0x11d   :  { %v4719_v23 = vadd.f32 %v4718_v22, %v4717_v18  ;;  %v5005_v18 = vld [vmem:[%s6736_s3 + $0x88] ss:$16 sps:$4 sm:$0xff]   ;;  %v5013_v22 = vld [vmem:[%s6736_s3 + $0x6c] ss:$16 sps:$4 sm:$0xff]   ;;  %v4751_v42 = vpop.f32.mrf.mxu1  ;;  %v5056_v17 = vld [vmem:[%s6736_s3 + $0x2e0] ss:$16 sps:$4 sm:$0xff]  }
 0x11e   :  { %v4720_v24 = vpop.f32.mrf.mxu0 }
 0x11f   :  { %v5749_v28 = vadd.f32 %v4719_v23, %v5718_v47  ;;  %v5016_v23 = vld [vmem:[%s6736_s3 + $0x1c4] ss:$16 sps:$4 sm:$0xff]   ;;  %v4752_v48 = vpop.f32.mrf.mxu1 }
 0x120   :  { %v4721_v35 = vpop.f32.mrf.mxu0 }
 0x121   :  { %v4722_v36 = vadd.f32 %v4721_v35, %v4720_v24  ;;  %v641_v24 = vadd.f32 %v5711_v40, %v5718_v47  ;;  %v5019_v40 = vld [vmem:[%s6736_s3 + $0x4c] ss:$16 sps:$4 sm:$0xff]  }
 0x122   :  { %v4853_v38 = vpop.f32.mrf.mxu0 }
 0x123   :  { %v5753_v39 = vadd.f32 %v4722_v36, %v5718_v47  ;;  %v832_v6 = vadd.f32 %v4853_v38, %v735_v2  ;;  %v738_v35 = vadd.f32 %v4750_v25, %v641_v24  ;;  %v5017_v36 = vld [vmem:[%s6736_s3 + $0x48] ss:$16 sps:$4 sm:$0xff]   ;;  %v5020_v38 = vld [vmem:[%s6736_s3 + $0x1a0] ss:$16 sps:$4 sm:$0xff]  }
 0x124   :  { %v823_v44 = vpop.f32.mrf.mxu0  ;;  %v5041_v2 = vld [vmem:[%s6736_s3 + $0x148] ss:$16 sps:$4 sm:$0xff]  }
 0x125   :  { %v824_v45 = vadd.f32 %v823_v44, %v727_v41  ;;  %v888_v13 = vmax.f32 %v832_v6, 0.0  ;;  %v5028_v41 = vld [vmem:[%s6736_s3 + $0x184] ss:$16 sps:$4 sm:$0xff]   ;;  %v5023_v44 = vld [vmem:[%s6736_s3 + $0x28] ss:$16 sps:$4 sm:$0xff]  }
 0x126   :  { %v5755_v46 = vpop.f32.mrf.mxu0  ;;  %v5049_v6 = vld [vmem:[%s6736_s3 + $0x12c] ss:$16 sps:$4 sm:$0xff]   ;;  %v5059_v25 = vld [vmem:[%s6736_s3 + $0x1e8] ss:$16 sps:$4 sm:$0xff]  }
 0x127   :  { %v886_v33 = vmax.f32 %v824_v45, 0.0  ;;  %v5814_v21 = vpack.c.bf16 %v888_v13, %v888_v13  ;;  %v835_v31 = vadd.f32 %v5755_v46, %v738_v35  ;;  %v5026_v45 = vld [vmem:[%s6736_s3 + $0x180] ss:$16 sps:$4 sm:$0xff]   ;;  %v5058_v13 = vld [vmem:[%s6736_s3 + $0x2e4] ss:$16 sps:$4 sm:$0xff]  }
 0x128   :  { %v826_v50 = vpop.f32.mrf.mxu0 }
 0x129   :  { %v5760_v52 = vpack.c.bf16 %v886_v33, %v886_v33  ;;  %v827_v54 = vadd.f32 %v826_v50, %v730_v34  ;;  %v889_v46 = vmax.f32 %v835_v31, 0.0  ;;  %v5031_v33 = vld [vmem:[%s6736_s3 + $0xc] ss:$16 sps:$4 sm:$0xff]   ;;  %v5034_v34 = vld [vmem:[%s6736_s3 + $0x264] ss:$16 sps:$4 sm:$0xff]  }
 0x12a   :  { %v5029_v50 = vld [vmem:[%s6736_s3 + $0x8] ss:$16 sps:$4 sm:$0xff]   ;;  %v5880_v58 = vpop.f32.mrf.mxu0 }
 0x12b   :  { %v887_v59 = vmax.f32 %v827_v54, 0.0  ;;  %4372 = vmatmul.mubr.msk.bf16.vlgmr.msra.gmra.mxu0 %vm570_vm0, %v5760_v52  ;;  %v5872_v54 = vpack.c.bf16 %v889_v46, %v889_v46  ;;  %v5082_v46 = vld [vmem:[%s6736_s3 + $0x364] ss:$16 sps:$4 sm:$0xff]  }
 0x12c   :  { %1375 = vmatpush1.bf16.msra.mxu0 %v4984_v51  ;;  %1398 = vmatprep.mubr.bf16.mxu0 %v5376_v29  ;;  %v5032_v51 = vld [vmem:[%s6736_s3 + $0x260] ss:$16 sps:$4 sm:$0xff]  }
 0x12d   :  { %v919_v63 = vpack.c.bf16 %v887_v59, %v887_v59  ;;  %1376 = vmatprep.subr.bf16.mxu0 %v4992_v55  ;;  %v5037_v55 = vld [vmem:[%s6736_s3 + $0x16c] ss:$16 sps:$4 sm:$0xff]   ;;  %v646_v59 = vadd.f32 %v5713_v43, %v5718_v47  ;;  %v5046_v47 = vld [vmem:[%s6736_s3 + $0x224] ss:$16 sps:$4 sm:$0xff]  }
 0x12e   :  { %v5043_v43 = vld [vmem:[%s6736_s3 + $0x14c] ss:$16 sps:$4 sm:$0xff]  }
 0x12f   :  { %4354 = vmatmul.mubr.msk.bf16.vlgmr.msra.gmra.mxu1 %vm570_vm0, %v919_v63 }
 0x130   :  { %1069 = vmatpush1.bf16.msra.mxu1 %v4987_v60  ;;  %1377 = vmatpush1.bf16.msra.mxu0 %v4990_v62  ;;  %v4753_v60 = vadd.f32 %v4752_v48, %v4751_v42  ;;  %v5035_v62 = vld [vmem:[%s6736_s3 + $0x168] ss:$16 sps:$4 sm:$0xff]   ;;  %v5074_v42 = vld [vmem:[%s6736_s3 + $0x280] ss:$16 sps:$4 sm:$0xff]  }
 0x131   :  { %1070 = vmatprep.subr.bf16.mxu1 %v4995_v37  ;;  %1378 = vmatprep.subr.bf16.mxu0 %v4998_v0  ;;  %v839_v37 = vpop.f32.mrf.mxu0  ;;  %v5080_v48 = vld [vmem:[%s6736_s3 + $0x360] ss:$16 sps:$4 sm:$0xff]  }
 0x132   :  { %1092 = vmatprep.mubr.bf16.mxu1 %v5376_v29  ;;  %v743_v0 = vadd.f32 %v4753_v60, %v646_v59  ;;  %v5083_v59 = vld [vmem:[%s6736_s3 + $0x268] ss:$16 sps:$4 sm:$0xff]   ;;  %v5086_v60 = vld [vmem:[%s6736_s3 + $0x340] ss:$16 sps:$4 sm:$0xff]  }
 0x134   :  { %1071 = vmatpush1.bf16.msra.mxu1 %v4993_v3  ;;  %1379 = vmatpush1.bf16.msra.mxu0 %v4996_v4  ;;  %v5044_v3 = vld [vmem:[%s6736_s3 + $0x220] ss:$16 sps:$4 sm:$0xff]   ;;  %v840_v4 = vadd.f32 %v839_v37, %v743_v0 }
 0x135   :  { %1072 = vmatprep.subr.bf16.mxu1 %v5001_v7  ;;  %1380 = vmatprep.subr.bf16.mxu0 %v5004_v8  ;;  %v4754_v7 = vpop.f32.mrf.mxu1  ;;  %v5047_v8 = vld [vmem:[%s6736_s3 + $0x128] ss:$16 sps:$4 sm:$0xff]   ;;  %v5092_v37 = vld [vmem:[%s6736_s3 + $0x320] ss:$16 sps:$4 sm:$0xff]  }
 0x138   :  { %1073 = vmatpush1.bf16.msra.mxu1 %v4999_v11  ;;  %1381 = vmatpush1.bf16.msra.mxu0 %v5002_v12  ;;  %v890_v11 = vmax.f32 %v840_v4, 0.0  ;;  %v5055_v12 = vld [vmem:[%s6736_s3 + $0x10c] ss:$16 sps:$4 sm:$0xff]  }
 0x139   :  { %1074 = vmatprep.subr.bf16.mxu1 %v5007_v15  ;;  %1560 = vmatprep.subr.bf16.mxu0 %v5010_v16  ;;  %v4755_v15 = vpop.f32.mrf.mxu1  ;;  %v5053_v16 = vld [vmem:[%s6736_s3 + $0x108] ss:$16 sps:$4 sm:$0xff]  }
 0x13a   :  { %v4756_v24 = vadd.f32 %v4755_v15, %v4754_v7 }
 0x13b   :  { %4390 = vmatmul.mubr.msk.bf16.vlgmr.msra.gmra.mxu0 %vm570_vm0, %v5814_v21 }
 0x13c   :  { %1075 = vmatpush1.bf16.msra.mxu1 %v5005_v18  ;;  %1561 = vmatpush1.bf16.msra.mxu0 %v5008_v19  ;;  %v5932_v18 = vpack.c.bf16 %v890_v11, %v890_v11  ;;  %v5061_v19 = vld [vmem:[%s6736_s3 + $0x1ec] ss:$16 sps:$4 sm:$0xff]   ;;  %v746_v35 = vadd.f32 %v4756_v24, %v5721_v49 }
 0x13d   :  { %1233 = vmatprep.subr.bf16.mxu1 %v5013_v22  ;;  %1562 = vmatprep.subr.bf16.mxu0 %v5016_v23  ;;  %v5064_v22 = vld [vmem:[%s6736_s3 + $0x2c4] ss:$16 sps:$4 sm:$0xff]   ;;  %v5940_v23 = vpop.f32.mrf.mxu0  ;;  %v5073_v49 = vld [vmem:[%s6736_s3 + $0x1ac] ss:$16 sps:$4 sm:$0xff]  }
 0x13e   :  { %1584 = vmatprep.mubr.bf16.mxu0 %v5376_v29 }
 0x13f   :  { %4355 = vmatmul.mubr.msk.bf16.vlgmr.msra.gmra.mxu1 %vm570_vm0, %v919_v63  ;;  %v5038_v63 = vld [vmem:[%s6736_s3 + $0x240] ss:$16 sps:$4 sm:$0xff]  }
 0x140   :  { %1234 = vmatpush1.bf16.msra.mxu1 %v5011_v26  ;;  %1563 = vmatpush1.bf16.msra.mxu0 %v5014_v27  ;;  %v5062_v26 = vld [vmem:[%s6736_s3 + $0x2c0] ss:$16 sps:$4 sm:$0xff]   ;;  %v5067_v27 = vld [vmem:[%s6736_s3 + $0x1cc] ss:$16 sps:$4 sm:$0xff]  }
 0x141   :  { %1235 = vmatprep.subr.bf16.mxu1 %v5019_v40  ;;  %1564 = vmatprep.subr.bf16.mxu0 %v5022_v30  ;;  %v5070_v40 = vld [vmem:[%s6736_s3 + $0x2a4] ss:$16 sps:$4 sm:$0xff]   ;;  %v842_v30 = vpop.f32.mrf.mxu0 }
 0x142   :  { %1257 = vmatprep.mubr.bf16.mxu1 %v5376_v29  ;;  %v843_v31 = vadd.f32 %v842_v30, %v746_v35  ;;  %v5119_v30 = vld [vmem:[%s6736_s3 + $0x2a8] ss:$16 sps:$4 sm:$0xff]  }
 0x144   :  { %1236 = vmatpush1.bf16.msra.mxu1 %v5017_v36  ;;  %1565 = vmatpush1.bf16.msra.mxu0 %v5020_v38  ;;  %v5065_v36 = vld [vmem:[%s6736_s3 + $0x1c8] ss:$16 sps:$4 sm:$0xff]   ;;  %v5068_v38 = vld [vmem:[%s6736_s3 + $0x2a0] ss:$16 sps:$4 sm:$0xff]  }
 0x145   :  { %1237 = vmatprep.subr.bf16.mxu1 %v5025_v32  ;;  %1566 = vmatprep.subr.bf16.mxu0 %v5028_v41  ;;  %v4757_v32 = vpop.f32.mrf.mxu1  ;;  %v5071_v41 = vld [vmem:[%s6736_s3 + $0x1a8] ss:$16 sps:$4 sm:$0xff]  }
 0x148   :  { %1238 = vmatpush1.bf16.msra.mxu1 %v5023_v44  ;;  %1567 = vmatpush1.bf16.msra.mxu0 %v5026_v45  ;;  %v891_v44 = vmax.f32 %v843_v31, 0.0  ;;  %v5079_v45 = vld [vmem:[%s6736_s3 + $0x18c] ss:$16 sps:$4 sm:$0xff]  }
 0x149   :  { %1239 = vmatprep.subr.bf16.mxu1 %v5031_v33  ;;  %1746 = vmatprep.subr.bf16.mxu0 %v5034_v34  ;;  %v4758_v33 = vpop.f32.mrf.mxu1  ;;  %v5077_v34 = vld [vmem:[%s6736_s3 + $0x188] ss:$16 sps:$4 sm:$0xff]  }
 0x14b   :  { %4408 = vmatmul.mubr.msk.bf16.vlgmr.msra.gmra.mxu0 %vm570_vm0, %v5872_v54 }
 0x14c   :  { %1240 = vmatpush1.bf16.msra.mxu1 %v5029_v50  ;;  %1747 = vmatpush1.bf16.msra.mxu0 %v5032_v51  ;;  %v5991_v50 = vpack.c.bf16 %v891_v44, %v891_v44  ;;  %v5085_v51 = vld [vmem:[%s6736_s3 + $0x26c] ss:$16 sps:$4 sm:$0xff]   ;;  %v6115_v44 = vpop.f32.mrf.mxu0 }
 0x14d   :  { %1415 = vmatprep.subr.bf16.mxu1 %v5037_v55  ;;  %1748 = vmatprep.subr.bf16.mxu0 %v5040_v56  ;;  %v5088_v55 = vld [vmem:[%s6736_s3 + $0x344] ss:$16 sps:$4 sm:$0xff]   ;;  %v4759_v56 = vadd.f32 %v4758_v33, %v4757_v32  ;;  %v5134_v33 = vld [vmem:[%s6736_s3 + $0x440] ss:$16 sps:$4 sm:$0xff]  }
 0x14e   :  { %1770 = vmatprep.mubr.bf16.mxu0 %v5376_v29 }
 0x14f   :  { %4373 = vmatmul.mubr.msk.bf16.vlgmr.msra.gmra.mxu1 %vm570_vm0, %v5760_v52  ;;  %v5052_v52 = vld [vmem:[%s6736_s3 + $0x204] ss:$16 sps:$4 sm:$0xff]  }
 0x150   :  { %1416 = vmatpush1.bf16.msra.mxu1 %v5035_v62  ;;  %1749 = vmatpush1.bf16.msra.mxu0 %v5038_v63  ;;  %v5091_v62 = vld [vmem:[%s6736_s3 + $0x24c] ss:$16 sps:$4 sm:$0xff]   ;;  %v5094_v63 = vld [vmem:[%s6736_s3 + $0x324] ss:$16 sps:$4 sm:$0xff]  }
 0x151   :  { %1417 = vmatprep.subr.bf16.mxu1 %v5043_v43  ;;  %1750 = vmatprep.subr.bf16.mxu0 %v5046_v47  ;;  %v751_v43 = vadd.f32 %v4759_v56, %v5724_v53  ;;  %v5089_v47 = vld [vmem:[%s6736_s3 + $0x248] ss:$16 sps:$4 sm:$0xff]   ;;  %v5097_v53 = vld [vmem:[%s6736_s3 + $0x22c] ss:$16 sps:$4 sm:$0xff]  }
 0x152   :  { %1439 = vmatprep.mubr.bf16.mxu1 %v5376_v29  ;;  %v5137_v56 = vld [vmem:[%s6736_s3 + $0x348] ss:$16 sps:$4 sm:$0xff]  }
 0x153   :  { %v848_v0 = vadd.f32 %v5880_v58, %v751_v43  ;;  %v5098_v58 = vld [vmem:[%s6736_s3 + $0x300] ss:$16 sps:$4 sm:$0xff]  }
 0x154   :  { %1418 = vmatpush1.bf16.msra.mxu1 %v5041_v2  ;;  %1751 = vmatpush1.bf16.msra.mxu0 %v5044_v3  ;;  %v4760_v2 = vpop.f32.mrf.mxu1  ;;  %v5095_v3 = vld [vmem:[%s6736_s3 + $0x228] ss:$16 sps:$4 sm:$0xff]   ;;  %v5146_v43 = vld [vmem:[%s6736_s3 + $0x400] ss:$16 sps:$4 sm:$0xff]  }
 0x155   :  { %1419 = vmatprep.subr.bf16.mxu1 %v5049_v6  ;;  %1752 = vmatprep.subr.bf16.mxu0 %v5052_v52  ;;  %v892_v4 = vmax.f32 %v848_v0, 0.0  ;;  %v5103_v6 = vld [vmem:[%s6736_s3 + $0x20c] ss:$16 sps:$4 sm:$0xff]   ;;  %v5106_v52 = vld [vmem:[%s6736_s3 + $0x3e4] ss:$16 sps:$4 sm:$0xff]  }
 0x156   :  { %v4761_v7 = vpop.f32.mrf.mxu1  ;;  %v5154_v0 = vld [vmem:[%s6736_s3 + $0x4e4] ss:$16 sps:$4 sm:$0xff]  }
 0x157   :  { %v6049_v11 = vpack.c.bf16 %v892_v4, %v892_v4  ;;  %v4762_v15 = vadd.f32 %v4761_v7, %v4760_v2  ;;  %v5152_v2 = vld [vmem:[%s6736_s3 + $0x4e0] ss:$16 sps:$4 sm:$0xff]   ;;  %v5160_v4 = vld [vmem:[%s6736_s3 + $0x4c4] ss:$16 sps:$4 sm:$0xff]   ;;  %v5155_v7 = vld [vmem:[%s6736_s3 + $0x3e8] ss:$16 sps:$4 sm:$0xff]  }
 0x158   :  { %1420 = vmatpush1.bf16.msra.mxu1 %v5047_v8  ;;  %1753 = vmatpush1.bf16.msra.mxu0 %v5050_v10  ;;  %v5101_v8 = vld [vmem:[%s6736_s3 + $0x208] ss:$16 sps:$4 sm:$0xff]   ;;  %v5104_v10 = vld [vmem:[%s6736_s3 + $0x3e0] ss:$16 sps:$4 sm:$0xff]  }
 0x159   :  { %1421 = vmatprep.subr.bf16.mxu1 %v5055_v12  ;;  %1932 = vmatprep.subr.bf16.mxu0 %v5058_v13  ;;  %v5109_v12 = vld [vmem:[%s6736_s3 + $0x2ec] ss:$16 sps:$4 sm:$0xff]   ;;  %v5112_v13 = vld [vmem:[%s6736_s3 + $0x3c4] ss:$16 sps:$4 sm:$0xff]   ;;  %v754_v24 = vadd.f32 %v4762_v15, %v5727_v57 }
 0x15a   :  { %v5121_v57 = vld [vmem:[%s6736_s3 + $0x2ac] ss:$16 sps:$4 sm:$0xff]  }
 0x15b   :  { %4426 = vmatmul.mubr.msk.bf16.vlgmr.msra.gmra.mxu0 %vm570_vm0, %v5932_v18 }
 0x15c   :  { %1422 = vmatpush1.bf16.msra.mxu1 %v5053_v16  ;;  %1933 = vmatpush1.bf16.msra.mxu0 %v5056_v17  ;;  %v5107_v16 = vld [vmem:[%s6736_s3 + $0x2e8] ss:$16 sps:$4 sm:$0xff]   ;;  %v5110_v17 = vld [vmem:[%s6736_s3 + $0x3c0] ss:$16 sps:$4 sm:$0xff]  }
 0x15d   :  { %1601 = vmatprep.subr.bf16.mxu1 %v5061_v19  ;;  %1934 = vmatprep.subr.bf16.mxu0 %v5064_v22  ;;  %v5115_v19 = vld [vmem:[%s6736_s3 + $0x2cc] ss:$16 sps:$4 sm:$0xff]   ;;  %v5118_v22 = vld [vmem:[%s6736_s3 + $0x3a4] ss:$16 sps:$4 sm:$0xff]  }
 0x15e   :  { %1956 = vmatprep.mubr.bf16.mxu0 %v5376_v29 }
 0x15f   :  { %4391 = vmatmul.mubr.msk.bf16.vlgmr.msra.gmra.mxu1 %vm570_vm0, %v5814_v21  ;;  %v5076_v21 = vld [vmem:[%s6736_s3 + $0x284] ss:$16 sps:$4 sm:$0xff]  }
 0x160   :  { %1602 = vmatpush1.bf16.msra.mxu1 %v5059_v25  ;;  %1935 = vmatpush1.bf16.msra.mxu0 %v5062_v26  ;;  %v5113_v25 = vld [vmem:[%s6736_s3 + $0x2c8] ss:$16 sps:$4 sm:$0xff]   ;;  %v5116_v26 = vld [vmem:[%s6736_s3 + $0x3a0] ss:$16 sps:$4 sm:$0xff]  }
 0x161   :  { %1603 = vmatprep.subr.bf16.mxu1 %v5067_v27  ;;  %1936 = vmatprep.subr.bf16.mxu0 %v5070_v40  ;;  %v851_v27 = vadd.f32 %v5940_v23, %v754_v24  ;;  %v4763_v40 = vpop.f32.mrf.mxu1  ;;  %v5122_v23 = vld [vmem:[%s6736_s3 + $0x380] ss:$16 sps:$4 sm:$0xff]   ;;  %v5167_v24 = vld [vmem:[%s6736_s3 + $0x3a8] ss:$16 sps:$4 sm:$0xff]  }
 0x162   :  { %1625 = vmatprep.mubr.bf16.mxu1 %v5376_v29 }
 0x163   :  { %v893_v35 = vmax.f32 %v851_v27, 0.0  ;;  %v4764_v31 = vpop.f32.mrf.mxu1  ;;  %v5175_v27 = vld [vmem:[%s6736_s3 + $0x38c] ss:$16 sps:$4 sm:$0xff]  }
 0x164   :  { %1604 = vmatpush1.bf16.msra.mxu1 %v5065_v36  ;;  %1937 = vmatpush1.bf16.msra.mxu0 %v5068_v38  ;;  %v5127_v36 = vld [vmem:[%s6736_s3 + $0x28c] ss:$16 sps:$4 sm:$0xff]   ;;  %v5130_v38 = vld [vmem:[%s6736_s3 + $0x464] ss:$16 sps:$4 sm:$0xff]  }
 0x165   :  { %1605 = vmatprep.subr.bf16.mxu1 %v5073_v49  ;;  %1938 = vmatprep.subr.bf16.mxu0 %v5076_v21  ;;  %v5125_v49 = vld [vmem:[%s6736_s3 + $0x288] ss:$16 sps:$4 sm:$0xff]   ;;  %v5128_v21 = vld [vmem:[%s6736_s3 + $0x460] ss:$16 sps:$4 sm:$0xff]   ;;  %v6107_v32 = vpack.c.bf16 %v893_v35, %v893_v35  ;;  %v5181_v35 = vld [vmem:[%s6736_s3 + $0x46c] ss:$16 sps:$4 sm:$0xff]  }
 0x168   :  { %1606 = vmatpush1.bf16.msra.mxu1 %v5071_v41  ;;  %1939 = vmatpush1.bf16.msra.mxu0 %v5074_v42  ;;  %v5133_v41 = vld [vmem:[%s6736_s3 + $0x36c] ss:$16 sps:$4 sm:$0xff]   ;;  %v5136_v42 = vld [vmem:[%s6736_s3 + $0x444] ss:$16 sps:$4 sm:$0xff]  }
 0x169   :  { %1607 = vmatprep.subr.bf16.mxu1 %v5079_v45  ;;  %2118 = vmatprep.subr.bf16.mxu0 %v5082_v46  ;;  %v4765_v45 = vadd.f32 %v4764_v31, %v4763_v40  ;;  %v5131_v46 = vld [vmem:[%s6736_s3 + $0x368] ss:$16 sps:$4 sm:$0xff]  }
 0x16a   :  { %v5173_v40 = vld [vmem:[%s6736_s3 + $0x388] ss:$16 sps:$4 sm:$0xff]  }
 0x16b   :  { %4444 = vmatmul.mubr.msk.bf16.vlgmr.msra.gmra.mxu0 %vm570_vm0, %v5991_v50  ;;  %v5179_v31 = vld [vmem:[%s6736_s3 + $0x468] ss:$16 sps:$4 sm:$0xff]  }
 0x16c   :  { %1608 = vmatpush1.bf16.msra.mxu1 %v5077_v34  ;;  %2119 = vmatpush1.bf16.msra.mxu0 %v5080_v48  ;;  %v5139_v34 = vld [vmem:[%s6736_s3 + $0x34c] ss:$16 sps:$4 sm:$0xff]   ;;  %v5142_v48 = vld [vmem:[%s6736_s3 + $0x424] ss:$16 sps:$4 sm:$0xff]  }
 0x16d   :  { %1787 = vmatprep.subr.bf16.mxu1 %v5085_v51  ;;  %2120 = vmatprep.subr.bf16.mxu0 %v5088_v55  ;;  %v855_v51 = vpop.f32.mrf.mxu0  ;;  %v759_v55 = vadd.f32 %v4765_v45, %v5730_v61  ;;  %v5145_v61 = vld [vmem:[%s6736_s3 + $0x32c] ss:$16 sps:$4 sm:$0xff]   ;;  %v5185_v45 = vld [vmem:[%s6736_s3 + $0x448] ss:$16 sps:$4 sm:$0xff]  }
 0x16e   :  { %2142 = vmatprep.mubr.bf16.mxu0 %v5376_v29 }
 0x16f   :  { %4409 = vmatmul.mubr.msk.bf16.vlgmr.msra.gmra.mxu1 %vm570_vm0, %v5872_v54  ;;  %v5100_v54 = vld [vmem:[%s6736_s3 + $0x304] ss:$16 sps:$4 sm:$0xff]  }
 0x170   :  { %1788 = vmatpush1.bf16.msra.mxu1 %v5083_v59  ;;  %2121 = vmatpush1.bf16.msra.mxu0 %v5086_v60  ;;  %v5140_v59 = vld [vmem:[%s6736_s3 + $0x420] ss:$16 sps:$4 sm:$0xff]   ;;  %v856_v60 = vadd.f32 %v855_v51, %v759_v55  ;;  %v5199_v55 = vld [vmem:[%s6736_s3 + $0x40c] ss:$16 sps:$4 sm:$0xff]  }
 0x171   :  { %1789 = vmatprep.subr.bf16.mxu1 %v5091_v62  ;;  %2122 = vmatprep.subr.bf16.mxu0 %v5094_v63  ;;  %v4766_v62 = vpop.f32.mrf.mxu1  ;;  %v5143_v63 = vld [vmem:[%s6736_s3 + $0x328] ss:$16 sps:$4 sm:$0xff]  }
 0x172   :  { %1811 = vmatprep.mubr.bf16.mxu1 %v5376_v29 }
 0x174   :  { %1790 = vmatpush1.bf16.msra.mxu1 %v5089_v47  ;;  %2123 = vmatpush1.bf16.msra.mxu0 %v5092_v37  ;;  %v894_v47 = vmax.f32 %v856_v60, 0.0  ;;  %v5151_v37 = vld [vmem:[%s6736_s3 + $0x30c] ss:$16 sps:$4 sm:$0xff]   ;;  %v5197_v60 = vld [vmem:[%s6736_s3 + $0x408] ss:$16 sps:$4 sm:$0xff]  }
 0x175   :  { %1791 = vmatprep.subr.bf16.mxu1 %v5097_v53  ;;  %2124 = vmatprep.subr.bf16.mxu0 %v5100_v54  ;;  %v4767_v53 = vpop.f32.mrf.mxu1  ;;  %v5149_v54 = vld [vmem:[%s6736_s3 + $0x308] ss:$16 sps:$4 sm:$0xff]  }
 0x178   :  { %1792 = vmatpush1.bf16.msra.mxu1 %v5095_v3  ;;  %2125 = vmatpush1.bf16.msra.mxu0 %v5098_v58  ;;  %v6166_v3 = vpack.c.bf16 %v894_v47, %v894_v47  ;;  %v5157_v58 = vld [vmem:[%s6736_s3 + $0x3ec] ss:$16 sps:$4 sm:$0xff]   ;;  %v5203_v47 = vld [vmem:[%s6736_s3 + $0x4e8] ss:$16 sps:$4 sm:$0xff]  }
 0x179   :  { %1793 = vmatprep.subr.bf16.mxu1 %v5103_v6  ;;  %2304 = vmatprep.subr.bf16.mxu0 %v5106_v52  ;;  %v6174_v6 = vpop.f32.mrf.mxu0  ;;  %v4768_v52 = vadd.f32 %v4767_v53, %v4766_v62  ;;  %v5205_v62 = vld [vmem:[%s6736_s3 + $0x4ec] ss:$16 sps:$4 sm:$0xff]   ;;  %v5214_v53 = vld [vmem:[%s6736_s3 + $0x5a4] ss:$16 sps:$4 sm:$0xff]  }
 0x17b   :  { %4462 = vmatmul.mubr.msk.bf16.vlgmr.msra.gmra.mxu0 %vm570_vm0, %v6049_v11  ;;  %v762_v15 = vadd.f32 %v4768_v52, %v5733_v1  ;;  %v5169_v1 = vld [vmem:[%s6736_s3 + $0x3ac] ss:$16 sps:$4 sm:$0xff]  }
 0x17c   :  { %1794 = vmatpush1.bf16.msra.mxu1 %v5101_v8  ;;  %2305 = vmatpush1.bf16.msra.mxu0 %v5104_v10  ;;  %v5158_v8 = vld [vmem:[%s6736_s3 + $0x4c0] ss:$16 sps:$4 sm:$0xff]   ;;  %v5163_v10 = vld [vmem:[%s6736_s3 + $0x3cc] ss:$16 sps:$4 sm:$0xff]  }
 0x17d   :  { %1973 = vmatprep.subr.bf16.mxu1 %v5109_v12  ;;  %2306 = vmatprep.subr.bf16.mxu0 %v5112_v13  ;;  %v5166_v12 = vld [vmem:[%s6736_s3 + $0x4a4] ss:$16 sps:$4 sm:$0xff]   ;;  %v858_v13 = vpop.f32.mrf.mxu0 }
 0x17e   :  { %2328 = vmatprep.mubr.bf16.mxu0 %v5376_v29 }
 0x17f   :  { %4427 = vmatmul.mubr.msk.bf16.vlgmr.msra.gmra.mxu1 %vm570_vm0, %v5932_v18  ;;  %v5124_v18 = vld [vmem:[%s6736_s3 + $0x384] ss:$16 sps:$4 sm:$0xff]  }
 0x180   :  { %1974 = vmatpush1.bf16.msra.mxu1 %v5107_v16  ;;  %2307 = vmatpush1.bf16.msra.mxu0 %v5110_v17  ;;  %v5161_v16 = vld [vmem:[%s6736_s3 + $0x3c8] ss:$16 sps:$4 sm:$0xff]   ;;  %v5164_v17 = vld [vmem:[%s6736_s3 + $0x4a0] ss:$16 sps:$4 sm:$0xff]  }
 0x181   :  { %1975 = vmatprep.subr.bf16.mxu1 %v5115_v19  ;;  %2308 = vmatprep.subr.bf16.mxu0 %v5118_v22  ;;  %v859_v19 = vadd.f32 %v858_v13, %v762_v15  ;;  %v4769_v22 = vpop.f32.mrf.mxu1  ;;  %v5221_v15 = vld [vmem:[%s6736_s3 + $0x488] ss:$16 sps:$4 sm:$0xff]  }
 0x182   :  { %1997 = vmatprep.mubr.bf16.mxu1 %v5376_v29 }
 0x184   :  { %1976 = vmatpush1.bf16.msra.mxu1 %v5113_v25  ;;  %2309 = vmatpush1.bf16.msra.mxu0 %v5116_v26  ;;  %v5170_v25 = vld [vmem:[%s6736_s3 + $0x480] ss:$16 sps:$4 sm:$0xff]   ;;  %v895_v26 = vmax.f32 %v859_v19, 0.0  ;;  %v5229_v19 = vld [vmem:[%s6736_s3 + $0x56c] ss:$16 sps:$4 sm:$0xff]  }
 0x185   :  { %1977 = vmatprep.subr.bf16.mxu1 %v5121_v57  ;;  %2310 = vmatprep.subr.bf16.mxu0 %v5124_v18  ;;  %v5178_v57 = vld [vmem:[%s6736_s3 + $0x564] ss:$16 sps:$4 sm:$0xff]   ;;  %v4770_v18 = vpop.f32.mrf.mxu1 }
 0x188   :  { %1978 = vmatpush1.bf16.msra.mxu1 %v5119_v30  ;;  %2311 = vmatpush1.bf16.msra.mxu0 %v5122_v23  ;;  %v5176_v30 = vld [vmem:[%s6736_s3 + $0x560] ss:$16 sps:$4 sm:$0xff]   ;;  %v6225_v23 = vpack.c.bf16 %v895_v26, %v895_v26  ;;  %v5235_v26 = vld [vmem:[%s6736_s3 + $0x54c] ss:$16 sps:$4 sm:$0xff]  }
 0x189   :  { %1979 = vmatprep.subr.bf16.mxu1 %v5127_v36  ;;  %2490 = vmatprep.subr.bf16.mxu0 %v5130_v38  ;;  %v5184_v36 = vld [vmem:[%s6736_s3 + $0x544] ss:$16 sps:$4 sm:$0xff]   ;;  %v4771_v38 = vadd.f32 %v4770_v18, %v4769_v22 }
 0x18b   :  { %4480 = vmatmul.mubr.msk.bf16.vlgmr.msra.gmra.mxu0 %vm570_vm0, %v6107_v32 }
 0x18c   :  { %1980 = vmatpush1.bf16.msra.mxu1 %v5125_v49  ;;  %2491 = vmatpush1.bf16.msra.mxu0 %v5128_v21  ;;  %v5182_v49 = vld [vmem:[%s6736_s3 + $0x540] ss:$16 sps:$4 sm:$0xff]   ;;  %v5187_v21 = vld [vmem:[%s6736_s3 + $0x44c] ss:$16 sps:$4 sm:$0xff]  }
 0x18d   :  { %2159 = vmatprep.subr.bf16.mxu1 %v5133_v41  ;;  %2492 = vmatprep.subr.bf16.mxu0 %v5136_v42  ;;  %v5190_v41 = vld [vmem:[%s6736_s3 + $0x524] ss:$16 sps:$4 sm:$0xff]   ;;  %v767_v42 = vadd.f32 %v4771_v38, %v5736_v5  ;;  %v5193_v5 = vld [vmem:[%s6736_s3 + $0x42c] ss:$16 sps:$4 sm:$0xff]   ;;  %v5239_v38 = vld [vmem:[%s6736_s3 + $0x528] ss:$16 sps:$4 sm:$0xff]  }
 0x18e   :  { %2514 = vmatprep.mubr.bf16.mxu0 %v5376_v29 }
 0x18f   :  { %4445 = vmatmul.mubr.msk.bf16.vlgmr.msra.gmra.mxu1 %vm570_vm0, %v5991_v50  ;;  %v5148_v50 = vld [vmem:[%s6736_s3 + $0x404] ss:$16 sps:$4 sm:$0xff]  }
 0x190   :  { %2160 = vmatpush1.bf16.msra.mxu1 %v5131_v46  ;;  %2493 = vmatpush1.bf16.msra.mxu0 %v5134_v33  ;;  %v5188_v46 = vld [vmem:[%s6736_s3 + $0x520] ss:$16 sps:$4 sm:$0xff]   ;;  %v864_v33 = vadd.f32 %v6115_v44, %v767_v42 }
 0x191   :  { %2161 = vmatprep.subr.bf16.mxu1 %v5139_v34  ;;  %2494 = vmatprep.subr.bf16.mxu0 %v5142_v48  ;;  %v4772_v34 = vpop.f32.mrf.mxu1  ;;  %v5191_v48 = vld [vmem:[%s6736_s3 + $0x428] ss:$16 sps:$4 sm:$0xff]   ;;  %v5194_v44 = vld [vmem:[%s6736_s3 + $0x500] ss:$16 sps:$4 sm:$0xff]  }
 0x192   :  { %2183 = vmatprep.mubr.bf16.mxu1 %v5376_v29  ;;  %v896_v51 = vmax.f32 %v864_v33, 0.0 }
 0x194   :  { %2162 = vmatpush1.bf16.msra.mxu1 %v5137_v56  ;;  %2495 = vmatpush1.bf16.msra.mxu0 %v5140_v59  ;;  %v5202_v56 = vld [vmem:[%s6736_s3 + $0x5e4] ss:$16 sps:$4 sm:$0xff]   ;;  %v4773_v59 = vpop.f32.mrf.mxu1 }
 0x195   :  { %2163 = vmatprep.subr.bf16.mxu1 %v5145_v61  ;;  %2496 = vmatprep.subr.bf16.mxu0 %v5148_v50  ;;  %v5200_v61 = vld [vmem:[%s6736_s3 + $0x5e0] ss:$16 sps:$4 sm:$0xff]   ;;  %v6283_v50 = vpack.c.bf16 %v896_v51, %v896_v51 }
 0x196   :  { %v4775_v52 = vpop.f32.mrf.mxu1  ;;  %v5254_v51 = vld [vmem:[%s6736_s3 + $0x6c0] ss:$16 sps:$4 sm:$0xff]  }
 0x198   :  { %2164 = vmatpush1.bf16.msra.mxu1 %v5143_v63  ;;  %2497 = vmatpush1.bf16.msra.mxu0 %v5146_v43  ;;  %v5208_v63 = vld [vmem:[%s6736_s3 + $0x5c4] ss:$16 sps:$4 sm:$0xff]   ;;  %v4774_v43 = vadd.f32 %v4773_v59, %v4772_v34  ;;  %v4776_v13 = vpop.f32.mrf.mxu1 }
 0x199   :  { %2165 = vmatprep.subr.bf16.mxu1 %v5151_v37  ;;  %2676 = vmatprep.subr.bf16.mxu0 %v5154_v0  ;;  %v5206_v37 = vld [vmem:[%s6736_s3 + $0x5c0] ss:$16 sps:$4 sm:$0xff]   ;;  %v5211_v0 = vld [vmem:[%s6736_s3 + $0x4cc] ss:$16 sps:$4 sm:$0xff]   ;;  %v4777_v22 = vadd.f32 %v4776_v13, %v4775_v52 }
 0x19a   :  { %v5277_v52 = vld [vmem:[%s6736_s3 + $0x66c] ss:$16 sps:$4 sm:$0xff]  }
 0x19b   :  { %4498 = vmatmul.mubr.msk.bf16.vlgmr.msra.gmra.mxu0 %vm570_vm0, %v6166_v3  ;;  %v775_v18 = vadd.f32 %v4777_v22, %v5742_v14  ;;  %v5241_v14 = vld [vmem:[%s6736_s3 + $0x52c] ss:$16 sps:$4 sm:$0xff]  }
 0x19c   :  { %2166 = vmatpush1.bf16.msra.mxu1 %v5149_v54  ;;  %2677 = vmatpush1.bf16.msra.mxu0 %v5152_v2  ;;  %v770_v54 = vadd.f32 %v4774_v43, %v5739_v9  ;;  %v5209_v2 = vld [vmem:[%s6736_s3 + $0x4c8] ss:$16 sps:$4 sm:$0xff]   ;;  %v5217_v9 = vld [vmem:[%s6736_s3 + $0x4ac] ss:$16 sps:$4 sm:$0xff]  }
 0x19d   :  { %2345 = vmatprep.subr.bf16.mxu1 %v5157_v58  ;;  %2678 = vmatprep.subr.bf16.mxu0 %v5160_v4  ;;  %v5212_v58 = vld [vmem:[%s6736_s3 + $0x5a0] ss:$16 sps:$4 sm:$0xff]  }
 0x19e   :  { %2700 = vmatprep.mubr.bf16.mxu0 %v5376_v29  ;;  %v867_v4 = vadd.f32 %v6174_v6, %v770_v54  ;;  %v5218_v6 = vld [vmem:[%s6736_s3 + $0x580] ss:$16 sps:$4 sm:$0xff]   ;;  %v5271_v54 = vld [vmem:[%s6736_s3 + $0x58c] ss:$16 sps:$4 sm:$0xff]  }
 0x19f   :  { %4463 = vmatmul.mubr.msk.bf16.vlgmr.msra.gmra.mxu1 %vm570_vm0, %v6049_v11  ;;  %v5172_v11 = vld [vmem:[%s6736_s3 + $0x484] ss:$16 sps:$4 sm:$0xff]  }
 0x1a0   :  { %2346 = vmatpush1.bf16.msra.mxu1 %v5155_v7  ;;  %2679 = vmatpush1.bf16.msra.mxu0 %v5158_v8  ;;  %v5215_v7 = vld [vmem:[%s6736_s3 + $0x4a8] ss:$16 sps:$4 sm:$0xff]   ;;  %v897_v8 = vmax.f32 %v867_v4, 0.0  ;;  %v5272_v4 = vld [vmem:[%s6736_s3 + $0x760] ss:$16 sps:$4 sm:$0xff]  }
 0x1a1   :  { %2347 = vmatprep.subr.bf16.mxu1 %v5163_v10  ;;  %2680 = vmatprep.subr.bf16.mxu0 %v5166_v12  ;;  %v5223_v10 = vld [vmem:[%s6736_s3 + $0x48c] ss:$16 sps:$4 sm:$0xff]   ;;  %v5226_v12 = vld [vmem:[%s6736_s3 + $0x664] ss:$16 sps:$4 sm:$0xff]  }
 0x1a2   :  { %2369 = vmatprep.mubr.bf16.mxu1 %v5376_v29 }
 0x1a4   :  { %2348 = vmatpush1.bf16.msra.mxu1 %v5161_v16  ;;  %2681 = vmatpush1.bf16.msra.mxu0 %v5164_v17  ;;  %v5224_v16 = vld [vmem:[%s6736_s3 + $0x660] ss:$16 sps:$4 sm:$0xff]   ;;  %v6341_v17 = vpack.c.bf16 %v897_v8, %v897_v8 }
 0x1a5   :  { %2349 = vmatprep.subr.bf16.mxu1 %v5169_v1  ;;  %2682 = vmatprep.subr.bf16.mxu0 %v5172_v11  ;;  %v5232_v1 = vld [vmem:[%s6736_s3 + $0x644] ss:$16 sps:$4 sm:$0xff]   ;;  %v6349_v11 = vpop.f32.mrf.mxu0 }
 0x1a8   :  { %2350 = vmatpush1.bf16.msra.mxu1 %v5167_v24  ;;  %2683 = vmatpush1.bf16.msra.mxu0 %v5170_v25  ;;  %v5227_v24 = vld [vmem:[%s6736_s3 + $0x568] ss:$16 sps:$4 sm:$0xff]   ;;  %v5230_v25 = vld [vmem:[%s6736_s3 + $0x640] ss:$16 sps:$4 sm:$0xff]  }
 0x1a9   :  { %2351 = vmatprep.subr.bf16.mxu1 %v5175_v27  ;;  %2862 = vmatprep.subr.bf16.mxu0 %v5178_v57  ;;  %v5238_v27 = vld [vmem:[%s6736_s3 + $0x624] ss:$16 sps:$4 sm:$0xff]   ;;  %v871_v57 = vpop.f32.mrf.mxu0 }
 0x1ab   :  { %4516 = vmatmul.mubr.msk.bf16.vlgmr.msra.gmra.mxu0 %vm570_vm0, %v6225_v23  ;;  %v6408_v34 = vpop.f32.mrf.mxu0 }
 0x1ac   :  { %2352 = vmatpush1.bf16.msra.mxu1 %v5173_v40  ;;  %2863 = vmatpush1.bf16.msra.mxu0 %v5176_v30  ;;  %v5233_v40 = vld [vmem:[%s6736_s3 + $0x548] ss:$16 sps:$4 sm:$0xff]   ;;  %v5236_v30 = vld [vmem:[%s6736_s3 + $0x620] ss:$16 sps:$4 sm:$0xff]  }
 0x1ad   :  { %2531 = vmatprep.subr.bf16.mxu1 %v5181_v35  ;;  %2864 = vmatprep.subr.bf16.mxu0 %v5184_v36  ;;  %v872_v35 = vadd.f32 %v871_v57, %v775_v18  ;;  %v4778_v36 = vpop.f32.mrf.mxu1  ;;  %v874_v59 = vpop.f32.mrf.mxu0 }
 0x1ae   :  { %2886 = vmatprep.mubr.bf16.mxu0 %v5376_v29 }
 0x1af   :  { %4481 = vmatmul.mubr.msk.bf16.vlgmr.msra.gmra.mxu1 %vm570_vm0, %v6107_v32  ;;  %v5196_v32 = vld [vmem:[%s6736_s3 + $0x504] ss:$16 sps:$4 sm:$0xff]   ;;  %v4779_v42 = vpop.f32.mrf.mxu1 }
 0x1b0   :  { %2532 = vmatpush1.bf16.msra.mxu1 %v5179_v31  ;;  %2865 = vmatpush1.bf16.msra.mxu0 %v5182_v49  ;;  %v5242_v31 = vld [vmem:[%s6736_s3 + $0x600] ss:$16 sps:$4 sm:$0xff]   ;;  %v898_v49 = vmax.f32 %v872_v35, 0.0 }
 0x1b1   :  { %2533 = vmatprep.subr.bf16.mxu1 %v5187_v21  ;;  %2866 = vmatprep.subr.bf16.mxu0 %v5190_v41  ;;  %v5247_v21 = vld [vmem:[%s6736_s3 + $0x50c] ss:$16 sps:$4 sm:$0xff]   ;;  %v5250_v41 = vld [vmem:[%s6736_s3 + $0x6e4] ss:$16 sps:$4 sm:$0xff]  }
 0x1b2   :  { %2555 = vmatprep.mubr.bf16.mxu1 %v5376_v29  ;;  %v6400_v33 = vpack.c.bf16 %v898_v49, %v898_v49  ;;  %v5293_v49 = vld [vmem:[%s6736_s3 + $0x608] ss:$16 sps:$4 sm:$0xff]  }
 0x1b4   :  { %2534 = vmatpush1.bf16.msra.mxu1 %v5185_v45  ;;  %2867 = vmatpush1.bf16.msra.mxu0 %v5188_v46  ;;  %v5245_v45 = vld [vmem:[%s6736_s3 + $0x508] ss:$16 sps:$4 sm:$0xff]   ;;  %v5248_v46 = vld [vmem:[%s6736_s3 + $0x6e0] ss:$16 sps:$4 sm:$0xff]  }
 0x1b5   :  { %2535 = vmatprep.subr.bf16.mxu1 %v5193_v5  ;;  %2868 = vmatprep.subr.bf16.mxu0 %v5196_v32  ;;  %v5253_v5 = vld [vmem:[%s6736_s3 + $0x5ec] ss:$16 sps:$4 sm:$0xff]   ;;  %v5256_v32 = vld [vmem:[%s6736_s3 + $0x6c4] ss:$16 sps:$4 sm:$0xff]  }
 0x1b8   :  { %2536 = vmatpush1.bf16.msra.mxu1 %v5191_v48  ;;  %2869 = vmatpush1.bf16.msra.mxu0 %v5194_v44  ;;  %v4780_v48 = vadd.f32 %v4779_v42, %v4778_v36  ;;  %v5251_v44 = vld [vmem:[%s6736_s3 + $0x5e8] ss:$16 sps:$4 sm:$0xff]   ;;  %v5301_v42 = vld [vmem:[%s6736_s3 + $0x6ec] ss:$16 sps:$4 sm:$0xff]  }
 0x1b9   :  { %2537 = vmatprep.subr.bf16.mxu1 %v5199_v55  ;;  %3048 = vmatprep.subr.bf16.mxu0 %v5202_v56  ;;  %v5259_v55 = vld [vmem:[%s6736_s3 + $0x5cc] ss:$16 sps:$4 sm:$0xff]   ;;  %v5262_v56 = vld [vmem:[%s6736_s3 + $0x6a4] ss:$16 sps:$4 sm:$0xff]  }
 0x1bb   :  { %4534 = vmatmul.mubr.msk.bf16.vlgmr.msra.gmra.mxu0 %vm570_vm0, %v6283_v50 }
 0x1bc   :  { %2538 = vmatpush1.bf16.msra.mxu1 %v5197_v60  ;;  %3049 = vmatpush1.bf16.msra.mxu0 %v5200_v61  ;;  %v778_v60 = vadd.f32 %v4780_v48, %v5745_v20  ;;  %v5257_v61 = vld [vmem:[%s6736_s3 + $0x5c8] ss:$16 sps:$4 sm:$0xff]   ;;  %v5265_v20 = vld [vmem:[%s6736_s3 + $0x5ac] ss:$16 sps:$4 sm:$0xff]  }
 0x1bd   :  { %2717 = vmatprep.subr.bf16.mxu1 %v5205_v62  ;;  %3050 = vmatprep.subr.bf16.mxu0 %v5208_v63  ;;  %v5260_v62 = vld [vmem:[%s6736_s3 + $0x6a0] ss:$16 sps:$4 sm:$0xff]   ;;  %v4781_v63 = vpop.f32.mrf.mxu1  ;;  %v5299_v48 = vld [vmem:[%s6736_s3 + $0x6e8] ss:$16 sps:$4 sm:$0xff]  }
 0x1be   :  { %3072 = vmatprep.mubr.bf16.mxu0 %v5376_v29  ;;  %v875_v43 = vadd.f32 %v874_v59, %v778_v60 }
 0x1bf   :  { %4499 = vmatmul.mubr.msk.bf16.vlgmr.msra.gmra.mxu1 %vm570_vm0, %v6166_v3  ;;  %v5220_v3 = vld [vmem:[%s6736_s3 + $0x584] ss:$16 sps:$4 sm:$0xff]  }
 0x1c0   :  { %2718 = vmatpush1.bf16.msra.mxu1 %v5203_v47  ;;  %3051 = vmatpush1.bf16.msra.mxu0 %v5206_v37  ;;  %v5263_v47 = vld [vmem:[%s6736_s3 + $0x5a8] ss:$16 sps:$4 sm:$0xff]   ;;  %v5266_v37 = vld [vmem:[%s6736_s3 + $0x680] ss:$16 sps:$4 sm:$0xff]  }
 0x1c1   :  { %2719 = vmatprep.subr.bf16.mxu1 %v5211_v0  ;;  %3052 = vmatprep.subr.bf16.mxu0 %v5214_v53  ;;  %v4782_v0 = vpop.f32.mrf.mxu1  ;;  %v899_v53 = vmax.f32 %v875_v43, 0.0  ;;  %v5308_v43 = vld [vmem:[%s6736_s3 + $0x7a0] ss:$16 sps:$4 sm:$0xff]  }
 0x1c2   :  { %2741 = vmatprep.mubr.bf16.mxu1 %v5376_v29 }
 0x1c4   :  { %2720 = vmatpush1.bf16.msra.mxu1 %v5209_v2  ;;  %3053 = vmatpush1.bf16.msra.mxu0 %v5212_v58  ;;  %v5274_v2 = vld [vmem:[%s6736_s3 + $0x764] ss:$16 sps:$4 sm:$0xff]   ;;  %v5269_v58 = vld [vmem:[%s6736_s3 + $0x588] ss:$16 sps:$4 sm:$0xff]  }
 0x1c5   :  { %2721 = vmatprep.subr.bf16.mxu1 %v5217_v9  ;;  %3054 = vmatprep.subr.bf16.mxu0 %v5220_v3  ;;  %v4784_v9 = vpop.f32.mrf.mxu1  ;;  %v6459_v3 = vpack.c.bf16 %v899_v53, %v899_v53 }
 0x1c7   :  { %v4785_v13 = vpop.f32.mrf.mxu1 }
 0x1c8   :  { %2722 = vmatpush1.bf16.msra.mxu1 %v5215_v7  ;;  %3055 = vmatpush1.bf16.msra.mxu0 %v5218_v6  ;;  %v5280_v7 = vld [vmem:[%s6736_s3 + $0x744] ss:$16 sps:$4 sm:$0xff]   ;;  %v4783_v6 = vadd.f32 %v4782_v0, %v4781_v63  ;;  %v5305_v63 = vld [vmem:[%s6736_s3 + $0x6c8] ss:$16 sps:$4 sm:$0xff]   ;;  %v5314_v0 = vld [vmem:[%s6736_s3 + $0x780] ss:$16 sps:$4 sm:$0xff]  }
 0x1c9   :  { %2723 = vmatprep.subr.bf16.mxu1 %v5223_v10  ;;  %3234 = vmatprep.subr.bf16.mxu0 %v5226_v12  ;;  %v5275_v10 = vld [vmem:[%s6736_s3 + $0x668] ss:$16 sps:$4 sm:$0xff]   ;;  %v5278_v12 = vld [vmem:[%s6736_s3 + $0x740] ss:$16 sps:$4 sm:$0xff]  }
 0x1cb   :  { %4552 = vmatmul.mubr.msk.bf16.vlgmr.msra.gmra.mxu0 %vm570_vm0, %v6341_v17 }
 0x1cc   :  { %2724 = vmatpush1.bf16.msra.mxu1 %v5221_v15  ;;  %3235 = vmatpush1.bf16.msra.mxu0 %v5224_v16  ;;  %v5283_v16 = vld [vmem:[%s6736_s3 + $0x64c] ss:$16 sps:$4 sm:$0xff]  }
 0x1cd   :  { %2903 = vmatprep.subr.bf16.mxu1 %v5229_v19  ;;  %3236 = vmatprep.subr.bf16.mxu0 %v5232_v1  ;;  %v5286_v19 = vld [vmem:[%s6736_s3 + $0x724] ss:$16 sps:$4 sm:$0xff]   ;;  %v783_v1 = vadd.f32 %v4783_v6, %v5749_v28  ;;  %v5320_v6 = vld [vmem:[%s6736_s3 + $0x768] ss:$16 sps:$4 sm:$0xff]  }
 0x1ce   :  { %3258 = vmatprep.mubr.bf16.mxu0 %v5376_v29 }
 0x1cf   :  { %4517 = vmatmul.mubr.msk.bf16.vlgmr.msra.gmra.mxu1 %vm570_vm0, %v6225_v23  ;;  %v5244_v23 = vld [vmem:[%s6736_s3 + $0x604] ss:$16 sps:$4 sm:$0xff]   ;;  %v880_v57 = vadd.f32 %v6349_v11, %v783_v1  ;;  %v5287_v11 = vld [vmem:[%s6736_s3 + $0x628] ss:$16 sps:$4 sm:$0xff]  }
 0x1d0   :  { %2904 = vmatpush1.bf16.msra.mxu1 %v5227_v24  ;;  %3237 = vmatpush1.bf16.msra.mxu0 %v5230_v25 }
 0x1d1   :  { %2905 = vmatprep.subr.bf16.mxu1 %v5235_v26  ;;  %3238 = vmatprep.subr.bf16.mxu0 %v5238_v27  ;;  %v5281_v26 = vld [vmem:[%s6736_s3 + $0x648] ss:$16 sps:$4 sm:$0xff]   ;;  %v5284_v27 = vld [vmem:[%s6736_s3 + $0x720] ss:$16 sps:$4 sm:$0xff]  }
 0x1d2   :  { %2927 = vmatprep.mubr.bf16.mxu1 %v5376_v29 }
 0x1d4   :  { %2906 = vmatpush1.bf16.msra.mxu1 %v5233_v40  ;;  %3239 = vmatpush1.bf16.msra.mxu0 %v5236_v30  ;;  %v5292_v40 = vld [vmem:[%s6736_s3 + $0x704] ss:$16 sps:$4 sm:$0xff]  }
 0x1d5   :  { %2907 = vmatprep.subr.bf16.mxu1 %v5241_v14  ;;  %3240 = vmatprep.subr.bf16.mxu0 %v5244_v23  ;;  %v5290_v14 = vld [vmem:[%s6736_s3 + $0x700] ss:$16 sps:$4 sm:$0xff]   ;;  %v900_v23 = vmax.f32 %v880_v57, 0.0  ;;  %v5331_v57 = vld [vmem:[%s6736_s3 + $0x70c] ss:$16 sps:$4 sm:$0xff]  }
 0x1d8   :  { %2908 = vmatpush1.bf16.msra.mxu1 %v5239_v38  ;;  %3241 = vmatpush1.bf16.msra.mxu0 %v5242_v31  ;;  %v5295_v38 = vld [vmem:[%s6736_s3 + $0x60c] ss:$16 sps:$4 sm:$0xff]   ;;  %v5298_v31 = vld [vmem:[%s6736_s3 + $0x7e4] ss:$16 sps:$4 sm:$0xff]  }
 0x1d9   :  { %2909 = vmatprep.subr.bf16.mxu1 %v5247_v21  ;;  %3420 = vmatprep.subr.bf16.mxu0 %v5250_v41  ;;  %v5296_v21 = vld [vmem:[%s6736_s3 + $0x7e0] ss:$16 sps:$4 sm:$0xff]   ;;  %v6517_v41 = vpack.c.bf16 %v900_v23, %v900_v23 }
 0x1db   :  { %4570 = vmatmul.mubr.msk.bf16.vlgmr.msra.gmra.mxu0 %vm570_vm0, %v6400_v33 }
 0x1dc   :  { %2910 = vmatpush1.bf16.msra.mxu1 %v5245_v45  ;;  %3421 = vmatpush1.bf16.msra.mxu0 %v5248_v46  ;;  %v5304_v45 = vld [vmem:[%s6736_s3 + $0x7c4] ss:$16 sps:$4 sm:$0xff]   ;;  %v4786_v46 = vadd.f32 %v4785_v13, %v4784_v9  ;;  %v5322_v9 = vld [vmem:[%s6736_s3 + $0x76c] ss:$16 sps:$4 sm:$0xff]  }
 0x1dd   :  { %3089 = vmatprep.subr.bf16.mxu1 %v5253_v5  ;;  %3422 = vmatprep.subr.bf16.mxu0 %v5256_v32 }
 0x1de   :  { %3444 = vmatprep.mubr.bf16.mxu0 %v5376_v29  ;;  %v786_v60 = vadd.f32 %v4786_v46, %v5753_v39  ;;  %v5313_v39 = vld [vmem:[%s6736_s3 + $0x6ac] ss:$16 sps:$4 sm:$0xff]  }
 0x1df   :  { %4535 = vmatmul.mubr.msk.bf16.vlgmr.msra.gmra.mxu1 %vm570_vm0, %v6283_v50  ;;  %v5268_v50 = vld [vmem:[%s6736_s3 + $0x684] ss:$16 sps:$4 sm:$0xff]  }
 0x1e0   :  { %3090 = vmatpush1.bf16.msra.mxu1 %v5251_v44  ;;  %3423 = vmatpush1.bf16.msra.mxu0 %v5254_v51  ;;  %v5302_v44 = vld [vmem:[%s6736_s3 + $0x7c0] ss:$16 sps:$4 sm:$0xff]  }
 0x1e1   :  { %3091 = vmatprep.subr.bf16.mxu1 %v5259_v55  ;;  %3424 = vmatprep.subr.bf16.mxu0 %v5262_v56  ;;  %v5307_v55 = vld [vmem:[%s6736_s3 + $0x6cc] ss:$16 sps:$4 sm:$0xff]   ;;  %v5310_v56 = vld [vmem:[%s6736_s3 + $0x7a4] ss:$16 sps:$4 sm:$0xff]  }
 0x1e2   :  { %3113 = vmatprep.mubr.bf16.mxu1 %v5376_v29 }
 0x1e4   :  { %3092 = vmatpush1.bf16.msra.mxu1 %v5257_v61  ;;  %3425 = vmatpush1.bf16.msra.mxu0 %v5260_v62 }
 0x1e5   :  { %3093 = vmatprep.subr.bf16.mxu1 %v5265_v20  ;;  %3426 = vmatprep.subr.bf16.mxu0 %v5268_v50  ;;  %v883_v20 = vadd.f32 %v6408_v34, %v786_v60  ;;  %v5311_v34 = vld [vmem:[%s6736_s3 + $0x6a8] ss:$16 sps:$4 sm:$0xff]  }
 0x1e7   :  { %v901_v53 = vmax.f32 %v883_v20, 0.0 }
 0x1e8   :  { %3094 = vmatpush1.bf16.msra.mxu1 %v5263_v47  ;;  %3427 = vmatpush1.bf16.msra.mxu0 %v5266_v37 }
 0x1e9   :  { %3095 = vmatprep.subr.bf16.mxu1 %v5271_v54  ;;  %3606 = vmatprep.subr.bf16.mxu0 %v5274_v2  ;;  %v5319_v2 = vld [vmem:[%s6736_s3 + $0x68c] ss:$16 sps:$4 sm:$0xff]  }
 0x1eb   :  { %4588 = vmatmul.mubr.msk.bf16.vlgmr.msra.gmra.mxu0 %vm570_vm0, %v6459_v3  ;;  %v1218_v8 = vpop.f32.mrf.mxu0 }
 0x1ec   :  { %3096 = vmatpush1.bf16.msra.mxu1 %v5269_v58  ;;  %3607 = vmatpush1.bf16.msra.mxu0 %v5272_v4  ;;  %v5317_v58 = vld [vmem:[%s6736_s3 + $0x688] ss:$16 sps:$4 sm:$0xff]   ;;  %v6569_v4 = vpack.c.bf16 %v901_v53, %v901_v53 }
 0x1ed   :  { %v1220_v15 = vpop.f32.mrf.mxu0  ;;  %3275 = vmatprep.subr.bf16.mxu1 %v5277_v52  ;;  %3608 = vmatprep.subr.bf16.mxu0 %v5280_v7  ;;  %v5348_v53 = vld [vmem:[%s6738_s5 + $0x68] sm:$0xff]  }
 0x1ee   :  { %3630 = vmatprep.mubr.bf16.mxu0 %v5376_v29 }
 0x1ef   :  { %4553 = vmatmul.mubr.msk.bf16.vlgmr.msra.gmra.mxu1 %vm570_vm0, %v6341_v17  ;;  %v1053_v22 = vpop.f32.mrf.mxu1  ;;  %v1222_v24 = vpop.f32.mrf.mxu0  ;;  %v5289_v17 = vld [vmem:[%s6736_s3 + $0x62c] ss:$16 sps:$4 sm:$0xff]  }
 0x1f0   :  { %v1219_v25 = vadd.f32 %v1218_v8, %v1053_v22  ;;  %3276 = vmatpush1.bf16.msra.mxu1 %v5275_v10  ;;  %3609 = vmatpush1.bf16.msra.mxu0 %v5278_v12  ;;  %v5325_v10 = vld [vmem:[%s6736_s3 + $0x74c] ss:$16 sps:$4 sm:$0xff]  }
 0x1f1   :  { %v1055_v18 = vpop.f32.mrf.mxu1  ;;  %v1223_v28 = vpop.f32.mrf.mxu0  ;;  %3277 = vmatprep.subr.bf16.mxu1 %v5283_v16  ;;  %3610 = vmatprep.subr.bf16.mxu0 %v5286_v19  ;;  %v5323_v19 = vld [vmem:[%s6736_s3 + $0x748] ss:$16 sps:$4 sm:$0xff]   ;;  %v5328_v24 = vld [vmem:[%s6736_s3 + $0x72c] ss:$16 sps:$4 sm:$0xff]  }
 0x1f2   :  { %v1221_v30 = vadd.f32 %v1220_v15, %v1055_v18  ;;  %3299 = vmatprep.mubr.bf16.mxu1 %v5376_v29  ;;  %v5329_v18 = vld [vmem:[%s6736_s3 + $0x708] ss:$16 sps:$4 sm:$0xff]   ;;  %v5334_v28 = vld [vmem:[%s6736_s3 + $0x7ec] ss:$16 sps:$4 sm:$0xff]  }
 0x1f3   :  { %v1057_v35 = vpop.f32.mrf.mxu1 }
 0x1f4   :  { %3278 = vmatpush1.bf16.msra.mxu1 %v5281_v26  ;;  %3611 = vmatpush1.bf16.msra.mxu0 %v5284_v27 }
 0x1f5   :  { %v1058_v36 = vpop.f32.mrf.mxu1  ;;  %3279 = vmatprep.subr.bf16.mxu1 %v5289_v17  ;;  %3612 = vmatprep.subr.bf16.mxu0 %v5292_v40 }
 0x1f8   :  { %3280 = vmatpush1.bf16.msra.mxu1 %v5287_v11  ;;  %3613 = vmatpush1.bf16.msra.mxu0 %v5290_v14  ;;  %v5337_v11 = vld [vmem:[%s6736_s3 + $0x7cc] ss:$16 sps:$4 sm:$0xff]  }
 0x1f9   :  { %3281 = vmatprep.subr.bf16.mxu1 %v5295_v38  ;;  %3792 = vmatprep.subr.bf16.mxu0 %v5298_v31  ;;  %v5335_v31 = vld [vmem:[%s6736_s3 + $0x7c8] ss:$16 sps:$4 sm:$0xff]  }
 0x1fb   :  { %v1400_v5 = vpop.f32.mrf.mxu0  ;;  %4606 = vmatmul.mubr.msk.bf16.vlgmr.msra.gmra.mxu0 %vm570_vm0, %v6517_v41 }
 0x1fc   :  { %v1448_v32 = vadd.f32 %v1400_v5, %v1219_v25  ;;  %3282 = vmatpush1.bf16.msra.mxu1 %v5293_v49  ;;  %3793 = vmatpush1.bf16.msra.mxu0 %v5296_v21 }
 0x1fd   :  { %v1402_v51 = vpop.f32.mrf.mxu0  ;;  %3461 = vmatprep.subr.bf16.mxu1 %v5301_v42  ;;  %3794 = vmatprep.subr.bf16.mxu0 %v5304_v45  ;;  %v5340_v42 = vld [vmem:[%s6736_s3 + $0x7ac] ss:$16 sps:$4 sm:$0xff]  }
 0x1fe   :  { %v1449_v59 = vadd.f32 %v1402_v51, %v1221_v30  ;;  %3816 = vmatprep.mubr.bf16.mxu0 %v5376_v29  ;;  %v5332_v30 = vld [vmem:[%s6736_s3 + $0x7e8] ss:$16 sps:$4 sm:$0xff]  }
 0x1ff   :  { %v1094_v61 = vpop.f32.mrf.mxu1  ;;  %v1404_v62 = vpop.f32.mrf.mxu0  ;;  %4571 = vmatmul.mubr.msk.bf16.vlgmr.msra.gmra.mxu1 %vm570_vm0, %v6400_v33  ;;  %v5316_v33 = vld [vmem:[%s6736_s3 + $0x784] ss:$16 sps:$4 sm:$0xff]  }
 0x200   :  { %3462 = vmatpush1.bf16.msra.mxu1 %v5299_v48  ;;  %3795 = vmatpush1.bf16.msra.mxu0 %v5302_v44 }
 0x201   :  { %v1096_v50 = vpop.f32.mrf.mxu1  ;;  %v1405_v47 = vpop.f32.mrf.mxu0  ;;  %3463 = vmatprep.subr.bf16.mxu1 %v5307_v55  ;;  %3796 = vmatprep.subr.bf16.mxu0 %v5310_v56 }
 0x202   :  { %3485 = vmatprep.mubr.bf16.mxu1 %v5376_v29  ;;  %v5345_v47 = vld [vmem:[%s6738_s5 + $0x38] sm:$0xff]  }
 0x203   :  { %v1098_v37 = vpop.f32.mrf.mxu1 }
 0x204   :  { %3464 = vmatpush1.bf16.msra.mxu1 %v5305_v63  ;;  %3797 = vmatpush1.bf16.msra.mxu0 %v5308_v43 }
 0x205   :  { %v1099_v54 = vpop.f32.mrf.mxu1  ;;  %3465 = vmatprep.subr.bf16.mxu1 %v5313_v39  ;;  %3798 = vmatprep.subr.bf16.mxu0 %v5316_v33  ;;  %v5346_v39 = vld [vmem:[%s6738_s5 + $0x70] sm:$0xff]  }
 0x206   :  { %v5347_v33 = vld [vmem:[%s6738_s5 + $0x30] sm:$0xff]  }
 0x208   :  { %3466 = vmatpush1.bf16.msra.mxu1 %v5311_v34  ;;  %3799 = vmatpush1.bf16.msra.mxu0 %v5314_v0 }
 0x209   :  { %3467 = vmatprep.subr.bf16.mxu1 %v5319_v2  ;;  %v5349_v2 = vld [vmem:[%s6738_s5 + $0x28] sm:$0xff]  }
 0x20b   :  { %v1586_v52 = vpop.f32.mrf.mxu0  ;;  %4624 = vmatmul.mubr.msk.bf16.vlgmr.msra.gmra.mxu0 %vm570_vm0, %v6569_v4 }
 0x20c   :  { %v1634_v7 = vadd.f32 %v1586_v52, %v1448_v32  ;;  %3468 = vmatpush1.bf16.msra.mxu1 %v5317_v58  ;;  %v5341_v32 = vld [vmem:[%s6736_s3 + $0x788] ss:$16 sps:$4 sm:$0xff]  }
 0x20d   :  { %v1588_v8 = vpop.f32.mrf.mxu0  ;;  %3647 = vmatprep.subr.bf16.mxu1 %v5322_v9 }
 0x20e   :  { %v1635_v12 = vadd.f32 %v1588_v8, %v1449_v59 }
 0x20f   :  { %v1259_v13 = vpop.f32.mrf.mxu1  ;;  %v1590_v15 = vpop.f32.mrf.mxu0  ;;  %4589 = vmatmul.mubr.msk.bf16.vlgmr.msra.gmra.mxu1 %vm570_vm0, %v6459_v3  ;;  %v5326_v3 = vld [vmem:[%s6736_s3 + $0x728] ss:$16 sps:$4 sm:$0xff]  }
 0x210   :  { %v1260_v16 = vadd.f32 %v1259_v13, %v1094_v61  ;;  %3648 = vmatpush1.bf16.msra.mxu1 %v5320_v6  ;;  %3671 = vmatprep.mubr.bf16.mxu1 %v5376_v29  ;;  %v5350_v6 = vld [vmem:[%s6738_s5 + $0x60] sm:$0xff]   ;;  %v5352_v15 = vld [vmem:[%s6738_s5 + $0x58] sm:$0xff]  }
 0x211   :  { %v1261_v1 = vpop.f32.mrf.mxu1  ;;  %v1591_v22 = vpop.f32.mrf.mxu0  ;;  %3649 = vmatprep.subr.bf16.mxu1 %v5325_v10  ;;  %v5351_v10 = vld [vmem:[%s6738_s5 + $0x20] sm:$0xff]  }
 0x212   :  { %v1262_v25 = vadd.f32 %v1261_v1, %v1096_v50  ;;  %v5344_v50 = vld [vmem:[%s6738_s5 + $0x78] sm:$0xff]   ;;  %v5355_v1 = vld [vmem:[%s6738_s5 + $0x10] sm:$0xff]  }
 0x213   :  { %v1263_v26 = vpop.f32.mrf.mxu1  ;;  %4799 = vmatprep.subr.bf16.mxu0 %v5344_v50 }
 0x214   :  { %3650 = vmatpush1.bf16.msra.mxu1 %v5323_v19  ;;  %4800 = vmatpush3.bf16.msra.mxu0 %v5345_v47  ;;  %v5354_v19 = vld [vmem:[%s6738_s5 + $0x50] sm:$0xff]   ;;  %v5356_v26 = vld [vmem:[%s6738_s5 + $0x48] sm:$0xff]  }
 0x215   :  { %v1264_v27 = vpop.f32.mrf.mxu1  ;;  %3651 = vmatprep.subr.bf16.mxu1 %v5328_v24  ;;  %4801 = vmatprep.subr.bf16.mxu0 %v5346_v39  ;;  %v5370_v47 = vld [vmem:[%s6738_s5 + $0xd0] sm:$0xff]  }
 0x216   :  { %v5357_v27 = vld [vmem:[%s6738_s5 + $0x8] sm:$0xff]  }
 0x218   :  { %3652 = vmatpush1.bf16.msra.mxu1 %v5326_v3  ;;  %4802 = vmatpush3.bf16.msra.mxu0 %v5347_v33  ;;  %v5371_v33 = vld [vmem:[%s6738_s5 + $0x90] sm:$0xff]  }
 0x219   :  { %3653 = vmatprep.subr.bf16.mxu1 %v5331_v57  ;;  %4803 = vmatprep.subr.bf16.mxu0 %v5348_v53 }
 0x21b   :  { %v1772_v17 = vpop.f32.mrf.mxu0 }
 0x21c   :  { %v1820_v40 = vadd.f32 %v1772_v17, %v1634_v7  ;;  %3654 = vmatpush1.bf16.msra.mxu1 %v5329_v18  ;;  %4804 = vmatpush3.bf16.msra.mxu0 %v5349_v2  ;;  %v5372_v2 = vld [vmem:[%s6738_s5 + $0xc8] sm:$0xff]  }
 0x21d   :  { %v1774_v35 = vpop.f32.mrf.mxu0  ;;  %3833 = vmatprep.subr.bf16.mxu1 %v5334_v28  ;;  %4805 = vmatprep.subr.bf16.mxu0 %v5350_v6  ;;  %v5375_v6 = vld [vmem:[%s6738_s5 + $0x80] sm:$0xff]  }
 0x21e   :  { %v1821_v14 = vadd.f32 %v1774_v35, %v1635_v12 }
 0x21f   :  { %v1441_v23 = vpop.f32.mrf.mxu1  ;;  %v1776_v36 = vpop.f32.mrf.mxu0  ;;  %4607 = vmatmul.mubr.msk.bf16.vlgmr.msra.gmra.mxu1 %vm570_vm0, %v6517_v41  ;;  %v5338_v41 = vld [vmem:[%s6736_s3 + $0x7a8] ss:$16 sps:$4 sm:$0xff]  }
 0x220   :  { %v1450_v38 = vadd.f32 %v1441_v23, %v1260_v16  ;;  %3834 = vmatpush1.bf16.msra.mxu1 %v5332_v30  ;;  %3857 = vmatprep.mubr.bf16.mxu1 %v5376_v29  ;;  %v5343_v29 = vld [vmem:[%s6736_s3 + $0x78c] ss:$16 sps:$4 sm:$0xff]   ;;  %v5358_v30 = vld [vmem:[%s6738_s5 + $0x40] sm:$0xff]  }
 0x221   :  { %v1443_v49 = vpop.f32.mrf.mxu1  ;;  %v1777_v21 = vpop.f32.mrf.mxu0  ;;  %3835 = vmatprep.subr.bf16.mxu1 %v5337_v11  ;;  %4806 = vmatpush3.bf16.msra.mxu0 %v5351_v10  ;;  %v5353_v16 = vld [vmem:[%s6738_s5 + $0x18] sm:$0xff]   ;;  %v5359_v11 = vld [vmem:[%s6738_s5] sm:$0xff]  }
 0x222   :  { %v1451_v45 = vadd.f32 %v1443_v49, %v1262_v25  ;;  %4807 = vmatprep.subr.bf16.mxu0 %v5352_v15  ;;  %v5360_v36 = vld [vmem:[%s6738_s5 + $0xf8] sm:$0xff]  }
 0x223   :  { %v1445_v46 = vpop.f32.mrf.mxu1 }
 0x224   :  { %3836 = vmatpush1.bf16.msra.mxu1 %v5335_v31  ;;  %v5363_v46 = vld [vmem:[%s6738_s5 + $0xb0] sm:$0xff]  }
 0x225   :  { %v1446_v5 = vpop.f32.mrf.mxu1  ;;  %3837 = vmatprep.subr.bf16.mxu1 %v5340_v42  ;;  %4808 = vmatpush3.bf16.msra.mxu0 %v5353_v16  ;;  %v5362_v42 = vld [vmem:[%s6738_s5 + $0xf0] sm:$0xff]  }
 0x226   :  { %4809 = vmatprep.subr.bf16.mxu0 %v5354_v19 }
 0x228   :  { %3838 = vmatpush1.bf16.msra.mxu1 %v5338_v41 }
 0x229   :  { %3839 = vmatprep.subr.bf16.mxu1 %v5343_v29  ;;  %4810 = vmatpush3.bf16.msra.mxu0 %v5355_v1 }
 0x22a   :  { %4811 = vmatprep.subr.bf16.mxu0 %v5356_v26 }
 0x22b   :  { %v1958_v48 = vpop.f32.mrf.mxu0 }
 0x22c   :  { %v2006_v44 = vadd.f32 %v1958_v48, %v1820_v40  ;;  %3840 = vmatpush1.bf16.msra.mxu1 %v5341_v32 }
 0x22d   :  { %v1960_v51 = vpop.f32.mrf.mxu0  ;;  %4812 = vmatpush3.bf16.msra.mxu0 %v5357_v27  ;;  %4821 = vmatprep.subr.bf16.mxu1 %v5360_v36 }
 0x22e   :  { %v2007_v55 = vadd.f32 %v1960_v51, %v1821_v14  ;;  %4813 = vmatprep.subr.bf16.mxu0 %v5358_v30 }
 0x22f   :  { %v1627_v56 = vpop.f32.mrf.mxu1  ;;  %v1962_v59 = vpop.f32.mrf.mxu0  ;;  %4625 = vmatmul.mubr.msk.bf16.vlgmr.msra.gmra.mxu1 %vm570_vm0, %v6569_v4 }
 0x230   :  { %v1636_v60 = vadd.f32 %v1627_v56, %v1450_v38  ;;  %v5361_v38 = vld [vmem:[%s6738_s5 + $0xb8] sm:$0xff]  }
 0x231   :  { %v1629_v61 = vpop.f32.mrf.mxu1  ;;  %v1963_v62 = vpop.f32.mrf.mxu0  ;;  %4814 = vmatpush3.bf16.msra.mxu0 %v5359_v11  ;;  %4822 = vmatpush3.bf16.msra.mxu1 %v5361_v38 }
 0x232   :  { %v1637_v63 = vadd.f32 %v1629_v61, %v1451_v45  ;;  %4823 = vmatprep.subr.bf16.mxu1 %v5362_v42  ;;  %v5367_v61 = vld [vmem:[%s6738_s5 + $0xa0] sm:$0xff]   ;;  %v5368_v62 = vld [vmem:[%s6738_s5 + $0xd8] sm:$0xff]  }
 0x233   :  { %v1631_v43 = vpop.f32.mrf.mxu1 }
 0x235   :  { %v1632_v20 = vpop.f32.mrf.mxu1  ;;  %4824 = vmatpush3.bf16.msra.mxu1 %v5363_v46 }
 0x23b   :  { %v2144_v37 = vpop.f32.mrf.mxu0 }
 0x23c   :  { %v2192_v34 = vadd.f32 %v2144_v37, %v2006_v44  ;;  %v5364_v44 = vld [vmem:[%s6738_s5 + $0xe8] sm:$0xff]  }
 0x23d   :  { %v2146_v0 = vpop.f32.mrf.mxu0  ;;  %4825 = vmatprep.subr.bf16.mxu1 %v5364_v44 }
 0x23e   :  { %v2193_v54 = vadd.f32 %v2146_v0, %v2007_v55  ;;  %v5365_v55 = vld [vmem:[%s6738_s5 + $0xa8] sm:$0xff]  }
 0x23f   :  { %v1813_v58 = vpop.f32.mrf.mxu1  ;;  %v2148_v4 = vpop.f32.mrf.mxu0  ;;  %4826 = vmatpush3.bf16.msra.mxu1 %v5365_v55 }
 0x240   :  { %v1822_v9 = vadd.f32 %v1813_v58, %v1636_v60  ;;  %v5366_v60 = vld [vmem:[%s6738_s5 + $0xe0] sm:$0xff]   ;;  %v5373_v4 = vld [vmem:[%s6738_s5 + $0x88] sm:$0xff]  }
 0x241   :  { %v1815_v52 = vpop.f32.mrf.mxu1  ;;  %v2149_v7 = vpop.f32.mrf.mxu0  ;;  %4827 = vmatprep.subr.bf16.mxu1 %v5366_v60  ;;  %v3872_v60 = vlaneseq }
 0x242   :  { %v1823_v8 = vadd.f32 %v1815_v52, %v1637_v63  ;;  %v5369_v63 = vld [vmem:[%s6738_s5 + $0x98] sm:$0xff]   ;;  %v5374_v7 = vld [vmem:[%s6738_s5 + $0xc0] sm:$0xff]  }
 0x243   :  { %v1817_v12 = vpop.f32.mrf.mxu1  ;;  %4828 = vmatpush3.bf16.msra.mxu1 %v5367_v61 }
 0x244   :  { %4829 = vmatprep.subr.bf16.mxu1 %v5368_v62 }
 0x245   :  { %v1818_v13 = vpop.f32.mrf.mxu1 }
 0x247   :  { %4830 = vmatpush3.bf16.msra.mxu1 %v5369_v63 }
 0x248   :  { %4831 = vmatprep.subr.bf16.mxu1 %v5370_v47 }
 0x24b   :  { %v2330_v22 = vpop.f32.mrf.mxu0  ;;  %4832 = vmatpush3.bf16.msra.mxu1 %v5371_v33 }
 0x24c   :  { %v2378_v24 = vadd.f32 %v2330_v22, %v2192_v34  ;;  %4833 = vmatprep.subr.bf16.mxu1 %v5372_v2 }
 0x24d   :  { %v2332_v25 = vpop.f32.mrf.mxu0 }
 0x24e   :  { %v2379_v3 = vadd.f32 %v2332_v25, %v2193_v54 }
 0x24f   :  { %v1999_v57 = vpop.f32.mrf.mxu1  ;;  %v2334_v18 = vpop.f32.mrf.mxu0  ;;  %4834 = vmatpush3.bf16.msra.mxu1 %v5373_v4 }
 0x250   :  { %v2008_v28 = vadd.f32 %v1999_v57, %v1822_v9  ;;  %4835 = vmatprep.subr.bf16.mxu1 %v5374_v7 }
 0x251   :  { %v2001_v17 = vpop.f32.mrf.mxu1  ;;  %v2335_v40 = vpop.f32.mrf.mxu0 }
 0x252   :  { %v2009_v35 = vadd.f32 %v2001_v17, %v1823_v8 }
 0x253   :  { %v2003_v14 = vpop.f32.mrf.mxu1  ;;  %4836 = vmatpush3.bf16.msra.mxu1 %v5375_v6 }
 0x255   :  { %v2004_v23 = vpop.f32.mrf.mxu1 }
 0x25b   :  { %v2516_v31 = vpop.f32.mrf.mxu0 }
 0x25c   :  { %v2564_v49 = vadd.f32 %v2516_v31, %v2378_v24 }
 0x25d   :  { %v2518_v21 = vpop.f32.mrf.mxu0 }
 0x25e   :  { %v2565_v45 = vadd.f32 %v2518_v21, %v2379_v3 }
 0x25f   :  { %v2185_v41 = vpop.f32.mrf.mxu1  ;;  %v2520_v5 = vpop.f32.mrf.mxu0 }
 0x260   :  { %v2194_v29 = vadd.f32 %v2185_v41, %v2008_v28 }
 0x261   :  { %v2187_v32 = vpop.f32.mrf.mxu1  ;;  %v2521_v48 = vpop.f32.mrf.mxu0 }
 0x262   :  { %v2195_v51 = vadd.f32 %v2187_v32, %v2009_v35 }
 0x263   :  { %v2189_v56 = vpop.f32.mrf.mxu1 }
 0x265   :  { %v2190_v59 = vpop.f32.mrf.mxu1 }
 0x26b   :  { %v2702_v43 = vpop.f32.mrf.mxu0 }
 0x26c   :  { %v2750_v20 = vadd.f32 %v2702_v43, %v2564_v49 }
 0x26d   :  { %v2704_v50 = vpop.f32.mrf.mxu0 }
 0x26e   :  { %v2751_v39 = vadd.f32 %v2704_v50, %v2565_v45 }
 0x26f   :  { %v2371_v37 = vpop.f32.mrf.mxu1  ;;  %v2706_v34 = vpop.f32.mrf.mxu0 }
 0x270   :  { %v2380_v0 = vadd.f32 %v2371_v37, %v2194_v29 }
 0x271   :  { %v2373_v53 = vpop.f32.mrf.mxu1  ;;  %v2707_v54 = vpop.f32.mrf.mxu0 }
 0x272   :  { %v2381_v58 = vadd.f32 %v2373_v53, %v2195_v51 }
 0x273   :  { %v2375_v9 = vpop.f32.mrf.mxu1 }
 0x275   :  { %v2376_v52 = vpop.f32.mrf.mxu1 }
 0x27b   :  { %v2888_v8 = vpop.f32.mrf.mxu0 }
 0x27c   :  { %v2936_v10 = vadd.f32 %v2888_v8, %v2750_v20  ;;  %v3873_v20 = vshrl.u32 %v3872_v60, 7 }
 0x27d   :  { %v2890_v12 = vpop.f32.mrf.mxu0 }
 0x27e   :  { %v2937_v13 = vadd.f32 %v2890_v12, %v2751_v39  ;;  %v3874_v34 = vsub.s32 0, %v3873_v20  ;;  %v3878_v2 = vsub.s32 1, %v3873_v20 }
 0x27f   :  { %v2557_v15 = vpop.f32.mrf.mxu1  ;;  %v2892_v16 = vpop.f32.mrf.mxu0 }
 0x280   :  { %v2566_v19 = vadd.f32 %v2557_v15, %v2380_v0  ;;  %v3870_v0 = vld [vmem:[%s6739_s4] sm:$0xf] }
 0x281   :  { %v2559_v1 = vpop.f32.mrf.mxu1  ;;  %v2893_v22 = vpop.f32.mrf.mxu0  ;;  %v3875_v9 = vrot.slane %v3870_v0, %v3874_v34  ;;  %v3879_v8 = vrot.slane %v3870_v0, %v3878_v2 }
 0x282   :  { %v2567_v24 = vadd.f32 %v2559_v1, %v2381_v58 }
 0x283   :  { %v2561_v25 = vpop.f32.mrf.mxu1 }
 0x285   :  { %v2562_v26 = vpop.f32.mrf.mxu1 }
 0x28b   :  { %v3074_v3 = vpop.f32.mrf.mxu0 }
 0x28c   :  { %v3122_v47 = vadd.f32 %v3074_v3, %v2936_v10 }
 0x28d   :  { %v3076_v27 = vpop.f32.mrf.mxu0 }
 0x28e   :  { %v3123_v33 = vadd.f32 %v3076_v27, %v2937_v13 }
 0x28f   :  { %v2743_v57 = vpop.f32.mrf.mxu1  ;;  %v3078_v18 = vpop.f32.mrf.mxu0 }
 0x290   :  { %v2752_v28 = vadd.f32 %v2743_v57, %v2566_v19 }
 0x291   :  { %v2745_v17 = vpop.f32.mrf.mxu1  ;;  %v3079_v40 = vpop.f32.mrf.mxu0 }
 0x292   :  { %v2753_v30 = vadd.f32 %v2745_v17, %v2567_v24 }
 0x293   :  { %v2747_v35 = vpop.f32.mrf.mxu1 }
 0x295   :  { %v2748_v11 = vpop.f32.mrf.mxu1 }
 0x29b   :  { %v3260_v14 = vpop.f32.mrf.mxu0 }
 0x29c   :  { %v3308_v37 = vadd.f32 %v3260_v14, %v3122_v47  ;;  %v3882_v14 = vsub.s32 2, %v3873_v20 }
 0x29d   :  { %v3262_v23 = vpop.f32.mrf.mxu0 }
 0x29e   :  { %v3309_v53 = vadd.f32 %v3262_v23, %v3123_v33 }
 0x29f   :  { %v2929_v36 = vpop.f32.mrf.mxu1  ;;  %v3264_v38 = vpop.f32.mrf.mxu0 }
 0x2a0   :  { %v2938_v31 = vadd.f32 %v2929_v36, %v2752_v28  ;;  %v3886_v38 = vsub.s32 3, %v3873_v20 }
 0x2a1   :  { %v2931_v49 = vpop.f32.mrf.mxu1  ;;  %v3265_v21 = vpop.f32.mrf.mxu0 }
 0x2a2   :  { %v2939_v42 = vadd.f32 %v2931_v49, %v2753_v30 }
 0x2a3   :  { %v2933_v45 = vpop.f32.mrf.mxu1 }
 0x2a4   :  { %v3883_v45 = vrot.slane %v3870_v0, %v3882_v14 }
 0x2a5   :  { %v2934_v46 = vpop.f32.mrf.mxu1 }
 0x2ab   :  { %v3446_v41 = vpop.f32.mrf.mxu0 }
 0x2ac   :  { %v3494_v54 = vadd.f32 %v3446_v41, %v3308_v37 }
 0x2ad   :  { %v3448_v5 = vpop.f32.mrf.mxu0 }
 0x2ae   :  { %v3495_v58 = vadd.f32 %v3448_v5, %v3309_v53 }
 0x2af   :  { %v3115_v29 = vpop.f32.mrf.mxu1  ;;  %v3450_v32 = vpop.f32.mrf.mxu0 }
 0x2b0   :  { %v3124_v30 = vadd.f32 %v3115_v29, %v2938_v31  ;;  %v3887_v32 = vrot.slane %v3870_v0, %v3886_v38 }
 0x2b1   :  { %v3117_v48 = vpop.f32.mrf.mxu1  ;;  %v3451_v44 = vpop.f32.mrf.mxu0 }
 0x2b2   :  { %v3125_v35 = vadd.f32 %v3117_v48, %v2939_v42 }
 0x2b3   :  { %v3119_v51 = vpop.f32.mrf.mxu1 }
 0x2b5   :  { %v3120_v55 = vpop.f32.mrf.mxu1 }
 0x2bb   :  { %v3632_v56 = vpop.f32.mrf.mxu0 }
 0x2bc   :  { %v3680_v4 = vadd.f32 %v3632_v56, %v3494_v54 }
 0x2bd   :  { %v3634_v59 = vpop.f32.mrf.mxu0 }
 0x2be   :  { %v3681_v7 = vadd.f32 %v3634_v59, %v3495_v58 }
 0x2bf   :  { %v3301_v61 = vpop.f32.mrf.mxu1  ;;  %v3636_v62 = vpop.f32.mrf.mxu0 }
 0x2c0   :  { %v3310_v11 = vadd.f32 %v3301_v61, %v3124_v30 }
 0x2c1   :  { %v3303_v63 = vpop.f32.mrf.mxu1  ;;  %v3637_v43 = vpop.f32.mrf.mxu0 }
 0x2c2   :  { %v3311_v23 = vadd.f32 %v3303_v63, %v3125_v35 }
 0x2c3   :  { %v3305_v50 = vpop.f32.mrf.mxu1 }
 0x2c4   :  { %v4626_v50 = vld [vmem:[%s6740_s6] ss:$0 sm:$0xff] }
 0x2c5   :  { %v3306_v39 = vpop.f32.mrf.mxu1 }
 0x2cb   :  { %v3818_v52 = vpop.f32.mrf.mxu0 }
 0x2cc   :  { %v3866_v6 = vadd.f32 %v3818_v52, %v3680_v4 }
 0x2cd   :  { %v3820_v12 = vpop.f32.mrf.mxu0 }
 0x2ce   :  { %v3892_v10 = vadd.f32 %v3875_v9, %v3866_v6  ;;  %v3867_v15 = vadd.f32 %v3820_v12, %v3681_v7 }
 0x2cf   :  { %v3487_v13 = vpop.f32.mrf.mxu1  ;;  %v3822_v16 = vpop.f32.mrf.mxu0 }
 0x2d0   :  { %v3893_v19 = vadd.f32 %v3879_v8, %v3867_v15  ;;  %v3896_v1 = vmax.f32 %v3892_v10, 0.0  ;;  %v3496_v36 = vadd.f32 %v3487_v13, %v3310_v11 }
 0x2d1   :  { %v3489_v22 = vpop.f32.mrf.mxu1  ;;  %v3823_v24 = vpop.f32.mrf.mxu0 }
 0x2d2   :  { %v3897_v25 = vmax.f32 %v3893_v19, 0.0  ;;  %v3900_v27 = vpack.c.bf16 %v3896_v1, %v3896_v1  ;;  %v3497_v49 = vadd.f32 %v3489_v22, %v3311_v23 }
 0x2d3   :  { %v3491_v26 = vpop.f32.mrf.mxu1 }
 0x2d4   :  { %v3901_v3 = vpack.c.bf16 %v3897_v25, %v3897_v25 }
 0x2d5   :  { %v3492_v57 = vpop.f32.mrf.mxu1 }
 0x2d6   :  { %4199 = vmatprep.mubr.bf16.mxu0 %v3901_v3 }
 0x2d7   :  { %4200 = vmatmul.mubr.bf16.vlgmr.msra.gmra.mxu0 %v3900_v27 }
 0x2df   :  { %v3673_v18 = vpop.f32.mrf.mxu1 }
 0x2e0   :  { %v3682_v21 = vadd.f32 %v3673_v18, %v3496_v36 }
 0x2e1   :  { %v3675_v28 = vpop.f32.mrf.mxu1 }
 0x2e2   :  { %v3683_v41 = vadd.f32 %v3675_v28, %v3497_v49 }
 0x2e3   :  { %v3677_v17 = vpop.f32.mrf.mxu1 }
 0x2e5   :  { %v3678_v40 = vpop.f32.mrf.mxu1 }
 0x2ef   :  { %v3859_v46 = vpop.f32.mrf.mxu1 }
 0x2f0   :  { %v3868_v5 = vadd.f32 %v3859_v46, %v3682_v21 }
 0x2f1   :  { %v3861_v44 = vpop.f32.mrf.mxu1 }
 0x2f2   :  { %v3894_v51 = vadd.f32 %v3883_v45, %v3868_v5  ;;  %v3869_v55 = vadd.f32 %v3861_v44, %v3683_v41 }
 0x2f3   :  { %v3863_v56 = vpop.f32.mrf.mxu1 }
 0x2f4   :  { %v3895_v59 = vadd.f32 %v3887_v32, %v3869_v55  ;;  %v3898_v60 = vmax.f32 %v3894_v51, 0.0 }
 0x2f5   :  { %v3864_v31 = vpop.f32.mrf.mxu1 }
 0x2f6   :  { %v3899_v42 = vmax.f32 %v3895_v59, 0.0  ;;  %v3902_v48 = vpack.c.bf16 %v3898_v60, %v3898_v60 }
 0x2f8   :  { %v3903_v29 = vpack.c.bf16 %v3899_v42, %v3899_v42 }
 0x2fa   :  { %4239 = vmatprep.mubr.bf16.mxu1 %v3903_v29 }
 0x2fb   :  { %4240 = vmatmul.mubr.bf16.vlgmr.msra.gmra.mxu1 %v3902_v48 }
 0x397   :  { %v4815_v61 = vpop.f32.mrf.mxu0 }
 0x399   :  { %v4816_v62 = vpop.f32.mrf.mxu0 }
 0x39a   :  { %v4817_v20 = vadd.f32 %v4816_v62, %v4815_v61 }
 0x39b   :  { %v4818_v63 = vpop.f32.mrf.mxu0 }
 0x39c   :  { %v4202_v33 = vadd.f32 %v4817_v20, %v4626_v50 }
 0x39d   :  { %v4819_v43 = vpop.f32.mrf.mxu0 }
 0x3bb   :  { %v4837_v47 = vpop.f32.mrf.mxu1 }
 0x3bd   :  { %v4838_v39 = vpop.f32.mrf.mxu1 }
 0x3be   :  { %v4839_v37 = vadd.f32 %v4838_v39, %v4837_v47 }
 0x3bf   :  { %v4840_v34 = vpop.f32.mrf.mxu1 }
 0x3c0   :  { %v4242_v0 = vadd.f32 %v4839_v37, %v4202_v33 }
 0x3c1   :  { %v4841_v53 = vpop.f32.mrf.mxu1 }
 0x3c2   :  { %4248 = vst.msk [vmem:[%s6741_s7] sm:$0xff] %vm4247_vm1, %v4242_v0 }

</bundles_post_ra>
